<compile_context>
chip_gen: v6e
topology: v6e:2x2x1
jax: 0.10.0
libtpu: 0.0.40
codegen_flags: <defaults>
</compile_context>

<pallas_src>
import functools
import math

import jax
import jax.numpy as jnp
from jax.experimental import pallas as pl
from jax.experimental.pallas import tpu as pltpu


def block_kernel(x_ref,
                 ln1w_ref, ln1b_ref,
                 wq_ref, bq_ref,
                 wkv_ref, bkv_ref,
                 wprojh_ref, bproj_ref,
                 ln2w_ref, ln2b_ref,
                 w1_ref, b1_ref,
                 w2_ref, b2_ref,
                 out_ref,
                 q_sc, k_sc, v_sc,
                 *, heads, q_tile, kv_chunk, bf16_softmax, eps=1e-5):
    t = pl.program_id(1)
    N, C = x_ref.shape
    hd = C // heads
    bf16 = jnp.bfloat16

    def layernorm(v, w, b):
        v = v.astype(jnp.float32)
        mu = jnp.mean(v, axis=-1, keepdims=True)
        var = jnp.mean((v - mu) ** 2, axis=-1, keepdims=True)
        return (v - mu) * jax.lax.rsqrt(var + eps) * w + b

    # ---- K/V for the whole sequence: computed once per batch element, in
    # ---- kv_chunk-row chunks (bounds the live intermediate to (chunk, 2C)). --
    @pl.when(t == 0)
    def _():
        for c0 in range(0, N, kv_chunk):
            xn = layernorm(x_ref[c0:c0 + kv_chunk, :], ln1w_ref[...], ln1b_ref[...])
            kv = jnp.dot(xn.astype(bf16), wkv_ref[...],
                         preferred_element_type=jnp.float32) + bkv_ref[...]   # (chunk, 2C) f32
            # Head-major scratch stores: pure data movement, matmuls stay batched.
            for h in range(heads):
                k_sc[h, c0:c0 + kv_chunk, :] = kv[:, h * hd:(h + 1) * hd].astype(bf16)
                v_sc[h, c0:c0 + kv_chunk, :] = kv[:, C + h * hd:C + (h + 1) * hd].astype(bf16)

    # ---- this q-tile --------------------------------------------------------
    row0 = t * q_tile
    if q_tile % 16 == 0:
        row0 = pl.multiple_of(row0, 16)
    elif q_tile % 8 == 0:
        row0 = pl.multiple_of(row0, 8)
    x_t = x_ref[pl.ds(row0, q_tile), :].astype(jnp.float32)                   # (TQ, C)

    # Q computed per tile (softmax scale pre-folded into wq/bq at trace time).
    xn1 = layernorm(x_t, ln1w_ref[...], ln1b_ref[...])
    qf = jnp.dot(xn1.astype(bf16), wq_ref[...],
                 preferred_element_type=jnp.float32) + bq_ref[...]            # (TQ, C) f32
    for h in range(heads):
        q_sc[h] = qf[:, h * hd:(h + 1) * hd].astype(bf16)                     # (heads, TQ, hd)

    qh = q_sc[...]                                                            # (heads, TQ, hd) bf16
    k = k_sc[...]                                                             # (heads, N, hd)  bf16
    v = v_sc[...]                                                             # (heads, N, hd)  bf16

    s = jnp.einsum('hqd,hkd->hqk', qh, k,
                   preferred_element_type=jnp.float32)                        # (heads, TQ, N) f32
    m = jnp.max(s, axis=-1, keepdims=True)
    if bf16_softmax:
        # v6e/v7x: bf16 EUP exp over the big (heads, TQ, N) tensor; s - m <= 0
        # and p is cast to bf16 for the PV matmul anyway.
        p = jnp.exp((s - m).astype(bf16))
        l = jnp.sum(p.astype(jnp.float32), axis=-1, keepdims=True)
    else:
        # v5e: no bf16 VPU/EUP path -> keep f32.
        p = jnp.exp(s - m)
        l = jnp.sum(p, axis=-1, keepdims=True)
    ctx = jnp.einsum('hqk,hkd->hqd', p.astype(bf16), v,
                     preferred_element_type=jnp.float32)                      # (heads, TQ, hd) f32
    ctx = ctx * pl.reciprocal(l, approx=True)                                 # deferred softmax normalization

    # Output projection fused with head reassembly: y = sum_h ctx[h] @ Wproj[h]
    # (Wproj pre-reshaped to (heads, hd, C)); no ctx scratch round trip.
    y = jnp.dot(ctx[0].astype(bf16), wprojh_ref[0],
                preferred_element_type=jnp.float32)
    for h in range(1, heads):
        y = y + jnp.dot(ctx[h].astype(bf16), wprojh_ref[h],
                        preferred_element_type=jnp.float32)
    y = y + bproj_ref[...]                                                    # (TQ, C) f32

    x1 = x_t + y                                                              # first residual

    # ---- MLP ----------------------------------------------------------------
    xn2 = layernorm(x1, ln2w_ref[...], ln2b_ref[...])
    h1 = jnp.dot(xn2.astype(bf16), w1_ref[...],
                 preferred_element_type=jnp.float32) + b1_ref[...]
    h1 = 0.5 * h1 * (1.0 + jax.lax.erf(h1 * (1.0 / math.sqrt(2.0))))          # exact (erf) GELU, f32
    h2 = jnp.dot(h1.astype(bf16), w2_ref[...],
                 preferred_element_type=jnp.float32) + b2_ref[...]

    out_ref[...] = (x1 + h2).astype(out_ref.dtype)                            # second residual


def _tpu_config():
    """Generation-aware knobs: (vmem_limit_bytes, q_tile_target, bf16_softmax)."""
    kind = ""
    try:
        kind = jax.devices()[0].device_kind.lower()
    except Exception:
        pass
    vmem_phys = None
    try:
        vmem_phys = int(pltpu.get_tpu_info().vmem_capacity_bytes)
    except Exception:
        vmem_phys = None
    if vmem_phys is None:
        # v7x-class parts have 64 MiB VMEM per TensorCore; v5e/v6e have 128 MiB.
        vmem_phys = (64 if ("7x" in kind or "v7" in kind) else 128) * 1024 * 1024
    small_vmem = vmem_phys <= 64 * 1024 * 1024
    vmem_limit = (48 if small_vmem else 96) * 1024 * 1024
    q_target = 128 if small_vmem else 256
    # bf16 VPU/EUP exists on v6e and later; v5e (and older) lack it.
    bf16_softmax = any(tag in kind for tag in ("v6", "v7", "7x"))
    return vmem_limit, q_target, bf16_softmax


def _pick_q_tile(n, target):
    """Largest divisor of n <= target, preferring multiples of 16, then 8."""
    if n <= target:
        return n
    for step in (16, 8):
        t = (target // step) * step
        while t >= step:
            if n % t == 0:
                return t
            t -= step
    return n


def block_forward(x, params, *, heads, q_tile=None, interpret=False):
    B, N, C = x.shape
    assert C % heads == 0
    hd = C // heads
    mlp_dim = params["w1"].shape[1]

    vmem_limit, q_target, bf16_softmax = _tpu_config()

    if q_tile is None:
        q_tile = _pick_q_tile(N, q_target)
    assert N % q_tile == 0, "q_tile must divide the sequence length"
    nt = N // q_tile
    kv_chunk = q_tile

    # Fold the 1/sqrt(head_dim) softmax scale into the Q projection at trace
    # time; split the QKV projection into Q and KV halves (Q is per-tile now).
    scale = float(hd) ** -0.5
    w_qkv = params["w_qkv"].astype(jnp.float32)
    b_qkv = params["b_qkv"].astype(jnp.float32)
    w_q, w_kv = w_qkv[:, :C] * scale, w_qkv[:, C:]
    b_q, b_kv = b_qkv[:, :C] * scale, b_qkv[:, C:]
    # w_proj reshaped head-major for the fused per-head output projection.
    w_proj_h = params["w_proj"].astype(jnp.float32).reshape(heads, hd, C)

    bf16 = jnp.bfloat16
    f32 = jnp.float32
    weight_args = [
        params["ln1_w"].astype(f32), params["ln1_b"].astype(f32),
        w_q.astype(bf16), b_q,                                   # matmul weights bf16, biases f32
        w_kv.astype(bf16), b_kv,
        w_proj_h.astype(bf16), params["b_proj"].astype(f32),
        params["ln2_w"].astype(f32), params["ln2_b"].astype(f32),
        params["w1"].astype(bf16), params["b1"].astype(f32),
        params["w2"].astype(bf16), params["b2"].astype(f32),
    ]
    weight_bytes = sum(int(a.size) * jnp.dtype(a.dtype).itemsize for a in weight_args)
    scratch_bytes = (heads * q_tile * hd + 2 * heads * N * hd) * 2
    io_bytes = 2 * (N * C * 4) + 2 * (q_tile * C * 4)            # x block + out block, double-buffered

    cost = pl.CostEstimate(
        flops=int(B * N * (8 * C * C + 4 * C * mlp_dim) + 4 * B * N * N * C),
        transcendentals=int(B * heads * N * N + B * N * mlp_dim),
        bytes_accessed=int(2 * B * N * C * 4 + weight_bytes),
    )

    def weight_spec(arr, single_buffer):
        nd = arr.ndim
        if single_buffer:
            # Constant index_map -> fetched once; single-buffering halves the
            # weight VMEM footprint (matters most under v7x's 64 MiB VMEM).
            return pl.BlockSpec(arr.shape, lambda b, t, _nd=nd: (0,) * _nd,
                                pipeline_mode=pl.Buffered(1))
        return pl.BlockSpec(arr.shape, lambda b, t, _nd=nd: (0,) * _nd)

    def build(single_buffer_weights):
        if not single_buffer_weights:
            # Hardened fallback: don't silently accept a doubled weight footprint.
            need = 2 * weight_bytes + scratch_bytes + io_bytes
            if need > vmem_limit:
                raise ValueError(
                    f"double-buffered weights need ~{need} B of VMEM, over the "
                    f"{vmem_limit} B limit; reduce q_tile or enable pl.Buffered(1)")
        in_specs = [pl.BlockSpec((None, N, C), lambda b, t: (b, 0, 0))]
        in_specs += [weight_spec(a, single_buffer_weights) for a in weight_args]
        return pl.pallas_call(
            functools.partial(block_kernel, heads=heads, q_tile=q_tile,
                              kv_chunk=kv_chunk, bf16_softmax=bf16_softmax),
            out_shape=jax.ShapeDtypeStruct((B, N, C), x.dtype),
            grid_spec=pltpu.PrefetchScalarGridSpec(
                num_scalar_prefetch=0,
                grid=(B, nt),
                in_specs=in_specs,
                out_specs=pl.BlockSpec((None, q_tile, C), lambda b, t: (b, t, 0)),
                scratch_shapes=[
                    pltpu.VMEM((heads, q_tile, hd), bf16),   # per-tile Q (scale pre-folded)
                    pltpu.VMEM((heads, N, hd), bf16),        # K (whole sequence)
                    pltpu.VMEM((heads, N, hd), bf16),        # V (whole sequence)
                ]),
            compiler_params=pltpu.CompilerParams(
                dimension_semantics=("parallel", "arbitrary"),
                vmem_limit_bytes=vmem_limit),
            cost_estimate=cost,
            interpret=interpret,
        )(x, *weight_args)

    try:
        return build(True)
    except Exception:
        # pl.Buffered(1) not accepted on this jax/libtpu build.  A genuine
        # tracing/lowering error will re-surface from build(False); the only
        # silently-changed behavior is the weight buffering, which build(False)
        # verifies against the VMEM limit before compiling.
        return build(False)


def init_params(key, dim, heads, mlp_dim):
    ks = jax.random.split(key, 6)
    s = 0.02
    return {
        "ln1_w": jnp.ones((1, dim), jnp.float32),
        "ln1_b": jnp.zeros((1, dim), jnp.float32),
        # stored as (in, out) so kernel does x @ W (equivalent to torch x @ W.T)
        "w_qkv": s * jax.random.normal(ks[0], (dim, 3 * dim), jnp.float32),
        "b_qkv": s * jax.random.normal(ks[1], (1, 3 * dim), jnp.float32),
        "w_proj": s * jax.random.normal(ks[2], (dim, dim), jnp.float32),
        "b_proj": jnp.zeros((1, dim), jnp.float32),
        "ln2_w": jnp.ones((1, dim), jnp.float32),
        "ln2_b": jnp.zeros((1, dim), jnp.float32),
        "w1": s * jax.random.normal(ks[3], (dim, mlp_dim), jnp.float32),
        "b1": s * jax.random.normal(ks[4], (1, mlp_dim), jnp.float32),
        "w2": s * jax.random.normal(ks[5], (mlp_dim, dim), jnp.float32),
        "b2": jnp.zeros((1, dim), jnp.float32),
    }


def block_reference(x, p, *, heads, eps=1e-5):
    """Pure-JAX f32 reference mirroring the PyTorch forward (eval mode)."""
    B, N, C = x.shape
    hd = C // heads

    def ln(v, w, b):
        mu = jnp.mean(v, axis=-1, keepdims=True)
        var = jnp.mean((v - mu) ** 2, axis=-1, keepdims=True)
        return (v - mu) / jnp.sqrt(var + eps) * w + b

    xn = ln(x, p["ln1_w"][0], p["ln1_b"][0])
    qkv = xn @ p["w_qkv"] + p["b_qkv"][0]
    qkv = qkv.reshape(B, N, 3, heads, hd).transpose(2, 0, 3, 1, 4)
    q, k, v = qkv[0], qkv[1], qkv[2]
    attn = jax.nn.softmax((q @ jnp.swapaxes(k, -2, -1)) * (hd ** -0.5), axis=-1)
    y = (attn @ v).transpose(0, 2, 1, 3).reshape(B, N, C)
    y = y @ p["w_proj"] + p["b_proj"][0]
    x = x + y
    xn2 = ln(x, p["ln2_w"][0], p["ln2_b"][0])
    h1 = xn2 @ p["w1"] + p["b1"][0]
    h1 = 0.5 * h1 * (1.0 + jax.lax.erf(h1 / jnp.sqrt(2.0)))
    h2 = h1 @ p["w2"] + p["b2"][0]
    return x + h2


if __name__ == "__main__":
    B, N, C = 2, 16, 32
    heads, mlp_dim = 4, 64

    key = jax.random.PRNGKey(0)
    kx, kp = jax.random.split(key)
    x = jax.random.normal(kx, (B, N, C), jnp.float32)
    params = init_params(kp, C, heads, mlp_dim)

    out = block_forward(x, params, heads=heads, q_tile=8)   # 2 q-tiles per batch element
    out = jax.block_until_ready(out)

    ref = block_reference(x, params, heads=heads)
    assert out.shape == (B, N, C)
    # bf16 MXU operands (f32 accumulation), approx softmax reciprocal and
    # (on v6e/v7x) bf16 softmax exp -> loosened tolerance vs. the f32 reference.
    assert jnp.allclose(out, ref, atol=2e-2, rtol=2e-2), "mismatch vs reference"

    print("KERNEL_OK")
</pallas_src>

<mosaic_0001>
module attributes {stable_mosaic.version = 11 : i64} {
  func.func @block_kernel(%arg0: i32, %arg1: i32, %arg2: memref<1x16x32xf32, #tpu.memory_space<vmem>>, %arg3: memref<1x32xf32, #tpu.memory_space<vmem>>, %arg4: memref<1x32xf32, #tpu.memory_space<vmem>>, %arg5: memref<32x32xbf16, #tpu.memory_space<vmem>>, %arg6: memref<1x32xf32, #tpu.memory_space<vmem>>, %arg7: memref<32x64xbf16, #tpu.memory_space<vmem>>, %arg8: memref<1x64xf32, #tpu.memory_space<vmem>>, %arg9: memref<4x8x32xbf16, #tpu.memory_space<vmem>>, %arg10: memref<1x32xf32, #tpu.memory_space<vmem>>, %arg11: memref<1x32xf32, #tpu.memory_space<vmem>>, %arg12: memref<1x32xf32, #tpu.memory_space<vmem>>, %arg13: memref<32x64xbf16, #tpu.memory_space<vmem>>, %arg14: memref<1x64xf32, #tpu.memory_space<vmem>>, %arg15: memref<64x32xbf16, #tpu.memory_space<vmem>>, %arg16: memref<1x32xf32, #tpu.memory_space<vmem>>, %arg17: memref<1x8x32xf32, #tpu.memory_space<vmem>>, %arg18: memref<4x8x8xbf16, #tpu.memory_space<vmem>>, %arg19: memref<4x16x8xbf16, #tpu.memory_space<vmem>>, %arg20: memref<4x16x8xbf16, #tpu.memory_space<vmem>>) attributes {dimension_semantics = [#tpu.dimension_semantics<parallel>, #tpu.dimension_semantics<arbitrary>], iteration_bounds = array<i64: 2, 2>, scalar_prefetch = 0 : i64, scratch_operands = 3 : i64, tpu.core_type = #tpu.core_type<tc>, window_params = [{transform_indices = @transform_0, window_bounds = array<i64: 1, 16, 32>}, {pipeline_mode = #tpu.pipeline_mode<synchronous>, transform_indices = @transform_1, window_bounds = array<i64: 1, 32>}, {pipeline_mode = #tpu.pipeline_mode<synchronous>, transform_indices = @transform_2, window_bounds = array<i64: 1, 32>}, {pipeline_mode = #tpu.pipeline_mode<synchronous>, transform_indices = @transform_3, window_bounds = array<i64: 32, 32>}, {pipeline_mode = #tpu.pipeline_mode<synchronous>, transform_indices = @transform_4, window_bounds = array<i64: 1, 32>}, {pipeline_mode = #tpu.pipeline_mode<synchronous>, transform_indices = @transform_5, window_bounds = array<i64: 32, 64>}, {pipeline_mode = #tpu.pipeline_mode<synchronous>, transform_indices = @transform_6, window_bounds = array<i64: 1, 64>}, {pipeline_mode = #tpu.pipeline_mode<synchronous>, transform_indices = @transform_7, window_bounds = array<i64: 4, 8, 32>}, {pipeline_mode = #tpu.pipeline_mode<synchronous>, transform_indices = @transform_8, window_bounds = array<i64: 1, 32>}, {pipeline_mode = #tpu.pipeline_mode<synchronous>, transform_indices = @transform_9, window_bounds = array<i64: 1, 32>}, {pipeline_mode = #tpu.pipeline_mode<synchronous>, transform_indices = @transform_10, window_bounds = array<i64: 1, 32>}, {pipeline_mode = #tpu.pipeline_mode<synchronous>, transform_indices = @transform_11, window_bounds = array<i64: 32, 64>}, {pipeline_mode = #tpu.pipeline_mode<synchronous>, transform_indices = @transform_12, window_bounds = array<i64: 1, 64>}, {pipeline_mode = #tpu.pipeline_mode<synchronous>, transform_indices = @transform_13, window_bounds = array<i64: 64, 32>}, {pipeline_mode = #tpu.pipeline_mode<synchronous>, transform_indices = @transform_14, window_bounds = array<i64: 1, 32>}, {transform_indices = @transform_15, window_bounds = array<i64: 1, 8, 32>}]} {
    %c0_i32 = arith.constant 0 : i32
    %0 = arith.cmpi eq, %arg1, %c0_i32 : i32
    %1 = arith.extui %0 : i1 to i32
    %c0_i32_0 = arith.constant 0 : i32
    %2 = arith.cmpi ne, %1, %c0_i32_0 : i32
    scf.if %2 {
      %c0_80 = arith.constant 0 : index
      %c0_81 = arith.constant 0 : index
      %c0_82 = arith.constant 0 : index
      %153 = vector.load %arg2[%c0_80, %c0_81, %c0_82] : memref<1x16x32xf32, #tpu.memory_space<vmem>>, vector<1x8x32xf32>
      %154 = vector.shape_cast %153 : vector<1x8x32xf32> to vector<8x32xf32>
      %c0_83 = arith.constant 0 : index
      %c0_84 = arith.constant 0 : index
      %155 = vector.load %arg3[%c0_83, %c0_84] : memref<1x32xf32, #tpu.memory_space<vmem>>, vector<1x32xf32>
      %c0_85 = arith.constant 0 : index
      %c0_86 = arith.constant 0 : index
      %156 = vector.load %arg4[%c0_85, %c0_86] : memref<1x32xf32, #tpu.memory_space<vmem>>, vector<1x32xf32>
      %cst_87 = arith.constant dense<0.000000e+00> : vector<8xf32>
      %157 = vector.multi_reduction <add>, %154, %cst_87 [1] : vector<8x32xf32> to vector<8xf32>
      %158 = vector.shape_cast %157 : vector<8xf32> to vector<8x1xf32>
      %cst_88 = arith.constant 3.200000e+01 : f32
      %159 = vector.broadcast %cst_88 : f32 to vector<8x1xf32>
      %160 = arith.divf %158, %159 : vector<8x1xf32>
      %161 = vector.broadcast %160 : vector<8x1xf32> to vector<8x32xf32>
      %162 = arith.subf %154, %161 : vector<8x32xf32>
      %163 = arith.mulf %162, %162 : vector<8x32xf32>
      %cst_89 = arith.constant dense<0.000000e+00> : vector<8xf32>
      %164 = vector.multi_reduction <add>, %163, %cst_89 [1] : vector<8x32xf32> to vector<8xf32>
      %165 = vector.shape_cast %164 : vector<8xf32> to vector<8x1xf32>
      %cst_90 = arith.constant 3.200000e+01 : f32
      %166 = vector.broadcast %cst_90 : f32 to vector<8x1xf32>
      %167 = arith.divf %165, %166 : vector<8x1xf32>
      %168 = vector.broadcast %160 : vector<8x1xf32> to vector<8x32xf32>
      %169 = arith.subf %154, %168 : vector<8x32xf32>
      %cst_91 = arith.constant 9.99999974E-6 : f32
      %170 = vector.broadcast %cst_91 : f32 to vector<8x1xf32>
      %171 = arith.addf %167, %170 : vector<8x1xf32>
      %172 = math.rsqrt %171 : vector<8x1xf32>
      %173 = vector.broadcast %172 : vector<8x1xf32> to vector<8x32xf32>
      %174 = arith.mulf %169, %173 : vector<8x32xf32>
      %175 = vector.broadcast %155 : vector<1x32xf32> to vector<8x32xf32>
      %176 = arith.mulf %174, %175 : vector<8x32xf32>
      %177 = vector.broadcast %156 : vector<1x32xf32> to vector<8x32xf32>
      %178 = arith.addf %176, %177 : vector<8x32xf32>
      %179 = arith.truncf %178 : vector<8x32xf32> to vector<8x32xbf16>
      %c0_92 = arith.constant 0 : index
      %c0_93 = arith.constant 0 : index
      %180 = vector.load %arg7[%c0_92, %c0_93] : memref<32x64xbf16, #tpu.memory_space<vmem>>, vector<32x64xbf16>
      %cst_94 = arith.constant dense<0.000000e+00> : vector<8x64xf32>
      %181 = tpu.matmul %179, %180, %cst_94 {dimension_numbers = #tpu.dot_dimension_numbers<[1], [0], [0], [1], [0, 0, 1, 1], [], []>} : vector<8x32xbf16>, vector<32x64xbf16>, vector<8x64xf32> -> vector<8x64xf32>
      %c0_95 = arith.constant 0 : index
      %c0_96 = arith.constant 0 : index
      %182 = vector.load %arg8[%c0_95, %c0_96] : memref<1x64xf32, #tpu.memory_space<vmem>>, vector<1x64xf32>
      %183 = vector.broadcast %182 : vector<1x64xf32> to vector<8x64xf32>
      %184 = arith.addf %181, %183 : vector<8x64xf32>
      %185 = vector.extract_strided_slice %184 {offsets = [0, 0], sizes = [8, 8], strides = [1, 1]} : vector<8x64xf32> to vector<8x8xf32>
      %186 = arith.truncf %185 : vector<8x8xf32> to vector<8x8xbf16>
      %c0_97 = arith.constant 0 : index
      %c0_98 = arith.constant 0 : index
      %c0_99 = arith.constant 0 : index
      %187 = vector.load %arg19[%c0_97, %c0_98, %c0_99] : memref<4x16x8xbf16, #tpu.memory_space<vmem>>, vector<1x8x8xbf16>
      %188 = vector.shape_cast %187 : vector<1x8x8xbf16> to vector<8x8xbf16>
      %189 = vector.shape_cast %186 : vector<8x8xbf16> to vector<1x8x8xbf16>
      tpu.vector_store %arg19[%c0_97, %c0_98, %c0_99], %189 {strides = array<i32>} : memref<4x16x8xbf16, #tpu.memory_space<vmem>>, vector<1x8x8xbf16>,
      %190 = vector.extract_strided_slice %184 {offsets = [0, 32], sizes = [8, 8], strides = [1, 1]} : vector<8x64xf32> to vector<8x8xf32>
      %191 = arith.truncf %190 : vector<8x8xf32> to vector<8x8xbf16>
      %c0_100 = arith.constant 0 : index
      %c0_101 = arith.constant 0 : index
      %c0_102 = arith.constant 0 : index
      %192 = vector.load %arg20[%c0_100, %c0_101, %c0_102] : memref<4x16x8xbf16, #tpu.memory_space<vmem>>, vector<1x8x8xbf16>
      %193 = vector.shape_cast %192 : vector<1x8x8xbf16> to vector<8x8xbf16>
      %194 = vector.shape_cast %191 : vector<8x8xbf16> to vector<1x8x8xbf16>
      tpu.vector_store %arg20[%c0_100, %c0_101, %c0_102], %194 {strides = array<i32>} : memref<4x16x8xbf16, #tpu.memory_space<vmem>>, vector<1x8x8xbf16>,
      %195 = vector.extract_strided_slice %184 {offsets = [0, 8], sizes = [8, 8], strides = [1, 1]} : vector<8x64xf32> to vector<8x8xf32>
      %196 = arith.truncf %195 : vector<8x8xf32> to vector<8x8xbf16>
      %c1_103 = arith.constant 1 : index
      %c0_104 = arith.constant 0 : index
      %c0_105 = arith.constant 0 : index
      %197 = vector.load %arg19[%c1_103, %c0_104, %c0_105] : memref<4x16x8xbf16, #tpu.memory_space<vmem>>, vector<1x8x8xbf16>
      %198 = vector.shape_cast %197 : vector<1x8x8xbf16> to vector<8x8xbf16>
      %199 = vector.shape_cast %196 : vector<8x8xbf16> to vector<1x8x8xbf16>
      tpu.vector_store %arg19[%c1_103, %c0_104, %c0_105], %199 {strides = array<i32>} : memref<4x16x8xbf16, #tpu.memory_space<vmem>>, vector<1x8x8xbf16>,
      %200 = vector.extract_strided_slice %184 {offsets = [0, 40], sizes = [8, 8], strides = [1, 1]} : vector<8x64xf32> to vector<8x8xf32>
      %201 = arith.truncf %200 : vector<8x8xf32> to vector<8x8xbf16>
      %c1_106 = arith.constant 1 : index
      %c0_107 = arith.constant 0 : index
      %c0_108 = arith.constant 0 : index
      %202 = vector.load %arg20[%c1_106, %c0_107, %c0_108] : memref<4x16x8xbf16, #tpu.memory_space<vmem>>, vector<1x8x8xbf16>
      %203 = vector.shape_cast %202 : vector<1x8x8xbf16> to vector<8x8xbf16>
      %204 = vector.shape_cast %201 : vector<8x8xbf16> to vector<1x8x8xbf16>
      tpu.vector_store %arg20[%c1_106, %c0_107, %c0_108], %204 {strides = array<i32>} : memref<4x16x8xbf16, #tpu.memory_space<vmem>>, vector<1x8x8xbf16>,
      %205 = vector.extract_strided_slice %184 {offsets = [0, 16], sizes = [8, 8], strides = [1, 1]} : vector<8x64xf32> to vector<8x8xf32>
      %206 = arith.truncf %205 : vector<8x8xf32> to vector<8x8xbf16>
      %c2_109 = arith.constant 2 : index
      %c0_110 = arith.constant 0 : index
      %c0_111 = arith.constant 0 : index
      %207 = vector.load %arg19[%c2_109, %c0_110, %c0_111] : memref<4x16x8xbf16, #tpu.memory_space<vmem>>, vector<1x8x8xbf16>
      %208 = vector.shape_cast %207 : vector<1x8x8xbf16> to vector<8x8xbf16>
      %209 = vector.shape_cast %206 : vector<8x8xbf16> to vector<1x8x8xbf16>
      tpu.vector_store %arg19[%c2_109, %c0_110, %c0_111], %209 {strides = array<i32>} : memref<4x16x8xbf16, #tpu.memory_space<vmem>>, vector<1x8x8xbf16>,
      %210 = vector.extract_strided_slice %184 {offsets = [0, 48], sizes = [8, 8], strides = [1, 1]} : vector<8x64xf32> to vector<8x8xf32>
      %211 = arith.truncf %210 : vector<8x8xf32> to vector<8x8xbf16>
      %c2_112 = arith.constant 2 : index
      %c0_113 = arith.constant 0 : index
      %c0_114 = arith.constant 0 : index
      %212 = vector.load %arg20[%c2_112, %c0_113, %c0_114] : memref<4x16x8xbf16, #tpu.memory_space<vmem>>, vector<1x8x8xbf16>
      %213 = vector.shape_cast %212 : vector<1x8x8xbf16> to vector<8x8xbf16>
      %214 = vector.shape_cast %211 : vector<8x8xbf16> to vector<1x8x8xbf16>
      tpu.vector_store %arg20[%c2_112, %c0_113, %c0_114], %214 {strides = array<i32>} : memref<4x16x8xbf16, #tpu.memory_space<vmem>>, vector<1x8x8xbf16>,
      %215 = vector.extract_strided_slice %184 {offsets = [0, 24], sizes = [8, 8], strides = [1, 1]} : vector<8x64xf32> to vector<8x8xf32>
      %216 = arith.truncf %215 : vector<8x8xf32> to vector<8x8xbf16>
      %c3_115 = arith.constant 3 : index
      %c0_116 = arith.constant 0 : index
      %c0_117 = arith.constant 0 : index
      %217 = vector.load %arg19[%c3_115, %c0_116, %c0_117] : memref<4x16x8xbf16, #tpu.memory_space<vmem>>, vector<1x8x8xbf16>
      %218 = vector.shape_cast %217 : vector<1x8x8xbf16> to vector<8x8xbf16>
      %219 = vector.shape_cast %216 : vector<8x8xbf16> to vector<1x8x8xbf16>
      tpu.vector_store %arg19[%c3_115, %c0_116, %c0_117], %219 {strides = array<i32>} : memref<4x16x8xbf16, #tpu.memory_space<vmem>>, vector<1x8x8xbf16>,
      %220 = vector.extract_strided_slice %184 {offsets = [0, 56], sizes = [8, 8], strides = [1, 1]} : vector<8x64xf32> to vector<8x8xf32>
      %221 = arith.truncf %220 : vector<8x8xf32> to vector<8x8xbf16>
      %c3_118 = arith.constant 3 : index
      %c0_119 = arith.constant 0 : index
      %c0_120 = arith.constant 0 : index
      %222 = vector.load %arg20[%c3_118, %c0_119, %c0_120] : memref<4x16x8xbf16, #tpu.memory_space<vmem>>, vector<1x8x8xbf16>
      %223 = vector.shape_cast %222 : vector<1x8x8xbf16> to vector<8x8xbf16>
      %224 = vector.shape_cast %221 : vector<8x8xbf16> to vector<1x8x8xbf16>
      tpu.vector_store %arg20[%c3_118, %c0_119, %c0_120], %224 {strides = array<i32>} : memref<4x16x8xbf16, #tpu.memory_space<vmem>>, vector<1x8x8xbf16>,
      %c0_121 = arith.constant 0 : index
      %c8 = arith.constant 8 : index
      %c0_122 = arith.constant 0 : index
      %225 = vector.load %arg2[%c0_121, %c8, %c0_122] : memref<1x16x32xf32, #tpu.memory_space<vmem>>, vector<1x8x32xf32>
      %226 = vector.shape_cast %225 : vector<1x8x32xf32> to vector<8x32xf32>
      %c0_123 = arith.constant 0 : index
      %c0_124 = arith.constant 0 : index
      %227 = vector.load %arg3[%c0_123, %c0_124] : memref<1x32xf32, #tpu.memory_space<vmem>>, vector<1x32xf32>
      %c0_125 = arith.constant 0 : index
      %c0_126 = arith.constant 0 : index
      %228 = vector.load %arg4[%c0_125, %c0_126] : memref<1x32xf32, #tpu.memory_space<vmem>>, vector<1x32xf32>
      %cst_127 = arith.constant dense<0.000000e+00> : vector<8xf32>
      %229 = vector.multi_reduction <add>, %226, %cst_127 [1] : vector<8x32xf32> to vector<8xf32>
      %230 = vector.shape_cast %229 : vector<8xf32> to vector<8x1xf32>
      %cst_128 = arith.constant 3.200000e+01 : f32
      %231 = vector.broadcast %cst_128 : f32 to vector<8x1xf32>
      %232 = arith.divf %230, %231 : vector<8x1xf32>
      %233 = vector.broadcast %232 : vector<8x1xf32> to vector<8x32xf32>
      %234 = arith.subf %226, %233 : vector<8x32xf32>
      %235 = arith.mulf %234, %234 : vector<8x32xf32>
      %cst_129 = arith.constant dense<0.000000e+00> : vector<8xf32>
      %236 = vector.multi_reduction <add>, %235, %cst_129 [1] : vector<8x32xf32> to vector<8xf32>
      %237 = vector.shape_cast %236 : vector<8xf32> to vector<8x1xf32>
      %cst_130 = arith.constant 3.200000e+01 : f32
      %238 = vector.broadcast %cst_130 : f32 to vector<8x1xf32>
      %239 = arith.divf %237, %238 : vector<8x1xf32>
      %240 = vector.broadcast %232 : vector<8x1xf32> to vector<8x32xf32>
      %241 = arith.subf %226, %240 : vector<8x32xf32>
      %cst_131 = arith.constant 9.99999974E-6 : f32
      %242 = vector.broadcast %cst_131 : f32 to vector<8x1xf32>
      %243 = arith.addf %239, %242 : vector<8x1xf32>
      %244 = math.rsqrt %243 : vector<8x1xf32>
      %245 = vector.broadcast %244 : vector<8x1xf32> to vector<8x32xf32>
      %246 = arith.mulf %241, %245 : vector<8x32xf32>
      %247 = vector.broadcast %227 : vector<1x32xf32> to vector<8x32xf32>
      %248 = arith.mulf %246, %247 : vector<8x32xf32>
      %249 = vector.broadcast %228 : vector<1x32xf32> to vector<8x32xf32>
      %250 = arith.addf %248, %249 : vector<8x32xf32>
      %251 = arith.truncf %250 : vector<8x32xf32> to vector<8x32xbf16>
      %c0_132 = arith.constant 0 : index
      %c0_133 = arith.constant 0 : index
      %252 = vector.load %arg7[%c0_132, %c0_133] : memref<32x64xbf16, #tpu.memory_space<vmem>>, vector<32x64xbf16>
      %cst_134 = arith.constant dense<0.000000e+00> : vector<8x64xf32>
      %253 = tpu.matmul %251, %252, %cst_134 {dimension_numbers = #tpu.dot_dimension_numbers<[1], [0], [0], [1], [0, 0, 1, 1], [], []>} : vector<8x32xbf16>, vector<32x64xbf16>, vector<8x64xf32> -> vector<8x64xf32>
      %c0_135 = arith.constant 0 : index
      %c0_136 = arith.constant 0 : index
      %254 = vector.load %arg8[%c0_135, %c0_136] : memref<1x64xf32, #tpu.memory_space<vmem>>, vector<1x64xf32>
      %255 = vector.broadcast %254 : vector<1x64xf32> to vector<8x64xf32>
      %256 = arith.addf %253, %255 : vector<8x64xf32>
      %257 = vector.extract_strided_slice %256 {offsets = [0, 0], sizes = [8, 8], strides = [1, 1]} : vector<8x64xf32> to vector<8x8xf32>
      %258 = arith.truncf %257 : vector<8x8xf32> to vector<8x8xbf16>
      %c0_137 = arith.constant 0 : index
      %c8_138 = arith.constant 8 : index
      %c0_139 = arith.constant 0 : index
      %259 = vector.load %arg19[%c0_137, %c8_138, %c0_139] : memref<4x16x8xbf16, #tpu.memory_space<vmem>>, vector<1x8x8xbf16>
      %260 = vector.shape_cast %259 : vector<1x8x8xbf16> to vector<8x8xbf16>
      %261 = vector.shape_cast %258 : vector<8x8xbf16> to vector<1x8x8xbf16>
      tpu.vector_store %arg19[%c0_137, %c8_138, %c0_139], %261 {strides = array<i32>} : memref<4x16x8xbf16, #tpu.memory_space<vmem>>, vector<1x8x8xbf16>,
      %262 = vector.extract_strided_slice %256 {offsets = [0, 32], sizes = [8, 8], strides = [1, 1]} : vector<8x64xf32> to vector<8x8xf32>
      %263 = arith.truncf %262 : vector<8x8xf32> to vector<8x8xbf16>
      %c0_140 = arith.constant 0 : index
      %c8_141 = arith.constant 8 : index
      %c0_142 = arith.constant 0 : index
      %264 = vector.load %arg20[%c0_140, %c8_141, %c0_142] : memref<4x16x8xbf16, #tpu.memory_space<vmem>>, vector<1x8x8xbf16>
      %265 = vector.shape_cast %264 : vector<1x8x8xbf16> to vector<8x8xbf16>
      %266 = vector.shape_cast %263 : vector<8x8xbf16> to vector<1x8x8xbf16>
      tpu.vector_store %arg20[%c0_140, %c8_141, %c0_142], %266 {strides = array<i32>} : memref<4x16x8xbf16, #tpu.memory_space<vmem>>, vector<1x8x8xbf16>,
      %267 = vector.extract_strided_slice %256 {offsets = [0, 8], sizes = [8, 8], strides = [1, 1]} : vector<8x64xf32> to vector<8x8xf32>
      %268 = arith.truncf %267 : vector<8x8xf32> to vector<8x8xbf16>
      %c1_143 = arith.constant 1 : index
      %c8_144 = arith.constant 8 : index
      %c0_145 = arith.constant 0 : index
      %269 = vector.load %arg19[%c1_143, %c8_144, %c0_145] : memref<4x16x8xbf16, #tpu.memory_space<vmem>>, vector<1x8x8xbf16>
      %270 = vector.shape_cast %269 : vector<1x8x8xbf16> to vector<8x8xbf16>
      %271 = vector.shape_cast %268 : vector<8x8xbf16> to vector<1x8x8xbf16>
      tpu.vector_store %arg19[%c1_143, %c8_144, %c0_145], %271 {strides = array<i32>} : memref<4x16x8xbf16, #tpu.memory_space<vmem>>, vector<1x8x8xbf16>,
      %272 = vector.extract_strided_slice %256 {offsets = [0, 40], sizes = [8, 8], strides = [1, 1]} : vector<8x64xf32> to vector<8x8xf32>
      %273 = arith.truncf %272 : vector<8x8xf32> to vector<8x8xbf16>
      %c1_146 = arith.constant 1 : index
      %c8_147 = arith.constant 8 : index
      %c0_148 = arith.constant 0 : index
      %274 = vector.load %arg20[%c1_146, %c8_147, %c0_148] : memref<4x16x8xbf16, #tpu.memory_space<vmem>>, vector<1x8x8xbf16>
      %275 = vector.shape_cast %274 : vector<1x8x8xbf16> to vector<8x8xbf16>
      %276 = vector.shape_cast %273 : vector<8x8xbf16> to vector<1x8x8xbf16>
      tpu.vector_store %arg20[%c1_146, %c8_147, %c0_148], %276 {strides = array<i32>} : memref<4x16x8xbf16, #tpu.memory_space<vmem>>, vector<1x8x8xbf16>,
      %277 = vector.extract_strided_slice %256 {offsets = [0, 16], sizes = [8, 8], strides = [1, 1]} : vector<8x64xf32> to vector<8x8xf32>
      %278 = arith.truncf %277 : vector<8x8xf32> to vector<8x8xbf16>
      %c2_149 = arith.constant 2 : index
      %c8_150 = arith.constant 8 : index
      %c0_151 = arith.constant 0 : index
      %279 = vector.load %arg19[%c2_149, %c8_150, %c0_151] : memref<4x16x8xbf16, #tpu.memory_space<vmem>>, vector<1x8x8xbf16>
      %280 = vector.shape_cast %279 : vector<1x8x8xbf16> to vector<8x8xbf16>
      %281 = vector.shape_cast %278 : vector<8x8xbf16> to vector<1x8x8xbf16>
      tpu.vector_store %arg19[%c2_149, %c8_150, %c0_151], %281 {strides = array<i32>} : memref<4x16x8xbf16, #tpu.memory_space<vmem>>, vector<1x8x8xbf16>,
      %282 = vector.extract_strided_slice %256 {offsets = [0, 48], sizes = [8, 8], strides = [1, 1]} : vector<8x64xf32> to vector<8x8xf32>
      %283 = arith.truncf %282 : vector<8x8xf32> to vector<8x8xbf16>
      %c2_152 = arith.constant 2 : index
      %c8_153 = arith.constant 8 : index
      %c0_154 = arith.constant 0 : index
      %284 = vector.load %arg20[%c2_152, %c8_153, %c0_154] : memref<4x16x8xbf16, #tpu.memory_space<vmem>>, vector<1x8x8xbf16>
      %285 = vector.shape_cast %284 : vector<1x8x8xbf16> to vector<8x8xbf16>
      %286 = vector.shape_cast %283 : vector<8x8xbf16> to vector<1x8x8xbf16>
      tpu.vector_store %arg20[%c2_152, %c8_153, %c0_154], %286 {strides = array<i32>} : memref<4x16x8xbf16, #tpu.memory_space<vmem>>, vector<1x8x8xbf16>,
      %287 = vector.extract_strided_slice %256 {offsets = [0, 24], sizes = [8, 8], strides = [1, 1]} : vector<8x64xf32> to vector<8x8xf32>
      %288 = arith.truncf %287 : vector<8x8xf32> to vector<8x8xbf16>
      %c3_155 = arith.constant 3 : index
      %c8_156 = arith.constant 8 : index
      %c0_157 = arith.constant 0 : index
      %289 = vector.load %arg19[%c3_155, %c8_156, %c0_157] : memref<4x16x8xbf16, #tpu.memory_space<vmem>>, vector<1x8x8xbf16>
      %290 = vector.shape_cast %289 : vector<1x8x8xbf16> to vector<8x8xbf16>
      %291 = vector.shape_cast %288 : vector<8x8xbf16> to vector<1x8x8xbf16>
      tpu.vector_store %arg19[%c3_155, %c8_156, %c0_157], %291 {strides = array<i32>} : memref<4x16x8xbf16, #tpu.memory_space<vmem>>, vector<1x8x8xbf16>,
      %292 = vector.extract_strided_slice %256 {offsets = [0, 56], sizes = [8, 8], strides = [1, 1]} : vector<8x64xf32> to vector<8x8xf32>
      %293 = arith.truncf %292 : vector<8x8xf32> to vector<8x8xbf16>
      %c3_158 = arith.constant 3 : index
      %c8_159 = arith.constant 8 : index
      %c0_160 = arith.constant 0 : index
      %294 = vector.load %arg20[%c3_158, %c8_159, %c0_160] : memref<4x16x8xbf16, #tpu.memory_space<vmem>>, vector<1x8x8xbf16>
      %295 = vector.shape_cast %294 : vector<1x8x8xbf16> to vector<8x8xbf16>
      %296 = vector.shape_cast %293 : vector<8x8xbf16> to vector<1x8x8xbf16>
      tpu.vector_store %arg20[%c3_158, %c8_159, %c0_160], %296 {strides = array<i32>} : memref<4x16x8xbf16, #tpu.memory_space<vmem>>, vector<1x8x8xbf16>,
    } else {
    }
    %c8_i32 = arith.constant 8 : i32
    %3 = arith.muli %arg1, %c8_i32 : i32
    %4 = tpu.assume_multiple %3, 8 : i32
    %c0 = arith.constant 0 : index
    %5 = arith.index_cast %4 : i32 to index
    %c0_1 = arith.constant 0 : index
    %6 = vector.load %arg2[%c0, %5, %c0_1] : memref<1x16x32xf32, #tpu.memory_space<vmem>>, vector<1x8x32xf32>
    %7 = vector.shape_cast %6 : vector<1x8x32xf32> to vector<8x32xf32>
    %c0_2 = arith.constant 0 : index
    %c0_3 = arith.constant 0 : index
    %8 = vector.load %arg3[%c0_2, %c0_3] : memref<1x32xf32, #tpu.memory_space<vmem>>, vector<1x32xf32>
    %c0_4 = arith.constant 0 : index
    %c0_5 = arith.constant 0 : index
    %9 = vector.load %arg4[%c0_4, %c0_5] : memref<1x32xf32, #tpu.memory_space<vmem>>, vector<1x32xf32>
    %cst = arith.constant dense<0.000000e+00> : vector<8xf32>
    %10 = vector.multi_reduction <add>, %7, %cst [1] : vector<8x32xf32> to vector<8xf32>
    %11 = vector.shape_cast %10 : vector<8xf32> to vector<8x1xf32>
    %cst_6 = arith.constant 3.200000e+01 : f32
    %12 = vector.broadcast %cst_6 : f32 to vector<8x1xf32>
    %13 = arith.divf %11, %12 : vector<8x1xf32>
    %14 = vector.broadcast %13 : vector<8x1xf32> to vector<8x32xf32>
    %15 = arith.subf %7, %14 : vector<8x32xf32>
    %16 = arith.mulf %15, %15 : vector<8x32xf32>
    %cst_7 = arith.constant dense<0.000000e+00> : vector<8xf32>
    %17 = vector.multi_reduction <add>, %16, %cst_7 [1] : vector<8x32xf32> to vector<8xf32>
    %18 = vector.shape_cast %17 : vector<8xf32> to vector<8x1xf32>
    %cst_8 = arith.constant 3.200000e+01 : f32
    %19 = vector.broadcast %cst_8 : f32 to vector<8x1xf32>
    %20 = arith.divf %18, %19 : vector<8x1xf32>
    %21 = vector.broadcast %13 : vector<8x1xf32> to vector<8x32xf32>
    %22 = arith.subf %7, %21 : vector<8x32xf32>
    %cst_9 = arith.constant 9.99999974E-6 : f32
    %23 = vector.broadcast %cst_9 : f32 to vector<8x1xf32>
    %24 = arith.addf %20, %23 : vector<8x1xf32>
    %25 = math.rsqrt %24 : vector<8x1xf32>
    %26 = vector.broadcast %25 : vector<8x1xf32> to vector<8x32xf32>
    %27 = arith.mulf %22, %26 : vector<8x32xf32>
    %28 = vector.broadcast %8 : vector<1x32xf32> to vector<8x32xf32>
    %29 = arith.mulf %27, %28 : vector<8x32xf32>
    %30 = vector.broadcast %9 : vector<1x32xf32> to vector<8x32xf32>
    %31 = arith.addf %29, %30 : vector<8x32xf32>
    %32 = arith.truncf %31 : vector<8x32xf32> to vector<8x32xbf16>
    %c0_10 = arith.constant 0 : index
    %c0_11 = arith.constant 0 : index
    %33 = vector.load %arg5[%c0_10, %c0_11] : memref<32x32xbf16, #tpu.memory_space<vmem>>, vector<32x32xbf16>
    %cst_12 = arith.constant dense<0.000000e+00> : vector<8x32xf32>
    %34 = tpu.matmul %32, %33, %cst_12 {dimension_numbers = #tpu.dot_dimension_numbers<[1], [0], [0], [1], [0, 0, 1, 1], [], []>} : vector<8x32xbf16>, vector<32x32xbf16>, vector<8x32xf32> -> vector<8x32xf32>
    %c0_13 = arith.constant 0 : index
    %c0_14 = arith.constant 0 : index
    %35 = vector.load %arg6[%c0_13, %c0_14] : memref<1x32xf32, #tpu.memory_space<vmem>>, vector<1x32xf32>
    %36 = vector.broadcast %35 : vector<1x32xf32> to vector<8x32xf32>
    %37 = arith.addf %34, %36 : vector<8x32xf32>
    %38 = vector.extract_strided_slice %37 {offsets = [0, 0], sizes = [8, 8], strides = [1, 1]} : vector<8x32xf32> to vector<8x8xf32>
    %39 = arith.truncf %38 : vector<8x8xf32> to vector<8x8xbf16>
    %c0_15 = arith.constant 0 : index
    %c0_16 = arith.constant 0 : index
    %c0_17 = arith.constant 0 : index
    %40 = vector.load %arg18[%c0_15, %c0_16, %c0_17] : memref<4x8x8xbf16, #tpu.memory_space<vmem>>, vector<1x8x8xbf16>
    %41 = vector.shape_cast %40 : vector<1x8x8xbf16> to vector<8x8xbf16>
    %42 = vector.shape_cast %39 : vector<8x8xbf16> to vector<1x8x8xbf16>
    tpu.vector_store %arg18[%c0_15, %c0_16, %c0_17], %42 {strides = array<i32>} : memref<4x8x8xbf16, #tpu.memory_space<vmem>>, vector<1x8x8xbf16>,
    %43 = vector.extract_strided_slice %37 {offsets = [0, 8], sizes = [8, 8], strides = [1, 1]} : vector<8x32xf32> to vector<8x8xf32>
    %44 = arith.truncf %43 : vector<8x8xf32> to vector<8x8xbf16>
    %c1 = arith.constant 1 : index
    %c0_18 = arith.constant 0 : index
    %c0_19 = arith.constant 0 : index
    %45 = vector.load %arg18[%c1, %c0_18, %c0_19] : memref<4x8x8xbf16, #tpu.memory_space<vmem>>, vector<1x8x8xbf16>
    %46 = vector.shape_cast %45 : vector<1x8x8xbf16> to vector<8x8xbf16>
    %47 = vector.shape_cast %44 : vector<8x8xbf16> to vector<1x8x8xbf16>
    tpu.vector_store %arg18[%c1, %c0_18, %c0_19], %47 {strides = array<i32>} : memref<4x8x8xbf16, #tpu.memory_space<vmem>>, vector<1x8x8xbf16>,
    %48 = vector.extract_strided_slice %37 {offsets = [0, 16], sizes = [8, 8], strides = [1, 1]} : vector<8x32xf32> to vector<8x8xf32>
    %49 = arith.truncf %48 : vector<8x8xf32> to vector<8x8xbf16>
    %c2 = arith.constant 2 : index
    %c0_20 = arith.constant 0 : index
    %c0_21 = arith.constant 0 : index
    %50 = vector.load %arg18[%c2, %c0_20, %c0_21] : memref<4x8x8xbf16, #tpu.memory_space<vmem>>, vector<1x8x8xbf16>
    %51 = vector.shape_cast %50 : vector<1x8x8xbf16> to vector<8x8xbf16>
    %52 = vector.shape_cast %49 : vector<8x8xbf16> to vector<1x8x8xbf16>
    tpu.vector_store %arg18[%c2, %c0_20, %c0_21], %52 {strides = array<i32>} : memref<4x8x8xbf16, #tpu.memory_space<vmem>>, vector<1x8x8xbf16>,
    %53 = vector.extract_strided_slice %37 {offsets = [0, 24], sizes = [8, 8], strides = [1, 1]} : vector<8x32xf32> to vector<8x8xf32>
    %54 = arith.truncf %53 : vector<8x8xf32> to vector<8x8xbf16>
    %c3 = arith.constant 3 : index
    %c0_22 = arith.constant 0 : index
    %c0_23 = arith.constant 0 : index
    %55 = vector.load %arg18[%c3, %c0_22, %c0_23] : memref<4x8x8xbf16, #tpu.memory_space<vmem>>, vector<1x8x8xbf16>
    %56 = vector.shape_cast %55 : vector<1x8x8xbf16> to vector<8x8xbf16>
    %57 = vector.shape_cast %54 : vector<8x8xbf16> to vector<1x8x8xbf16>
    tpu.vector_store %arg18[%c3, %c0_22, %c0_23], %57 {strides = array<i32>} : memref<4x8x8xbf16, #tpu.memory_space<vmem>>, vector<1x8x8xbf16>,
    %c0_24 = arith.constant 0 : index
    %c0_25 = arith.constant 0 : index
    %c0_26 = arith.constant 0 : index
    %58 = vector.load %arg18[%c0_24, %c0_25, %c0_26] : memref<4x8x8xbf16, #tpu.memory_space<vmem>>, vector<4x8x8xbf16>
    %c0_27 = arith.constant 0 : index
    %c0_28 = arith.constant 0 : index
    %c0_29 = arith.constant 0 : index
    %59 = vector.load %arg19[%c0_27, %c0_28, %c0_29] : memref<4x16x8xbf16, #tpu.memory_space<vmem>>, vector<4x16x8xbf16>
    %c0_30 = arith.constant 0 : index
    %c0_31 = arith.constant 0 : index
    %c0_32 = arith.constant 0 : index
    %60 = vector.load %arg20[%c0_30, %c0_31, %c0_32] : memref<4x16x8xbf16, #tpu.memory_space<vmem>>, vector<4x16x8xbf16>
    "tpu.trace_start"() <{level = 10 : i32, message = "hqd,hkd->hqk"}> : () -> ()
    %cst_33 = arith.constant dense<0.000000e+00> : vector<4x8x16xf32>
    %61 = tpu.matmul %58, %59, %cst_33 {dimension_numbers = #tpu.dot_dimension_numbers<[2], [2], [1], [1], [0, 0, 0, 1, 1, 1], [0], [0]>} : vector<4x8x8xbf16>, vector<4x16x8xbf16>, vector<4x8x16xf32> -> vector<4x8x16xf32>
    "tpu.trace_stop"() : () -> ()
    %cst_34 = arith.constant dense<0xFF800000> : vector<4x8xf32>
    %62 = vector.multi_reduction <maximumf>, %61, %cst_34 [2] : vector<4x8x16xf32> to vector<4x8xf32>
    %63 = vector.shape_cast %62 : vector<4x8xf32> to vector<4x8x1xf32>
    %64 = vector.broadcast %63 : vector<4x8x1xf32> to vector<4x8x16xf32>
    %65 = arith.subf %61, %64 : vector<4x8x16xf32>
    %66 = math.exp %65 : vector<4x8x16xf32>
    %cst_35 = arith.constant dense<0.000000e+00> : vector<4x8xf32>
    %67 = vector.multi_reduction <add>, %66, %cst_35 [2] : vector<4x8x16xf32> to vector<4x8xf32>
    %68 = vector.shape_cast %67 : vector<4x8xf32> to vector<4x8x1xf32>
    %69 = arith.truncf %66 : vector<4x8x16xf32> to vector<4x8x16xbf16>
    "tpu.trace_start"() <{level = 10 : i32, message = "hqk,hkd->hqd"}> : () -> ()
    %cst_36 = arith.constant dense<0.000000e+00> : vector<4x8x8xf32>
    %70 = tpu.matmul %69, %60, %cst_36 {dimension_numbers = #tpu.dot_dimension_numbers<[2], [1], [1], [2], [0, 0, 0, 1, 1, 2], [0], [0]>} : vector<4x8x16xbf16>, vector<4x16x8xbf16>, vector<4x8x8xf32> -> vector<4x8x8xf32>
    "tpu.trace_stop"() : () -> ()
    %71 = tpu.reciprocal %68 {approx = true} : vector<4x8x1xf32> -> vector<4x8x1xf32>
    %72 = vector.broadcast %71 : vector<4x8x1xf32> to vector<4x8x8xf32>
    %73 = arith.mulf %70, %72 : vector<4x8x8xf32>
    %74 = vector.extract_strided_slice %73 {offsets = [0, 0, 0], sizes = [1, 8, 8], strides = [1, 1, 1]} : vector<4x8x8xf32> to vector<1x8x8xf32>
    %75 = vector.shape_cast %74 : vector<1x8x8xf32> to vector<8x8xf32>
    %76 = arith.truncf %75 : vector<8x8xf32> to vector<8x8xbf16>
    %c0_37 = arith.constant 0 : index
    %c0_38 = arith.constant 0 : index
    %c0_39 = arith.constant 0 : index
    %77 = vector.load %arg9[%c0_37, %c0_38, %c0_39] : memref<4x8x32xbf16, #tpu.memory_space<vmem>>, vector<1x8x32xbf16>
    %78 = vector.shape_cast %77 : vector<1x8x32xbf16> to vector<8x32xbf16>
    %cst_40 = arith.constant dense<0.000000e+00> : vector<8x32xf32>
    %79 = tpu.matmul %76, %78, %cst_40 {dimension_numbers = #tpu.dot_dimension_numbers<[1], [0], [0], [1], [0, 0, 1, 1], [], []>} : vector<8x8xbf16>, vector<8x32xbf16>, vector<8x32xf32> -> vector<8x32xf32>
    %80 = vector.extract_strided_slice %73 {offsets = [1, 0, 0], sizes = [1, 8, 8], strides = [1, 1, 1]} : vector<4x8x8xf32> to vector<1x8x8xf32>
    %81 = vector.shape_cast %80 : vector<1x8x8xf32> to vector<8x8xf32>
    %82 = arith.truncf %81 : vector<8x8xf32> to vector<8x8xbf16>
    %c1_41 = arith.constant 1 : index
    %c0_42 = arith.constant 0 : index
    %c0_43 = arith.constant 0 : index
    %83 = vector.load %arg9[%c1_41, %c0_42, %c0_43] : memref<4x8x32xbf16, #tpu.memory_space<vmem>>, vector<1x8x32xbf16>
    %84 = vector.shape_cast %83 : vector<1x8x32xbf16> to vector<8x32xbf16>
    %cst_44 = arith.constant dense<0.000000e+00> : vector<8x32xf32>
    %85 = tpu.matmul %82, %84, %cst_44 {dimension_numbers = #tpu.dot_dimension_numbers<[1], [0], [0], [1], [0, 0, 1, 1], [], []>} : vector<8x8xbf16>, vector<8x32xbf16>, vector<8x32xf32> -> vector<8x32xf32>
    %86 = arith.addf %79, %85 : vector<8x32xf32>
    %87 = vector.extract_strided_slice %73 {offsets = [2, 0, 0], sizes = [1, 8, 8], strides = [1, 1, 1]} : vector<4x8x8xf32> to vector<1x8x8xf32>
    %88 = vector.shape_cast %87 : vector<1x8x8xf32> to vector<8x8xf32>
    %89 = arith.truncf %88 : vector<8x8xf32> to vector<8x8xbf16>
    %c2_45 = arith.constant 2 : index
    %c0_46 = arith.constant 0 : index
    %c0_47 = arith.constant 0 : index
    %90 = vector.load %arg9[%c2_45, %c0_46, %c0_47] : memref<4x8x32xbf16, #tpu.memory_space<vmem>>, vector<1x8x32xbf16>
    %91 = vector.shape_cast %90 : vector<1x8x32xbf16> to vector<8x32xbf16>
    %cst_48 = arith.constant dense<0.000000e+00> : vector<8x32xf32>
    %92 = tpu.matmul %89, %91, %cst_48 {dimension_numbers = #tpu.dot_dimension_numbers<[1], [0], [0], [1], [0, 0, 1, 1], [], []>} : vector<8x8xbf16>, vector<8x32xbf16>, vector<8x32xf32> -> vector<8x32xf32>
    %93 = arith.addf %86, %92 : vector<8x32xf32>
    %94 = vector.extract_strided_slice %73 {offsets = [3, 0, 0], sizes = [1, 8, 8], strides = [1, 1, 1]} : vector<4x8x8xf32> to vector<1x8x8xf32>
    %95 = vector.shape_cast %94 : vector<1x8x8xf32> to vector<8x8xf32>
    %96 = arith.truncf %95 : vector<8x8xf32> to vector<8x8xbf16>
    %c3_49 = arith.constant 3 : index
    %c0_50 = arith.constant 0 : index
    %c0_51 = arith.constant 0 : index
    %97 = vector.load %arg9[%c3_49, %c0_50, %c0_51] : memref<4x8x32xbf16, #tpu.memory_space<vmem>>, vector<1x8x32xbf16>
    %98 = vector.shape_cast %97 : vector<1x8x32xbf16> to vector<8x32xbf16>
    %cst_52 = arith.constant dense<0.000000e+00> : vector<8x32xf32>
    %99 = tpu.matmul %96, %98, %cst_52 {dimension_numbers = #tpu.dot_dimension_numbers<[1], [0], [0], [1], [0, 0, 1, 1], [], []>} : vector<8x8xbf16>, vector<8x32xbf16>, vector<8x32xf32> -> vector<8x32xf32>
    %100 = arith.addf %93, %99 : vector<8x32xf32>
    %c0_53 = arith.constant 0 : index
    %c0_54 = arith.constant 0 : index
    %101 = vector.load %arg10[%c0_53, %c0_54] : memref<1x32xf32, #tpu.memory_space<vmem>>, vector<1x32xf32>
    %102 = vector.broadcast %101 : vector<1x32xf32> to vector<8x32xf32>
    %103 = arith.addf %100, %102 : vector<8x32xf32>
    %104 = arith.addf %7, %103 : vector<8x32xf32>
    %c0_55 = arith.constant 0 : index
    %c0_56 = arith.constant 0 : index
    %105 = vector.load %arg11[%c0_55, %c0_56] : memref<1x32xf32, #tpu.memory_space<vmem>>, vector<1x32xf32>
    %c0_57 = arith.constant 0 : index
    %c0_58 = arith.constant 0 : index
    %106 = vector.load %arg12[%c0_57, %c0_58] : memref<1x32xf32, #tpu.memory_space<vmem>>, vector<1x32xf32>
    %cst_59 = arith.constant dense<0.000000e+00> : vector<8xf32>
    %107 = vector.multi_reduction <add>, %104, %cst_59 [1] : vector<8x32xf32> to vector<8xf32>
    %108 = vector.shape_cast %107 : vector<8xf32> to vector<8x1xf32>
    %cst_60 = arith.constant 3.200000e+01 : f32
    %109 = vector.broadcast %cst_60 : f32 to vector<8x1xf32>
    %110 = arith.divf %108, %109 : vector<8x1xf32>
    %111 = vector.broadcast %110 : vector<8x1xf32> to vector<8x32xf32>
    %112 = arith.subf %104, %111 : vector<8x32xf32>
    %113 = arith.mulf %112, %112 : vector<8x32xf32>
    %cst_61 = arith.constant dense<0.000000e+00> : vector<8xf32>
    %114 = vector.multi_reduction <add>, %113, %cst_61 [1] : vector<8x32xf32> to vector<8xf32>
    %115 = vector.shape_cast %114 : vector<8xf32> to vector<8x1xf32>
    %cst_62 = arith.constant 3.200000e+01 : f32
    %116 = vector.broadcast %cst_62 : f32 to vector<8x1xf32>
    %117 = arith.divf %115, %116 : vector<8x1xf32>
    %118 = vector.broadcast %110 : vector<8x1xf32> to vector<8x32xf32>
    %119 = arith.subf %104, %118 : vector<8x32xf32>
    %cst_63 = arith.constant 9.99999974E-6 : f32
    %120 = vector.broadcast %cst_63 : f32 to vector<8x1xf32>
    %121 = arith.addf %117, %120 : vector<8x1xf32>
    %122 = math.rsqrt %121 : vector<8x1xf32>
    %123 = vector.broadcast %122 : vector<8x1xf32> to vector<8x32xf32>
    %124 = arith.mulf %119, %123 : vector<8x32xf32>
    %125 = vector.broadcast %105 : vector<1x32xf32> to vector<8x32xf32>
    %126 = arith.mulf %124, %125 : vector<8x32xf32>
    %127 = vector.broadcast %106 : vector<1x32xf32> to vector<8x32xf32>
    %128 = arith.addf %126, %127 : vector<8x32xf32>
    %129 = arith.truncf %128 : vector<8x32xf32> to vector<8x32xbf16>
    %c0_64 = arith.constant 0 : index
    %c0_65 = arith.constant 0 : index
    %130 = vector.load %arg13[%c0_64, %c0_65] : memref<32x64xbf16, #tpu.memory_space<vmem>>, vector<32x64xbf16>
    %cst_66 = arith.constant dense<0.000000e+00> : vector<8x64xf32>
    %131 = tpu.matmul %129, %130, %cst_66 {dimension_numbers = #tpu.dot_dimension_numbers<[1], [0], [0], [1], [0, 0, 1, 1], [], []>} : vector<8x32xbf16>, vector<32x64xbf16>, vector<8x64xf32> -> vector<8x64xf32>
    %c0_67 = arith.constant 0 : index
    %c0_68 = arith.constant 0 : index
    %132 = vector.load %arg14[%c0_67, %c0_68] : memref<1x64xf32, #tpu.memory_space<vmem>>, vector<1x64xf32>
    %133 = vector.broadcast %132 : vector<1x64xf32> to vector<8x64xf32>
    %134 = arith.addf %131, %133 : vector<8x64xf32>
    %cst_69 = arith.constant 5.000000e-01 : f32
    %135 = vector.broadcast %cst_69 : f32 to vector<8x64xf32>
    %136 = arith.mulf %135, %134 : vector<8x64xf32>
    %cst_70 = arith.constant 0.707106769 : f32
    %137 = vector.broadcast %cst_70 : f32 to vector<8x64xf32>
    %138 = arith.mulf %134, %137 : vector<8x64xf32>
    %139 = math.erf %138 : vector<8x64xf32>
    %cst_71 = arith.constant 1.000000e+00 : f32
    %140 = vector.broadcast %cst_71 : f32 to vector<8x64xf32>
    %141 = arith.addf %140, %139 : vector<8x64xf32>
    %142 = arith.mulf %136, %141 : vector<8x64xf32>
    %143 = arith.truncf %142 : vector<8x64xf32> to vector<8x64xbf16>
    %c0_72 = arith.constant 0 : index
    %c0_73 = arith.constant 0 : index
    %144 = vector.load %arg15[%c0_72, %c0_73] : memref<64x32xbf16, #tpu.memory_space<vmem>>, vector<64x32xbf16>
    %cst_74 = arith.constant dense<0.000000e+00> : vector<8x32xf32>
    %145 = tpu.matmul %143, %144, %cst_74 {dimension_numbers = #tpu.dot_dimension_numbers<[1], [0], [0], [1], [0, 0, 1, 1], [], []>} : vector<8x64xbf16>, vector<64x32xbf16>, vector<8x32xf32> -> vector<8x32xf32>
    %c0_75 = arith.constant 0 : index
    %c0_76 = arith.constant 0 : index
    %146 = vector.load %arg16[%c0_75, %c0_76] : memref<1x32xf32, #tpu.memory_space<vmem>>, vector<1x32xf32>
    %147 = vector.broadcast %146 : vector<1x32xf32> to vector<8x32xf32>
    %148 = arith.addf %145, %147 : vector<8x32xf32>
    %149 = arith.addf %104, %148 : vector<8x32xf32>
    %c0_77 = arith.constant 0 : index
    %c0_78 = arith.constant 0 : index
    %c0_79 = arith.constant 0 : index
    %150 = vector.load %arg17[%c0_77, %c0_78, %c0_79] : memref<1x8x32xf32, #tpu.memory_space<vmem>>, vector<1x8x32xf32>
    %151 = vector.shape_cast %150 : vector<1x8x32xf32> to vector<8x32xf32>
    %152 = vector.shape_cast %149 : vector<8x32xf32> to vector<1x8x32xf32>
    tpu.vector_store %arg17[%c0_77, %c0_78, %c0_79], %152 {strides = array<i32>} : memref<1x8x32xf32, #tpu.memory_space<vmem>>, vector<1x8x32xf32>,
    return
  }
  func.func @transform_0(%arg0: i32, %arg1: i32) -> (i32, i32, i32) {
    %c0_i32 = arith.constant 0 : i32
    %c0_i32_0 = arith.constant 0 : i32
    %c0_i32_1 = arith.constant 0 : i32
    return %arg0, %c0_i32, %c0_i32_0 : i32, i32, i32
  }
  func.func @transform_1(%arg0: i32, %arg1: i32) -> (i32, i32) {
    %c0_i32 = arith.constant 0 : i32
    %c0_i32_0 = arith.constant 0 : i32
    %c0_i32_1 = arith.constant 0 : i32
    return %c0_i32, %c0_i32_0 : i32, i32
  }
  func.func @transform_2(%arg0: i32, %arg1: i32) -> (i32, i32) {
    %c0_i32 = arith.constant 0 : i32
    %c0_i32_0 = arith.constant 0 : i32
    %c0_i32_1 = arith.constant 0 : i32
    return %c0_i32, %c0_i32_0 : i32, i32
  }
  func.func @transform_3(%arg0: i32, %arg1: i32) -> (i32, i32) {
    %c0_i32 = arith.constant 0 : i32
    %c0_i32_0 = arith.constant 0 : i32
    %c0_i32_1 = arith.constant 0 : i32
    return %c0_i32, %c0_i32_0 : i32, i32
  }
  func.func @transform_4(%arg0: i32, %arg1: i32) -> (i32, i32) {
    %c0_i32 = arith.constant 0 : i32
    %c0_i32_0 = arith.constant 0 : i32
    %c0_i32_1 = arith.constant 0 : i32
    return %c0_i32, %c0_i32_0 : i32, i32
  }
  func.func @transform_5(%arg0: i32, %arg1: i32) -> (i32, i32) {
    %c0_i32 = arith.constant 0 : i32
    %c0_i32_0 = arith.constant 0 : i32
    %c0_i32_1 = arith.constant 0 : i32
    return %c0_i32, %c0_i32_0 : i32, i32
  }
  func.func @transform_6(%arg0: i32, %arg1: i32) -> (i32, i32) {
    %c0_i32 = arith.constant 0 : i32
    %c0_i32_0 = arith.constant 0 : i32
    %c0_i32_1 = arith.constant 0 : i32
    return %c0_i32, %c0_i32_0 : i32, i32
  }
  func.func @transform_7(%arg0: i32, %arg1: i32) -> (i32, i32, i32) {
    %c0_i32 = arith.constant 0 : i32
    %c0_i32_0 = arith.constant 0 : i32
    %c0_i32_1 = arith.constant 0 : i32
    %c0_i32_2 = arith.constant 0 : i32
    return %c0_i32, %c0_i32_0, %c0_i32_1 : i32, i32, i32
  }
  func.func @transform_8(%arg0: i32, %arg1: i32) -> (i32, i32) {
    %c0_i32 = arith.constant 0 : i32
    %c0_i32_0 = arith.constant 0 : i32
    %c0_i32_1 = arith.constant 0 : i32
    return %c0_i32, %c0_i32_0 : i32, i32
  }
  func.func @transform_9(%arg0: i32, %arg1: i32) -> (i32, i32) {
    %c0_i32 = arith.constant 0 : i32
    %c0_i32_0 = arith.constant 0 : i32
    %c0_i32_1 = arith.constant 0 : i32
    return %c0_i32, %c0_i32_0 : i32, i32
  }
  func.func @transform_10(%arg0: i32, %arg1: i32) -> (i32, i32) {
    %c0_i32 = arith.constant 0 : i32
    %c0_i32_0 = arith.constant 0 : i32
    %c0_i32_1 = arith.constant 0 : i32
    return %c0_i32, %c0_i32_0 : i32, i32
  }
  func.func @transform_11(%arg0: i32, %arg1: i32) -> (i32, i32) {
    %c0_i32 = arith.constant 0 : i32
    %c0_i32_0 = arith.constant 0 : i32
    %c0_i32_1 = arith.constant 0 : i32
    return %c0_i32, %c0_i32_0 : i32, i32
  }
  func.func @transform_12(%arg0: i32, %arg1: i32) -> (i32, i32) {
    %c0_i32 = arith.constant 0 : i32
    %c0_i32_0 = arith.constant 0 : i32
    %c0_i32_1 = arith.constant 0 : i32
    return %c0_i32, %c0_i32_0 : i32, i32
  }
  func.func @transform_13(%arg0: i32, %arg1: i32) -> (i32, i32) {
    %c0_i32 = arith.constant 0 : i32
    %c0_i32_0 = arith.constant 0 : i32
    %c0_i32_1 = arith.constant 0 : i32
    return %c0_i32, %c0_i32_0 : i32, i32
  }
  func.func @transform_14(%arg0: i32, %arg1: i32) -> (i32, i32) {
    %c0_i32 = arith.constant 0 : i32
    %c0_i32_0 = arith.constant 0 : i32
    %c0_i32_1 = arith.constant 0 : i32
    return %c0_i32, %c0_i32_0 : i32, i32
  }
  func.func @transform_15(%arg0: i32, %arg1: i32) -> (i32, i32, i32) {
    %c0_i32 = arith.constant 0 : i32
    %c0_i32_0 = arith.constant 0 : i32
    return %arg0, %arg1, %c0_i32 : i32, i32, i32
  }
}

module attributes {stable_mosaic.version = 11 : i64} {
  func.func @block_kernel(%arg0: i32, %arg1: i32, %arg2: memref<1x16x32xf32, #tpu.memory_space<vmem>>, %arg3: memref<1x32xf32, #tpu.memory_space<vmem>>, %arg4: memref<1x32xf32, #tpu.memory_space<vmem>>, %arg5: memref<32x32xbf16, #tpu.memory_space<vmem>>, %arg6: memref<1x32xf32, #tpu.memory_space<vmem>>, %arg7: memref<32x64xbf16, #tpu.memory_space<vmem>>, %arg8: memref<1x64xf32, #tpu.memory_space<vmem>>, %arg9: memref<4x8x32xbf16, #tpu.memory_space<vmem>>, %arg10: memref<1x32xf32, #tpu.memory_space<vmem>>, %arg11: memref<1x32xf32, #tpu.memory_space<vmem>>, %arg12: memref<1x32xf32, #tpu.memory_space<vmem>>, %arg13: memref<32x64xbf16, #tpu.memory_space<vmem>>, %arg14: memref<1x64xf32, #tpu.memory_space<vmem>>, %arg15: memref<64x32xbf16, #tpu.memory_space<vmem>>, %arg16: memref<1x32xf32, #tpu.memory_space<vmem>>, %arg17: memref<1x8x32xf32, #tpu.memory_space<vmem>>, %arg18: memref<4x8x8xbf16, #tpu.memory_space<vmem>>, %arg19: memref<4x16x8xbf16, #tpu.memory_space<vmem>>, %arg20: memref<4x16x8xbf16, #tpu.memory_space<vmem>>) attributes {dimension_semantics = [#tpu.dimension_semantics<parallel>, #tpu.dimension_semantics<arbitrary>], iteration_bounds = array<i64: 2, 2>, scalar_prefetch = 0 : i64, scratch_operands = 3 : i64, tpu.core_type = #tpu.core_type<tc>, window_params = [{transform_indices = @transform_0, window_bounds = array<i64: 1, 16, 32>}, {pipeline_mode = #tpu.pipeline_mode<synchronous>, transform_indices = @transform_1, window_bounds = array<i64: 1, 32>}, {pipeline_mode = #tpu.pipeline_mode<synchronous>, transform_indices = @transform_2, window_bounds = array<i64: 1, 32>}, {pipeline_mode = #tpu.pipeline_mode<synchronous>, transform_indices = @transform_3, window_bounds = array<i64: 32, 32>}, {pipeline_mode = #tpu.pipeline_mode<synchronous>, transform_indices = @transform_4, window_bounds = array<i64: 1, 32>}, {pipeline_mode = #tpu.pipeline_mode<synchronous>, transform_indices = @transform_5, window_bounds = array<i64: 32, 64>}, {pipeline_mode = #tpu.pipeline_mode<synchronous>, transform_indices = @transform_6, window_bounds = array<i64: 1, 64>}, {pipeline_mode = #tpu.pipeline_mode<synchronous>, transform_indices = @transform_7, window_bounds = array<i64: 4, 8, 32>}, {pipeline_mode = #tpu.pipeline_mode<synchronous>, transform_indices = @transform_8, window_bounds = array<i64: 1, 32>}, {pipeline_mode = #tpu.pipeline_mode<synchronous>, transform_indices = @transform_9, window_bounds = array<i64: 1, 32>}, {pipeline_mode = #tpu.pipeline_mode<synchronous>, transform_indices = @transform_10, window_bounds = array<i64: 1, 32>}, {pipeline_mode = #tpu.pipeline_mode<synchronous>, transform_indices = @transform_11, window_bounds = array<i64: 32, 64>}, {pipeline_mode = #tpu.pipeline_mode<synchronous>, transform_indices = @transform_12, window_bounds = array<i64: 1, 64>}, {pipeline_mode = #tpu.pipeline_mode<synchronous>, transform_indices = @transform_13, window_bounds = array<i64: 64, 32>}, {pipeline_mode = #tpu.pipeline_mode<synchronous>, transform_indices = @transform_14, window_bounds = array<i64: 1, 32>}, {transform_indices = @transform_15, window_bounds = array<i64: 1, 8, 32>}]} {
    %c0_i32 = arith.constant 0 : i32
    %0 = arith.cmpi eq, %arg1, %c0_i32 : i32
    %1 = arith.extui %0 : i1 to i32
    %c0_i32_0 = arith.constant 0 : i32
    %2 = arith.cmpi ne, %1, %c0_i32_0 : i32
    scf.if %2 {
      %c0_80 = arith.constant 0 : index
      %c0_81 = arith.constant 0 : index
      %c0_82 = arith.constant 0 : index
      %153 = vector.load %arg2[%c0_80, %c0_81, %c0_82] : memref<1x16x32xf32, #tpu.memory_space<vmem>>, vector<1x8x32xf32>
      %154 = vector.shape_cast %153 : vector<1x8x32xf32> to vector<8x32xf32>
      %c0_83 = arith.constant 0 : index
      %c0_84 = arith.constant 0 : index
      %155 = vector.load %arg3[%c0_83, %c0_84] : memref<1x32xf32, #tpu.memory_space<vmem>>, vector<1x32xf32>
      %c0_85 = arith.constant 0 : index
      %c0_86 = arith.constant 0 : index
      %156 = vector.load %arg4[%c0_85, %c0_86] : memref<1x32xf32, #tpu.memory_space<vmem>>, vector<1x32xf32>
      %cst_87 = arith.constant dense<0.000000e+00> : vector<8xf32>
      %157 = vector.multi_reduction <add>, %154, %cst_87 [1] : vector<8x32xf32> to vector<8xf32>
      %158 = vector.shape_cast %157 : vector<8xf32> to vector<8x1xf32>
      %cst_88 = arith.constant 3.200000e+01 : f32
      %159 = vector.broadcast %cst_88 : f32 to vector<8x1xf32>
      %160 = arith.divf %158, %159 : vector<8x1xf32>
      %161 = vector.broadcast %160 : vector<8x1xf32> to vector<8x32xf32>
      %162 = arith.subf %154, %161 : vector<8x32xf32>
      %163 = arith.mulf %162, %162 : vector<8x32xf32>
      %cst_89 = arith.constant dense<0.000000e+00> : vector<8xf32>
      %164 = vector.multi_reduction <add>, %163, %cst_89 [1] : vector<8x32xf32> to vector<8xf32>
      %165 = vector.shape_cast %164 : vector<8xf32> to vector<8x1xf32>
      %cst_90 = arith.constant 3.200000e+01 : f32
      %166 = vector.broadcast %cst_90 : f32 to vector<8x1xf32>
      %167 = arith.divf %165, %166 : vector<8x1xf32>
      %168 = vector.broadcast %160 : vector<8x1xf32> to vector<8x32xf32>
      %169 = arith.subf %154, %168 : vector<8x32xf32>
      %cst_91 = arith.constant 9.99999974E-6 : f32
      %170 = vector.broadcast %cst_91 : f32 to vector<8x1xf32>
      %171 = arith.addf %167, %170 : vector<8x1xf32>
      %172 = math.rsqrt %171 : vector<8x1xf32>
      %173 = vector.broadcast %172 : vector<8x1xf32> to vector<8x32xf32>
      %174 = arith.mulf %169, %173 : vector<8x32xf32>
      %175 = vector.broadcast %155 : vector<1x32xf32> to vector<8x32xf32>
      %176 = arith.mulf %174, %175 : vector<8x32xf32>
      %177 = vector.broadcast %156 : vector<1x32xf32> to vector<8x32xf32>
      %178 = arith.addf %176, %177 : vector<8x32xf32>
      %179 = arith.truncf %178 : vector<8x32xf32> to vector<8x32xbf16>
      %c0_92 = arith.constant 0 : index
      %c0_93 = arith.constant 0 : index
      %180 = vector.load %arg7[%c0_92, %c0_93] : memref<32x64xbf16, #tpu.memory_space<vmem>>, vector<32x64xbf16>
      %cst_94 = arith.constant dense<0.000000e+00> : vector<8x64xf32>
      %181 = tpu.matmul %179, %180, %cst_94 {dimension_numbers = #tpu.dot_dimension_numbers<[1], [0], [0], [1], [0, 0, 1, 1], [], []>} : vector<8x32xbf16>, vector<32x64xbf16>, vector<8x64xf32> -> vector<8x64xf32>
      %c0_95 = arith.constant 0 : index
      %c0_96 = arith.constant 0 : index
      %182 = vector.load %arg8[%c0_95, %c0_96] : memref<1x64xf32, #tpu.memory_space<vmem>>, vector<1x64xf32>
      %183 = vector.broadcast %182 : vector<1x64xf32> to vector<8x64xf32>
      %184 = arith.addf %181, %183 : vector<8x64xf32>
      %185 = vector.extract_strided_slice %184 {offsets = [0, 0], sizes = [8, 8], strides = [1, 1]} : vector<8x64xf32> to vector<8x8xf32>
      %186 = arith.truncf %185 : vector<8x8xf32> to vector<8x8xbf16>
      %c0_97 = arith.constant 0 : index
      %c0_98 = arith.constant 0 : index
      %c0_99 = arith.constant 0 : index
      %187 = vector.load %arg19[%c0_97, %c0_98, %c0_99] : memref<4x16x8xbf16, #tpu.memory_space<vmem>>, vector<1x8x8xbf16>
      %188 = vector.shape_cast %187 : vector<1x8x8xbf16> to vector<8x8xbf16>
      %189 = vector.shape_cast %186 : vector<8x8xbf16> to vector<1x8x8xbf16>
      tpu.vector_store %arg19[%c0_97, %c0_98, %c0_99], %189 {strides = array<i32>} : memref<4x16x8xbf16, #tpu.memory_space<vmem>>, vector<1x8x8xbf16>,
      %190 = vector.extract_strided_slice %184 {offsets = [0, 32], sizes = [8, 8], strides = [1, 1]} : vector<8x64xf32> to vector<8x8xf32>
      %191 = arith.truncf %190 : vector<8x8xf32> to vector<8x8xbf16>
      %c0_100 = arith.constant 0 : index
      %c0_101 = arith.constant 0 : index
      %c0_102 = arith.constant 0 : index
      %192 = vector.load %arg20[%c0_100, %c0_101, %c0_102] : memref<4x16x8xbf16, #tpu.memory_space<vmem>>, vector<1x8x8xbf16>
      %193 = vector.shape_cast %192 : vector<1x8x8xbf16> to vector<8x8xbf16>
      %194 = vector.shape_cast %191 : vector<8x8xbf16> to vector<1x8x8xbf16>
      tpu.vector_store %arg20[%c0_100, %c0_101, %c0_102], %194 {strides = array<i32>} : memref<4x16x8xbf16, #tpu.memory_space<vmem>>, vector<1x8x8xbf16>,
      %195 = vector.extract_strided_slice %184 {offsets = [0, 8], sizes = [8, 8], strides = [1, 1]} : vector<8x64xf32> to vector<8x8xf32>
      %196 = arith.truncf %195 : vector<8x8xf32> to vector<8x8xbf16>
      %c1_103 = arith.constant 1 : index
      %c0_104 = arith.constant 0 : index
      %c0_105 = arith.constant 0 : index
      %197 = vector.load %arg19[%c1_103, %c0_104, %c0_105] : memref<4x16x8xbf16, #tpu.memory_space<vmem>>, vector<1x8x8xbf16>
      %198 = vector.shape_cast %197 : vector<1x8x8xbf16> to vector<8x8xbf16>
      %199 = vector.shape_cast %196 : vector<8x8xbf16> to vector<1x8x8xbf16>
      tpu.vector_store %arg19[%c1_103, %c0_104, %c0_105], %199 {strides = array<i32>} : memref<4x16x8xbf16, #tpu.memory_space<vmem>>, vector<1x8x8xbf16>,
      %200 = vector.extract_strided_slice %184 {offsets = [0, 40], sizes = [8, 8], strides = [1, 1]} : vector<8x64xf32> to vector<8x8xf32>
      %201 = arith.truncf %200 : vector<8x8xf32> to vector<8x8xbf16>
      %c1_106 = arith.constant 1 : index
      %c0_107 = arith.constant 0 : index
      %c0_108 = arith.constant 0 : index
      %202 = vector.load %arg20[%c1_106, %c0_107, %c0_108] : memref<4x16x8xbf16, #tpu.memory_space<vmem>>, vector<1x8x8xbf16>
      %203 = vector.shape_cast %202 : vector<1x8x8xbf16> to vector<8x8xbf16>
      %204 = vector.shape_cast %201 : vector<8x8xbf16> to vector<1x8x8xbf16>
      tpu.vector_store %arg20[%c1_106, %c0_107, %c0_108], %204 {strides = array<i32>} : memref<4x16x8xbf16, #tpu.memory_space<vmem>>, vector<1x8x8xbf16>,
      %205 = vector.extract_strided_slice %184 {offsets = [0, 16], sizes = [8, 8], strides = [1, 1]} : vector<8x64xf32> to vector<8x8xf32>
      %206 = arith.truncf %205 : vector<8x8xf32> to vector<8x8xbf16>
      %c2_109 = arith.constant 2 : index
      %c0_110 = arith.constant 0 : index
      %c0_111 = arith.constant 0 : index
      %207 = vector.load %arg19[%c2_109, %c0_110, %c0_111] : memref<4x16x8xbf16, #tpu.memory_space<vmem>>, vector<1x8x8xbf16>
      %208 = vector.shape_cast %207 : vector<1x8x8xbf16> to vector<8x8xbf16>
      %209 = vector.shape_cast %206 : vector<8x8xbf16> to vector<1x8x8xbf16>
      tpu.vector_store %arg19[%c2_109, %c0_110, %c0_111], %209 {strides = array<i32>} : memref<4x16x8xbf16, #tpu.memory_space<vmem>>, vector<1x8x8xbf16>,
      %210 = vector.extract_strided_slice %184 {offsets = [0, 48], sizes = [8, 8], strides = [1, 1]} : vector<8x64xf32> to vector<8x8xf32>
      %211 = arith.truncf %210 : vector<8x8xf32> to vector<8x8xbf16>
      %c2_112 = arith.constant 2 : index
      %c0_113 = arith.constant 0 : index
      %c0_114 = arith.constant 0 : index
      %212 = vector.load %arg20[%c2_112, %c0_113, %c0_114] : memref<4x16x8xbf16, #tpu.memory_space<vmem>>, vector<1x8x8xbf16>
      %213 = vector.shape_cast %212 : vector<1x8x8xbf16> to vector<8x8xbf16>
      %214 = vector.shape_cast %211 : vector<8x8xbf16> to vector<1x8x8xbf16>
      tpu.vector_store %arg20[%c2_112, %c0_113, %c0_114], %214 {strides = array<i32>} : memref<4x16x8xbf16, #tpu.memory_space<vmem>>, vector<1x8x8xbf16>,
      %215 = vector.extract_strided_slice %184 {offsets = [0, 24], sizes = [8, 8], strides = [1, 1]} : vector<8x64xf32> to vector<8x8xf32>
      %216 = arith.truncf %215 : vector<8x8xf32> to vector<8x8xbf16>
      %c3_115 = arith.constant 3 : index
      %c0_116 = arith.constant 0 : index
      %c0_117 = arith.constant 0 : index
      %217 = vector.load %arg19[%c3_115, %c0_116, %c0_117] : memref<4x16x8xbf16, #tpu.memory_space<vmem>>, vector<1x8x8xbf16>
      %218 = vector.shape_cast %217 : vector<1x8x8xbf16> to vector<8x8xbf16>
      %219 = vector.shape_cast %216 : vector<8x8xbf16> to vector<1x8x8xbf16>
      tpu.vector_store %arg19[%c3_115, %c0_116, %c0_117], %219 {strides = array<i32>} : memref<4x16x8xbf16, #tpu.memory_space<vmem>>, vector<1x8x8xbf16>,
      %220 = vector.extract_strided_slice %184 {offsets = [0, 56], sizes = [8, 8], strides = [1, 1]} : vector<8x64xf32> to vector<8x8xf32>
      %221 = arith.truncf %220 : vector<8x8xf32> to vector<8x8xbf16>
      %c3_118 = arith.constant 3 : index
      %c0_119 = arith.constant 0 : index
      %c0_120 = arith.constant 0 : index
      %222 = vector.load %arg20[%c3_118, %c0_119, %c0_120] : memref<4x16x8xbf16, #tpu.memory_space<vmem>>, vector<1x8x8xbf16>
      %223 = vector.shape_cast %222 : vector<1x8x8xbf16> to vector<8x8xbf16>
      %224 = vector.shape_cast %221 : vector<8x8xbf16> to vector<1x8x8xbf16>
      tpu.vector_store %arg20[%c3_118, %c0_119, %c0_120], %224 {strides = array<i32>} : memref<4x16x8xbf16, #tpu.memory_space<vmem>>, vector<1x8x8xbf16>,
      %c0_121 = arith.constant 0 : index
      %c8 = arith.constant 8 : index
      %c0_122 = arith.constant 0 : index
      %225 = vector.load %arg2[%c0_121, %c8, %c0_122] : memref<1x16x32xf32, #tpu.memory_space<vmem>>, vector<1x8x32xf32>
      %226 = vector.shape_cast %225 : vector<1x8x32xf32> to vector<8x32xf32>
      %c0_123 = arith.constant 0 : index
      %c0_124 = arith.constant 0 : index
      %227 = vector.load %arg3[%c0_123, %c0_124] : memref<1x32xf32, #tpu.memory_space<vmem>>, vector<1x32xf32>
      %c0_125 = arith.constant 0 : index
      %c0_126 = arith.constant 0 : index
      %228 = vector.load %arg4[%c0_125, %c0_126] : memref<1x32xf32, #tpu.memory_space<vmem>>, vector<1x32xf32>
      %cst_127 = arith.constant dense<0.000000e+00> : vector<8xf32>
      %229 = vector.multi_reduction <add>, %226, %cst_127 [1] : vector<8x32xf32> to vector<8xf32>
      %230 = vector.shape_cast %229 : vector<8xf32> to vector<8x1xf32>
      %cst_128 = arith.constant 3.200000e+01 : f32
      %231 = vector.broadcast %cst_128 : f32 to vector<8x1xf32>
      %232 = arith.divf %230, %231 : vector<8x1xf32>
      %233 = vector.broadcast %232 : vector<8x1xf32> to vector<8x32xf32>
      %234 = arith.subf %226, %233 : vector<8x32xf32>
      %235 = arith.mulf %234, %234 : vector<8x32xf32>
      %cst_129 = arith.constant dense<0.000000e+00> : vector<8xf32>
      %236 = vector.multi_reduction <add>, %235, %cst_129 [1] : vector<8x32xf32> to vector<8xf32>
      %237 = vector.shape_cast %236 : vector<8xf32> to vector<8x1xf32>
      %cst_130 = arith.constant 3.200000e+01 : f32
      %238 = vector.broadcast %cst_130 : f32 to vector<8x1xf32>
      %239 = arith.divf %237, %238 : vector<8x1xf32>
      %240 = vector.broadcast %232 : vector<8x1xf32> to vector<8x32xf32>
      %241 = arith.subf %226, %240 : vector<8x32xf32>
      %cst_131 = arith.constant 9.99999974E-6 : f32
      %242 = vector.broadcast %cst_131 : f32 to vector<8x1xf32>
      %243 = arith.addf %239, %242 : vector<8x1xf32>
      %244 = math.rsqrt %243 : vector<8x1xf32>
      %245 = vector.broadcast %244 : vector<8x1xf32> to vector<8x32xf32>
      %246 = arith.mulf %241, %245 : vector<8x32xf32>
      %247 = vector.broadcast %227 : vector<1x32xf32> to vector<8x32xf32>
      %248 = arith.mulf %246, %247 : vector<8x32xf32>
      %249 = vector.broadcast %228 : vector<1x32xf32> to vector<8x32xf32>
      %250 = arith.addf %248, %249 : vector<8x32xf32>
      %251 = arith.truncf %250 : vector<8x32xf32> to vector<8x32xbf16>
      %c0_132 = arith.constant 0 : index
      %c0_133 = arith.constant 0 : index
      %252 = vector.load %arg7[%c0_132, %c0_133] : memref<32x64xbf16, #tpu.memory_space<vmem>>, vector<32x64xbf16>
      %cst_134 = arith.constant dense<0.000000e+00> : vector<8x64xf32>
      %253 = tpu.matmul %251, %252, %cst_134 {dimension_numbers = #tpu.dot_dimension_numbers<[1], [0], [0], [1], [0, 0, 1, 1], [], []>} : vector<8x32xbf16>, vector<32x64xbf16>, vector<8x64xf32> -> vector<8x64xf32>
      %c0_135 = arith.constant 0 : index
      %c0_136 = arith.constant 0 : index
      %254 = vector.load %arg8[%c0_135, %c0_136] : memref<1x64xf32, #tpu.memory_space<vmem>>, vector<1x64xf32>
      %255 = vector.broadcast %254 : vector<1x64xf32> to vector<8x64xf32>
      %256 = arith.addf %253, %255 : vector<8x64xf32>
      %257 = vector.extract_strided_slice %256 {offsets = [0, 0], sizes = [8, 8], strides = [1, 1]} : vector<8x64xf32> to vector<8x8xf32>
      %258 = arith.truncf %257 : vector<8x8xf32> to vector<8x8xbf16>
      %c0_137 = arith.constant 0 : index
      %c8_138 = arith.constant 8 : index
      %c0_139 = arith.constant 0 : index
      %259 = vector.load %arg19[%c0_137, %c8_138, %c0_139] : memref<4x16x8xbf16, #tpu.memory_space<vmem>>, vector<1x8x8xbf16>
      %260 = vector.shape_cast %259 : vector<1x8x8xbf16> to vector<8x8xbf16>
      %261 = vector.shape_cast %258 : vector<8x8xbf16> to vector<1x8x8xbf16>
      tpu.vector_store %arg19[%c0_137, %c8_138, %c0_139], %261 {strides = array<i32>} : memref<4x16x8xbf16, #tpu.memory_space<vmem>>, vector<1x8x8xbf16>,
      %262 = vector.extract_strided_slice %256 {offsets = [0, 32], sizes = [8, 8], strides = [1, 1]} : vector<8x64xf32> to vector<8x8xf32>
      %263 = arith.truncf %262 : vector<8x8xf32> to vector<8x8xbf16>
      %c0_140 = arith.constant 0 : index
      %c8_141 = arith.constant 8 : index
      %c0_142 = arith.constant 0 : index
      %264 = vector.load %arg20[%c0_140, %c8_141, %c0_142] : memref<4x16x8xbf16, #tpu.memory_space<vmem>>, vector<1x8x8xbf16>
      %265 = vector.shape_cast %264 : vector<1x8x8xbf16> to vector<8x8xbf16>
      %266 = vector.shape_cast %263 : vector<8x8xbf16> to vector<1x8x8xbf16>
      tpu.vector_store %arg20[%c0_140, %c8_141, %c0_142], %266 {strides = array<i32>} : memref<4x16x8xbf16, #tpu.memory_space<vmem>>, vector<1x8x8xbf16>,
      %267 = vector.extract_strided_slice %256 {offsets = [0, 8], sizes = [8, 8], strides = [1, 1]} : vector<8x64xf32> to vector<8x8xf32>
      %268 = arith.truncf %267 : vector<8x8xf32> to vector<8x8xbf16>
      %c1_143 = arith.constant 1 : index
      %c8_144 = arith.constant 8 : index
      %c0_145 = arith.constant 0 : index
      %269 = vector.load %arg19[%c1_143, %c8_144, %c0_145] : memref<4x16x8xbf16, #tpu.memory_space<vmem>>, vector<1x8x8xbf16>
      %270 = vector.shape_cast %269 : vector<1x8x8xbf16> to vector<8x8xbf16>
      %271 = vector.shape_cast %268 : vector<8x8xbf16> to vector<1x8x8xbf16>
      tpu.vector_store %arg19[%c1_143, %c8_144, %c0_145], %271 {strides = array<i32>} : memref<4x16x8xbf16, #tpu.memory_space<vmem>>, vector<1x8x8xbf16>,
      %272 = vector.extract_strided_slice %256 {offsets = [0, 40], sizes = [8, 8], strides = [1, 1]} : vector<8x64xf32> to vector<8x8xf32>
      %273 = arith.truncf %272 : vector<8x8xf32> to vector<8x8xbf16>
      %c1_146 = arith.constant 1 : index
      %c8_147 = arith.constant 8 : index
      %c0_148 = arith.constant 0 : index
      %274 = vector.load %arg20[%c1_146, %c8_147, %c0_148] : memref<4x16x8xbf16, #tpu.memory_space<vmem>>, vector<1x8x8xbf16>
      %275 = vector.shape_cast %274 : vector<1x8x8xbf16> to vector<8x8xbf16>
      %276 = vector.shape_cast %273 : vector<8x8xbf16> to vector<1x8x8xbf16>
      tpu.vector_store %arg20[%c1_146, %c8_147, %c0_148], %276 {strides = array<i32>} : memref<4x16x8xbf16, #tpu.memory_space<vmem>>, vector<1x8x8xbf16>,
      %277 = vector.extract_strided_slice %256 {offsets = [0, 16], sizes = [8, 8], strides = [1, 1]} : vector<8x64xf32> to vector<8x8xf32>
      %278 = arith.truncf %277 : vector<8x8xf32> to vector<8x8xbf16>
      %c2_149 = arith.constant 2 : index
      %c8_150 = arith.constant 8 : index
      %c0_151 = arith.constant 0 : index
      %279 = vector.load %arg19[%c2_149, %c8_150, %c0_151] : memref<4x16x8xbf16, #tpu.memory_space<vmem>>, vector<1x8x8xbf16>
      %280 = vector.shape_cast %279 : vector<1x8x8xbf16> to vector<8x8xbf16>
      %281 = vector.shape_cast %278 : vector<8x8xbf16> to vector<1x8x8xbf16>
      tpu.vector_store %arg19[%c2_149, %c8_150, %c0_151], %281 {strides = array<i32>} : memref<4x16x8xbf16, #tpu.memory_space<vmem>>, vector<1x8x8xbf16>,
      %282 = vector.extract_strided_slice %256 {offsets = [0, 48], sizes = [8, 8], strides = [1, 1]} : vector<8x64xf32> to vector<8x8xf32>
      %283 = arith.truncf %282 : vector<8x8xf32> to vector<8x8xbf16>
      %c2_152 = arith.constant 2 : index
      %c8_153 = arith.constant 8 : index
      %c0_154 = arith.constant 0 : index
      %284 = vector.load %arg20[%c2_152, %c8_153, %c0_154] : memref<4x16x8xbf16, #tpu.memory_space<vmem>>, vector<1x8x8xbf16>
      %285 = vector.shape_cast %284 : vector<1x8x8xbf16> to vector<8x8xbf16>
      %286 = vector.shape_cast %283 : vector<8x8xbf16> to vector<1x8x8xbf16>
      tpu.vector_store %arg20[%c2_152, %c8_153, %c0_154], %286 {strides = array<i32>} : memref<4x16x8xbf16, #tpu.memory_space<vmem>>, vector<1x8x8xbf16>,
      %287 = vector.extract_strided_slice %256 {offsets = [0, 24], sizes = [8, 8], strides = [1, 1]} : vector<8x64xf32> to vector<8x8xf32>
      %288 = arith.truncf %287 : vector<8x8xf32> to vector<8x8xbf16>
      %c3_155 = arith.constant 3 : index
      %c8_156 = arith.constant 8 : index
      %c0_157 = arith.constant 0 : index
      %289 = vector.load %arg19[%c3_155, %c8_156, %c0_157] : memref<4x16x8xbf16, #tpu.memory_space<vmem>>, vector<1x8x8xbf16>
      %290 = vector.shape_cast %289 : vector<1x8x8xbf16> to vector<8x8xbf16>
      %291 = vector.shape_cast %288 : vector<8x8xbf16> to vector<1x8x8xbf16>
      tpu.vector_store %arg19[%c3_155, %c8_156, %c0_157], %291 {strides = array<i32>} : memref<4x16x8xbf16, #tpu.memory_space<vmem>>, vector<1x8x8xbf16>,
      %292 = vector.extract_strided_slice %256 {offsets = [0, 56], sizes = [8, 8], strides = [1, 1]} : vector<8x64xf32> to vector<8x8xf32>
      %293 = arith.truncf %292 : vector<8x8xf32> to vector<8x8xbf16>
      %c3_158 = arith.constant 3 : index
      %c8_159 = arith.constant 8 : index
      %c0_160 = arith.constant 0 : index
      %294 = vector.load %arg20[%c3_158, %c8_159, %c0_160] : memref<4x16x8xbf16, #tpu.memory_space<vmem>>, vector<1x8x8xbf16>
      %295 = vector.shape_cast %294 : vector<1x8x8xbf16> to vector<8x8xbf16>
      %296 = vector.shape_cast %293 : vector<8x8xbf16> to vector<1x8x8xbf16>
      tpu.vector_store %arg20[%c3_158, %c8_159, %c0_160], %296 {strides = array<i32>} : memref<4x16x8xbf16, #tpu.memory_space<vmem>>, vector<1x8x8xbf16>,
    } else {
    }
    %c8_i32 = arith.constant 8 : i32
    %3 = arith.muli %arg1, %c8_i32 : i32
    %4 = tpu.assume_multiple %3, 8 : i32
    %c0 = arith.constant 0 : index
    %5 = arith.index_cast %4 : i32 to index
    %c0_1 = arith.constant 0 : index
    %6 = vector.load %arg2[%c0, %5, %c0_1] : memref<1x16x32xf32, #tpu.memory_space<vmem>>, vector<1x8x32xf32>
    %7 = vector.shape_cast %6 : vector<1x8x32xf32> to vector<8x32xf32>
    %c0_2 = arith.constant 0 : index
    %c0_3 = arith.constant 0 : index
    %8 = vector.load %arg3[%c0_2, %c0_3] : memref<1x32xf32, #tpu.memory_space<vmem>>, vector<1x32xf32>
    %c0_4 = arith.constant 0 : index
    %c0_5 = arith.constant 0 : index
    %9 = vector.load %arg4[%c0_4, %c0_5] : memref<1x32xf32, #tpu.memory_space<vmem>>, vector<1x32xf32>
    %cst = arith.constant dense<0.000000e+00> : vector<8xf32>
    %10 = vector.multi_reduction <add>, %7, %cst [1] : vector<8x32xf32> to vector<8xf32>
    %11 = vector.shape_cast %10 : vector<8xf32> to vector<8x1xf32>
    %cst_6 = arith.constant 3.200000e+01 : f32
    %12 = vector.broadcast %cst_6 : f32 to vector<8x1xf32>
    %13 = arith.divf %11, %12 : vector<8x1xf32>
    %14 = vector.broadcast %13 : vector<8x1xf32> to vector<8x32xf32>
    %15 = arith.subf %7, %14 : vector<8x32xf32>
    %16 = arith.mulf %15, %15 : vector<8x32xf32>
    %cst_7 = arith.constant dense<0.000000e+00> : vector<8xf32>
    %17 = vector.multi_reduction <add>, %16, %cst_7 [1] : vector<8x32xf32> to vector<8xf32>
    %18 = vector.shape_cast %17 : vector<8xf32> to vector<8x1xf32>
    %cst_8 = arith.constant 3.200000e+01 : f32
    %19 = vector.broadcast %cst_8 : f32 to vector<8x1xf32>
    %20 = arith.divf %18, %19 : vector<8x1xf32>
    %21 = vector.broadcast %13 : vector<8x1xf32> to vector<8x32xf32>
    %22 = arith.subf %7, %21 : vector<8x32xf32>
    %cst_9 = arith.constant 9.99999974E-6 : f32
    %23 = vector.broadcast %cst_9 : f32 to vector<8x1xf32>
    %24 = arith.addf %20, %23 : vector<8x1xf32>
    %25 = math.rsqrt %24 : vector<8x1xf32>
    %26 = vector.broadcast %25 : vector<8x1xf32> to vector<8x32xf32>
    %27 = arith.mulf %22, %26 : vector<8x32xf32>
    %28 = vector.broadcast %8 : vector<1x32xf32> to vector<8x32xf32>
    %29 = arith.mulf %27, %28 : vector<8x32xf32>
    %30 = vector.broadcast %9 : vector<1x32xf32> to vector<8x32xf32>
    %31 = arith.addf %29, %30 : vector<8x32xf32>
    %32 = arith.truncf %31 : vector<8x32xf32> to vector<8x32xbf16>
    %c0_10 = arith.constant 0 : index
    %c0_11 = arith.constant 0 : index
    %33 = vector.load %arg5[%c0_10, %c0_11] : memref<32x32xbf16, #tpu.memory_space<vmem>>, vector<32x32xbf16>
    %cst_12 = arith.constant dense<0.000000e+00> : vector<8x32xf32>
    %34 = tpu.matmul %32, %33, %cst_12 {dimension_numbers = #tpu.dot_dimension_numbers<[1], [0], [0], [1], [0, 0, 1, 1], [], []>} : vector<8x32xbf16>, vector<32x32xbf16>, vector<8x32xf32> -> vector<8x32xf32>
    %c0_13 = arith.constant 0 : index
    %c0_14 = arith.constant 0 : index
    %35 = vector.load %arg6[%c0_13, %c0_14] : memref<1x32xf32, #tpu.memory_space<vmem>>, vector<1x32xf32>
    %36 = vector.broadcast %35 : vector<1x32xf32> to vector<8x32xf32>
    %37 = arith.addf %34, %36 : vector<8x32xf32>
    %38 = vector.extract_strided_slice %37 {offsets = [0, 0], sizes = [8, 8], strides = [1, 1]} : vector<8x32xf32> to vector<8x8xf32>
    %39 = arith.truncf %38 : vector<8x8xf32> to vector<8x8xbf16>
    %c0_15 = arith.constant 0 : index
    %c0_16 = arith.constant 0 : index
    %c0_17 = arith.constant 0 : index
    %40 = vector.load %arg18[%c0_15, %c0_16, %c0_17] : memref<4x8x8xbf16, #tpu.memory_space<vmem>>, vector<1x8x8xbf16>
    %41 = vector.shape_cast %40 : vector<1x8x8xbf16> to vector<8x8xbf16>
    %42 = vector.shape_cast %39 : vector<8x8xbf16> to vector<1x8x8xbf16>
    tpu.vector_store %arg18[%c0_15, %c0_16, %c0_17], %42 {strides = array<i32>} : memref<4x8x8xbf16, #tpu.memory_space<vmem>>, vector<1x8x8xbf16>,
    %43 = vector.extract_strided_slice %37 {offsets = [0, 8], sizes = [8, 8], strides = [1, 1]} : vector<8x32xf32> to vector<8x8xf32>
    %44 = arith.truncf %43 : vector<8x8xf32> to vector<8x8xbf16>
    %c1 = arith.constant 1 : index
    %c0_18 = arith.constant 0 : index
    %c0_19 = arith.constant 0 : index
    %45 = vector.load %arg18[%c1, %c0_18, %c0_19] : memref<4x8x8xbf16, #tpu.memory_space<vmem>>, vector<1x8x8xbf16>
    %46 = vector.shape_cast %45 : vector<1x8x8xbf16> to vector<8x8xbf16>
    %47 = vector.shape_cast %44 : vector<8x8xbf16> to vector<1x8x8xbf16>
    tpu.vector_store %arg18[%c1, %c0_18, %c0_19], %47 {strides = array<i32>} : memref<4x8x8xbf16, #tpu.memory_space<vmem>>, vector<1x8x8xbf16>,
    %48 = vector.extract_strided_slice %37 {offsets = [0, 16], sizes = [8, 8], strides = [1, 1]} : vector<8x32xf32> to vector<8x8xf32>
    %49 = arith.truncf %48 : vector<8x8xf32> to vector<8x8xbf16>
    %c2 = arith.constant 2 : index
    %c0_20 = arith.constant 0 : index
    %c0_21 = arith.constant 0 : index
    %50 = vector.load %arg18[%c2, %c0_20, %c0_21] : memref<4x8x8xbf16, #tpu.memory_space<vmem>>, vector<1x8x8xbf16>
    %51 = vector.shape_cast %50 : vector<1x8x8xbf16> to vector<8x8xbf16>
    %52 = vector.shape_cast %49 : vector<8x8xbf16> to vector<1x8x8xbf16>
    tpu.vector_store %arg18[%c2, %c0_20, %c0_21], %52 {strides = array<i32>} : memref<4x8x8xbf16, #tpu.memory_space<vmem>>, vector<1x8x8xbf16>,
    %53 = vector.extract_strided_slice %37 {offsets = [0, 24], sizes = [8, 8], strides = [1, 1]} : vector<8x32xf32> to vector<8x8xf32>
    %54 = arith.truncf %53 : vector<8x8xf32> to vector<8x8xbf16>
    %c3 = arith.constant 3 : index
    %c0_22 = arith.constant 0 : index
    %c0_23 = arith.constant 0 : index
    %55 = vector.load %arg18[%c3, %c0_22, %c0_23] : memref<4x8x8xbf16, #tpu.memory_space<vmem>>, vector<1x8x8xbf16>
    %56 = vector.shape_cast %55 : vector<1x8x8xbf16> to vector<8x8xbf16>
    %57 = vector.shape_cast %54 : vector<8x8xbf16> to vector<1x8x8xbf16>
    tpu.vector_store %arg18[%c3, %c0_22, %c0_23], %57 {strides = array<i32>} : memref<4x8x8xbf16, #tpu.memory_space<vmem>>, vector<1x8x8xbf16>,
    %c0_24 = arith.constant 0 : index
    %c0_25 = arith.constant 0 : index
    %c0_26 = arith.constant 0 : index
    %58 = vector.load %arg18[%c0_24, %c0_25, %c0_26] : memref<4x8x8xbf16, #tpu.memory_space<vmem>>, vector<4x8x8xbf16>
    %c0_27 = arith.constant 0 : index
    %c0_28 = arith.constant 0 : index
    %c0_29 = arith.constant 0 : index
    %59 = vector.load %arg19[%c0_27, %c0_28, %c0_29] : memref<4x16x8xbf16, #tpu.memory_space<vmem>>, vector<4x16x8xbf16>
    %c0_30 = arith.constant 0 : index
    %c0_31 = arith.constant 0 : index
    %c0_32 = arith.constant 0 : index
    %60 = vector.load %arg20[%c0_30, %c0_31, %c0_32] : memref<4x16x8xbf16, #tpu.memory_space<vmem>>, vector<4x16x8xbf16>
    "tpu.trace_start"() <{level = 10 : i32, message = "hqd,hkd->hqk"}> : () -> ()
    %cst_33 = arith.constant dense<0.000000e+00> : vector<4x8x16xf32>
    %61 = tpu.matmul %58, %59, %cst_33 {dimension_numbers = #tpu.dot_dimension_numbers<[2], [2], [1], [1], [0, 0, 0, 1, 1, 1], [0], [0]>} : vector<4x8x8xbf16>, vector<4x16x8xbf16>, vector<4x8x16xf32> -> vector<4x8x16xf32>
    "tpu.trace_stop"() : () -> ()
    %cst_34 = arith.constant dense<0xFF800000> : vector<4x8xf32>
    %62 = vector.multi_reduction <maximumf>, %61, %cst_34 [2] : vector<4x8x16xf32> to vector<4x8xf32>
    %63 = vector.shape_cast %62 : vector<4x8xf32> to vector<4x8x1xf32>
    %64 = vector.broadcast %63 : vector<4x8x1xf32> to vector<4x8x16xf32>
    %65 = arith.subf %61, %64 : vector<4x8x16xf32>
    %66 = math.exp %65 : vector<4x8x16xf32>
    %cst_35 = arith.constant dense<0.000000e+00> : vector<4x8xf32>
    %67 = vector.multi_reduction <add>, %66, %cst_35 [2] : vector<4x8x16xf32> to vector<4x8xf32>
    %68 = vector.shape_cast %67 : vector<4x8xf32> to vector<4x8x1xf32>
    %69 = arith.truncf %66 : vector<4x8x16xf32> to vector<4x8x16xbf16>
    "tpu.trace_start"() <{level = 10 : i32, message = "hqk,hkd->hqd"}> : () -> ()
    %cst_36 = arith.constant dense<0.000000e+00> : vector<4x8x8xf32>
    %70 = tpu.matmul %69, %60, %cst_36 {dimension_numbers = #tpu.dot_dimension_numbers<[2], [1], [1], [2], [0, 0, 0, 1, 1, 2], [0], [0]>} : vector<4x8x16xbf16>, vector<4x16x8xbf16>, vector<4x8x8xf32> -> vector<4x8x8xf32>
    "tpu.trace_stop"() : () -> ()
    %71 = tpu.reciprocal %68 {approx = true} : vector<4x8x1xf32> -> vector<4x8x1xf32>
    %72 = vector.broadcast %71 : vector<4x8x1xf32> to vector<4x8x8xf32>
    %73 = arith.mulf %70, %72 : vector<4x8x8xf32>
    %74 = vector.extract_strided_slice %73 {offsets = [0, 0, 0], sizes = [1, 8, 8], strides = [1, 1, 1]} : vector<4x8x8xf32> to vector<1x8x8xf32>
    %75 = vector.shape_cast %74 : vector<1x8x8xf32> to vector<8x8xf32>
    %76 = arith.truncf %75 : vector<8x8xf32> to vector<8x8xbf16>
    %c0_37 = arith.constant 0 : index
    %c0_38 = arith.constant 0 : index
    %c0_39 = arith.constant 0 : index
    %77 = vector.load %arg9[%c0_37, %c0_38, %c0_39] : memref<4x8x32xbf16, #tpu.memory_space<vmem>>, vector<1x8x32xbf16>
    %78 = vector.shape_cast %77 : vector<1x8x32xbf16> to vector<8x32xbf16>
    %cst_40 = arith.constant dense<0.000000e+00> : vector<8x32xf32>
    %79 = tpu.matmul %76, %78, %cst_40 {dimension_numbers = #tpu.dot_dimension_numbers<[1], [0], [0], [1], [0, 0, 1, 1], [], []>} : vector<8x8xbf16>, vector<8x32xbf16>, vector<8x32xf32> -> vector<8x32xf32>
    %80 = vector.extract_strided_slice %73 {offsets = [1, 0, 0], sizes = [1, 8, 8], strides = [1, 1, 1]} : vector<4x8x8xf32> to vector<1x8x8xf32>
    %81 = vector.shape_cast %80 : vector<1x8x8xf32> to vector<8x8xf32>
    %82 = arith.truncf %81 : vector<8x8xf32> to vector<8x8xbf16>
    %c1_41 = arith.constant 1 : index
    %c0_42 = arith.constant 0 : index
    %c0_43 = arith.constant 0 : index
    %83 = vector.load %arg9[%c1_41, %c0_42, %c0_43] : memref<4x8x32xbf16, #tpu.memory_space<vmem>>, vector<1x8x32xbf16>
    %84 = vector.shape_cast %83 : vector<1x8x32xbf16> to vector<8x32xbf16>
    %cst_44 = arith.constant dense<0.000000e+00> : vector<8x32xf32>
    %85 = tpu.matmul %82, %84, %cst_44 {dimension_numbers = #tpu.dot_dimension_numbers<[1], [0], [0], [1], [0, 0, 1, 1], [], []>} : vector<8x8xbf16>, vector<8x32xbf16>, vector<8x32xf32> -> vector<8x32xf32>
    %86 = arith.addf %79, %85 : vector<8x32xf32>
    %87 = vector.extract_strided_slice %73 {offsets = [2, 0, 0], sizes = [1, 8, 8], strides = [1, 1, 1]} : vector<4x8x8xf32> to vector<1x8x8xf32>
    %88 = vector.shape_cast %87 : vector<1x8x8xf32> to vector<8x8xf32>
    %89 = arith.truncf %88 : vector<8x8xf32> to vector<8x8xbf16>
    %c2_45 = arith.constant 2 : index
    %c0_46 = arith.constant 0 : index
    %c0_47 = arith.constant 0 : index
    %90 = vector.load %arg9[%c2_45, %c0_46, %c0_47] : memref<4x8x32xbf16, #tpu.memory_space<vmem>>, vector<1x8x32xbf16>
    %91 = vector.shape_cast %90 : vector<1x8x32xbf16> to vector<8x32xbf16>
    %cst_48 = arith.constant dense<0.000000e+00> : vector<8x32xf32>
    %92 = tpu.matmul %89, %91, %cst_48 {dimension_numbers = #tpu.dot_dimension_numbers<[1], [0], [0], [1], [0, 0, 1, 1], [], []>} : vector<8x8xbf16>, vector<8x32xbf16>, vector<8x32xf32> -> vector<8x32xf32>
    %93 = arith.addf %86, %92 : vector<8x32xf32>
    %94 = vector.extract_strided_slice %73 {offsets = [3, 0, 0], sizes = [1, 8, 8], strides = [1, 1, 1]} : vector<4x8x8xf32> to vector<1x8x8xf32>
    %95 = vector.shape_cast %94 : vector<1x8x8xf32> to vector<8x8xf32>
    %96 = arith.truncf %95 : vector<8x8xf32> to vector<8x8xbf16>
    %c3_49 = arith.constant 3 : index
    %c0_50 = arith.constant 0 : index
    %c0_51 = arith.constant 0 : index
    %97 = vector.load %arg9[%c3_49, %c0_50, %c0_51] : memref<4x8x32xbf16, #tpu.memory_space<vmem>>, vector<1x8x32xbf16>
    %98 = vector.shape_cast %97 : vector<1x8x32xbf16> to vector<8x32xbf16>
    %cst_52 = arith.constant dense<0.000000e+00> : vector<8x32xf32>
    %99 = tpu.matmul %96, %98, %cst_52 {dimension_numbers = #tpu.dot_dimension_numbers<[1], [0], [0], [1], [0, 0, 1, 1], [], []>} : vector<8x8xbf16>, vector<8x32xbf16>, vector<8x32xf32> -> vector<8x32xf32>
    %100 = arith.addf %93, %99 : vector<8x32xf32>
    %c0_53 = arith.constant 0 : index
    %c0_54 = arith.constant 0 : index
    %101 = vector.load %arg10[%c0_53, %c0_54] : memref<1x32xf32, #tpu.memory_space<vmem>>, vector<1x32xf32>
    %102 = vector.broadcast %101 : vector<1x32xf32> to vector<8x32xf32>
    %103 = arith.addf %100, %102 : vector<8x32xf32>
    %104 = arith.addf %7, %103 : vector<8x32xf32>
    %c0_55 = arith.constant 0 : index
    %c0_56 = arith.constant 0 : index
    %105 = vector.load %arg11[%c0_55, %c0_56] : memref<1x32xf32, #tpu.memory_space<vmem>>, vector<1x32xf32>
    %c0_57 = arith.constant 0 : index
    %c0_58 = arith.constant 0 : index
    %106 = vector.load %arg12[%c0_57, %c0_58] : memref<1x32xf32, #tpu.memory_space<vmem>>, vector<1x32xf32>
    %cst_59 = arith.constant dense<0.000000e+00> : vector<8xf32>
    %107 = vector.multi_reduction <add>, %104, %cst_59 [1] : vector<8x32xf32> to vector<8xf32>
    %108 = vector.shape_cast %107 : vector<8xf32> to vector<8x1xf32>
    %cst_60 = arith.constant 3.200000e+01 : f32
    %109 = vector.broadcast %cst_60 : f32 to vector<8x1xf32>
    %110 = arith.divf %108, %109 : vector<8x1xf32>
    %111 = vector.broadcast %110 : vector<8x1xf32> to vector<8x32xf32>
    %112 = arith.subf %104, %111 : vector<8x32xf32>
    %113 = arith.mulf %112, %112 : vector<8x32xf32>
    %cst_61 = arith.constant dense<0.000000e+00> : vector<8xf32>
    %114 = vector.multi_reduction <add>, %113, %cst_61 [1] : vector<8x32xf32> to vector<8xf32>
    %115 = vector.shape_cast %114 : vector<8xf32> to vector<8x1xf32>
    %cst_62 = arith.constant 3.200000e+01 : f32
    %116 = vector.broadcast %cst_62 : f32 to vector<8x1xf32>
    %117 = arith.divf %115, %116 : vector<8x1xf32>
    %118 = vector.broadcast %110 : vector<8x1xf32> to vector<8x32xf32>
    %119 = arith.subf %104, %118 : vector<8x32xf32>
    %cst_63 = arith.constant 9.99999974E-6 : f32
    %120 = vector.broadcast %cst_63 : f32 to vector<8x1xf32>
    %121 = arith.addf %117, %120 : vector<8x1xf32>
    %122 = math.rsqrt %121 : vector<8x1xf32>
    %123 = vector.broadcast %122 : vector<8x1xf32> to vector<8x32xf32>
    %124 = arith.mulf %119, %123 : vector<8x32xf32>
    %125 = vector.broadcast %105 : vector<1x32xf32> to vector<8x32xf32>
    %126 = arith.mulf %124, %125 : vector<8x32xf32>
    %127 = vector.broadcast %106 : vector<1x32xf32> to vector<8x32xf32>
    %128 = arith.addf %126, %127 : vector<8x32xf32>
    %129 = arith.truncf %128 : vector<8x32xf32> to vector<8x32xbf16>
    %c0_64 = arith.constant 0 : index
    %c0_65 = arith.constant 0 : index
    %130 = vector.load %arg13[%c0_64, %c0_65] : memref<32x64xbf16, #tpu.memory_space<vmem>>, vector<32x64xbf16>
    %cst_66 = arith.constant dense<0.000000e+00> : vector<8x64xf32>
    %131 = tpu.matmul %129, %130, %cst_66 {dimension_numbers = #tpu.dot_dimension_numbers<[1], [0], [0], [1], [0, 0, 1, 1], [], []>} : vector<8x32xbf16>, vector<32x64xbf16>, vector<8x64xf32> -> vector<8x64xf32>
    %c0_67 = arith.constant 0 : index
    %c0_68 = arith.constant 0 : index
    %132 = vector.load %arg14[%c0_67, %c0_68] : memref<1x64xf32, #tpu.memory_space<vmem>>, vector<1x64xf32>
    %133 = vector.broadcast %132 : vector<1x64xf32> to vector<8x64xf32>
    %134 = arith.addf %131, %133 : vector<8x64xf32>
    %cst_69 = arith.constant 5.000000e-01 : f32
    %135 = vector.broadcast %cst_69 : f32 to vector<8x64xf32>
    %136 = arith.mulf %135, %134 : vector<8x64xf32>
    %cst_70 = arith.constant 0.707106769 : f32
    %137 = vector.broadcast %cst_70 : f32 to vector<8x64xf32>
    %138 = arith.mulf %134, %137 : vector<8x64xf32>
    %139 = math.erf %138 : vector<8x64xf32>
    %cst_71 = arith.constant 1.000000e+00 : f32
    %140 = vector.broadcast %cst_71 : f32 to vector<8x64xf32>
    %141 = arith.addf %140, %139 : vector<8x64xf32>
    %142 = arith.mulf %136, %141 : vector<8x64xf32>
    %143 = arith.truncf %142 : vector<8x64xf32> to vector<8x64xbf16>
    %c0_72 = arith.constant 0 : index
    %c0_73 = arith.constant 0 : index
    %144 = vector.load %arg15[%c0_72, %c0_73] : memref<64x32xbf16, #tpu.memory_space<vmem>>, vector<64x32xbf16>
    %cst_74 = arith.constant dense<0.000000e+00> : vector<8x32xf32>
    %145 = tpu.matmul %143, %144, %cst_74 {dimension_numbers = #tpu.dot_dimension_numbers<[1], [0], [0], [1], [0, 0, 1, 1], [], []>} : vector<8x64xbf16>, vector<64x32xbf16>, vector<8x32xf32> -> vector<8x32xf32>
    %c0_75 = arith.constant 0 : index
    %c0_76 = arith.constant 0 : index
    %146 = vector.load %arg16[%c0_75, %c0_76] : memref<1x32xf32, #tpu.memory_space<vmem>>, vector<1x32xf32>
    %147 = vector.broadcast %146 : vector<1x32xf32> to vector<8x32xf32>
    %148 = arith.addf %145, %147 : vector<8x32xf32>
    %149 = arith.addf %104, %148 : vector<8x32xf32>
    %c0_77 = arith.constant 0 : index
    %c0_78 = arith.constant 0 : index
    %c0_79 = arith.constant 0 : index
    %150 = vector.load %arg17[%c0_77, %c0_78, %c0_79] : memref<1x8x32xf32, #tpu.memory_space<vmem>>, vector<1x8x32xf32>
    %151 = vector.shape_cast %150 : vector<1x8x32xf32> to vector<8x32xf32>
    %152 = vector.shape_cast %149 : vector<8x32xf32> to vector<1x8x32xf32>
    tpu.vector_store %arg17[%c0_77, %c0_78, %c0_79], %152 {strides = array<i32>} : memref<1x8x32xf32, #tpu.memory_space<vmem>>, vector<1x8x32xf32>,
    return
  }
  func.func @transform_0(%arg0: i32, %arg1: i32) -> (i32, i32, i32) {
    %c0_i32 = arith.constant 0 : i32
    %c0_i32_0 = arith.constant 0 : i32
    %c0_i32_1 = arith.constant 0 : i32
    return %arg0, %c0_i32, %c0_i32_0 : i32, i32, i32
  }
  func.func @transform_1(%arg0: i32, %arg1: i32) -> (i32, i32) {
    %c0_i32 = arith.constant 0 : i32
    %c0_i32_0 = arith.constant 0 : i32
    %c0_i32_1 = arith.constant 0 : i32
    return %c0_i32, %c0_i32_0 : i32, i32
  }
  func.func @transform_2(%arg0: i32, %arg1: i32) -> (i32, i32) {
    %c0_i32 = arith.constant 0 : i32
    %c0_i32_0 = arith.constant 0 : i32
    %c0_i32_1 = arith.constant 0 : i32
    return %c0_i32, %c0_i32_0 : i32, i32
  }
  func.func @transform_3(%arg0: i32, %arg1: i32) -> (i32, i32) {
    %c0_i32 = arith.constant 0 : i32
    %c0_i32_0 = arith.constant 0 : i32
    %c0_i32_1 = arith.constant 0 : i32
    return %c0_i32, %c0_i32_0 : i32, i32
  }
  func.func @transform_4(%arg0: i32, %arg1: i32) -> (i32, i32) {
    %c0_i32 = arith.constant 0 : i32
    %c0_i32_0 = arith.constant 0 : i32
    %c0_i32_1 = arith.constant 0 : i32
    return %c0_i32, %c0_i32_0 : i32, i32
  }
  func.func @transform_5(%arg0: i32, %arg1: i32) -> (i32, i32) {
    %c0_i32 = arith.constant 0 : i32
    %c0_i32_0 = arith.constant 0 : i32
    %c0_i32_1 = arith.constant 0 : i32
    return %c0_i32, %c0_i32_0 : i32, i32
  }
  func.func @transform_6(%arg0: i32, %arg1: i32) -> (i32, i32) {
    %c0_i32 = arith.constant 0 : i32
    %c0_i32_0 = arith.constant 0 : i32
    %c0_i32_1 = arith.constant 0 : i32
    return %c0_i32, %c0_i32_0 : i32, i32
  }
  func.func @transform_7(%arg0: i32, %arg1: i32) -> (i32, i32, i32) {
    %c0_i32 = arith.constant 0 : i32
    %c0_i32_0 = arith.constant 0 : i32
    %c0_i32_1 = arith.constant 0 : i32
    %c0_i32_2 = arith.constant 0 : i32
    return %c0_i32, %c0_i32_0, %c0_i32_1 : i32, i32, i32
  }
  func.func @transform_8(%arg0: i32, %arg1: i32) -> (i32, i32) {
    %c0_i32 = arith.constant 0 : i32
    %c0_i32_0 = arith.constant 0 : i32
    %c0_i32_1 = arith.constant 0 : i32
    return %c0_i32, %c0_i32_0 : i32, i32
  }
  func.func @transform_9(%arg0: i32, %arg1: i32) -> (i32, i32) {
    %c0_i32 = arith.constant 0 : i32
    %c0_i32_0 = arith.constant 0 : i32
    %c0_i32_1 = arith.constant 0 : i32
    return %c0_i32, %c0_i32_0 : i32, i32
  }
  func.func @transform_10(%arg0: i32, %arg1: i32) -> (i32, i32) {
    %c0_i32 = arith.constant 0 : i32
    %c0_i32_0 = arith.constant 0 : i32
    %c0_i32_1 = arith.constant 0 : i32
    return %c0_i32, %c0_i32_0 : i32, i32
  }
  func.func @transform_11(%arg0: i32, %arg1: i32) -> (i32, i32) {
    %c0_i32 = arith.constant 0 : i32
    %c0_i32_0 = arith.constant 0 : i32
    %c0_i32_1 = arith.constant 0 : i32
    return %c0_i32, %c0_i32_0 : i32, i32
  }
  func.func @transform_12(%arg0: i32, %arg1: i32) -> (i32, i32) {
    %c0_i32 = arith.constant 0 : i32
    %c0_i32_0 = arith.constant 0 : i32
    %c0_i32_1 = arith.constant 0 : i32
    return %c0_i32, %c0_i32_0 : i32, i32
  }
  func.func @transform_13(%arg0: i32, %arg1: i32) -> (i32, i32) {
    %c0_i32 = arith.constant 0 : i32
    %c0_i32_0 = arith.constant 0 : i32
    %c0_i32_1 = arith.constant 0 : i32
    return %c0_i32, %c0_i32_0 : i32, i32
  }
  func.func @transform_14(%arg0: i32, %arg1: i32) -> (i32, i32) {
    %c0_i32 = arith.constant 0 : i32
    %c0_i32_0 = arith.constant 0 : i32
    %c0_i32_1 = arith.constant 0 : i32
    return %c0_i32, %c0_i32_0 : i32, i32
  }
  func.func @transform_15(%arg0: i32, %arg1: i32) -> (i32, i32, i32) {
    %c0_i32 = arith.constant 0 : i32
    %c0_i32_0 = arith.constant 0 : i32
    return %arg0, %arg1, %c0_i32 : i32, i32, i32
  }
}

</mosaic_0001>

<bundles_post_ra>
// kernel: tpu_custom_call.1
= control target key start
LH: loop header
LB: loop body
LE: loop exit
PB: predicated region body
PF: predicated region fallthrough
CT: control target
= control target key end

     0   :  { %s3067_s0 = inlined_call_operand.vmem [shape: f32[2,16,32], index: 0, kind: input, shape index: {}]   ;;  %s3068_s1 = inlined_call_operand.vmem [shape: f32[1,32], index: 1, kind: input, shape index: {}]   ;;  %s3069_s2 = inlined_call_operand.vmem [shape: f32[1,32], index: 2, kind: input, shape index: {}]   ;;  %s3070_s3 = inlined_call_operand.vmem [shape: bf16[32,32], index: 3, kind: input, shape index: {}]   ;;  %s3071_s4 = inlined_call_operand.vmem [shape: f32[1,32], index: 4, kind: input, shape index: {}]   ;;  %s3072_s5 = inlined_call_operand.hbm [shape: bf16[32,64], index: 5, kind: input, shape index: {}]   ;;  %s3073_s6 = inlined_call_operand.vmem [shape: f32[1,64], index: 6, kind: input, shape index: {}]   ;;  %s3074_s7 = inlined_call_operand.hbm [shape: bf16[4,8,32], index: 7, kind: input, shape index: {}]   ;;  %s3075_s8 = inlined_call_operand.vmem [shape: f32[1,32], index: 8, kind: input, shape index: {}]   ;;  %s3076_s9 = inlined_call_operand.vmem [shape: f32[1,32], index: 9, kind: input, shape index: {}]   ;;  %s3077_s10 = inlined_call_operand.vmem [shape: f32[1,32], index: 10, kind: input, shape index: {}]   ;;  %s3078_s11 = inlined_call_operand.hbm [shape: bf16[32,64], index: 11, kind: input, shape index: {}]   ;;  %s3079_s12 = inlined_call_operand.hbm [shape: f32[1,64], index: 12, kind: input, shape index: {}]   ;;  %s3080_s13 = inlined_call_operand.vmem [shape: bf16[64,32], index: 13, kind: input, shape index: {}]   ;;  %s3081_s14 = inlined_call_operand.vmem [shape: f32[1,32], index: 14, kind: input, shape index: {}]   ;;  %s3082_s15 = inlined_call_operand.hbm [shape: f32[2,16,32], index: 15, kind: output, shape index: {}]  }
   0x1   :  { %3093 = sst [smem:[#allocation26_spill]] %s3067_s0 }
   0x2   :  { %3094 = sst [smem:[#allocation27_spill]] %s3080_s13 }
   0x3   :  { %3095 = sst [smem:[#allocation28_spill]] %s3081_s14 }
   0x4   :  { %3096 = sst [smem:[#allocation29_spill]] %s3082_s15 }
   0x5   :  { %20 = vsyncpa [#allocation6], 0 }
   0x6   :  { %21 = vsyncpa [#allocation9], 0 }
   0x7   :  { %22 = vsyncpa [#allocation12], 0 }
   0x8   :  { %23 = vsyncpa [#allocation7], 0 }
   0x9   :  { %25 = vsyncpa [#allocation7 + $0x1], 0  ;;  %s2678_s18 = smov 0   ;;  %s2680_s19 = smov 0  }
   0xa   :  { %s2682_s20 = smov 0   ;;  %s2684_s21 = smov 0  }
   0xb   :  { %s2686_s22 = smov 0   ;;  %s2688_s23 = smov 0  }
   0xc   :  { %s2690_s24 = smov 0   ;;  %s2692_s25 = smov 0  }
   0xd LB: > { %3097 = sst [smem:[#allocation18_spill]] %s2547_s18  ;;  %s1955_s26 = sadd.s32 4294967295, %s2575_s25   ;;  %s2575_s25 = sphi %s2692_s25, %s31_s25   ;;  %s2571_s24 = sphi %s2690_s24, %s3123_s24   ;;  %s2567_s23 = sphi %s2688_s23, %s3122_s23   ;;  %s2563_s22 = sphi %s2686_s22, %s3121_s22   ;;  %s2559_s21 = sphi %s2684_s21, %s3120_s21   ;;  %s2555_s20 = sphi %s2682_s20, %s3119_s20   ;;  %s2551_s19 = sphi %s2680_s19, %s3125_s19   ;;  %s2547_s18 = sphi %s2678_s18, %s3124_s18  }
   0xe   : > { %3098 = sst [smem:[#allocation19_spill]] %s2555_s20  ;;  %s1956_s27 = sadd.s32 4294967294, %s2575_s25  }
   0xf   : > { %3099 = sst [smem:[#allocation20_spill]] %s2567_s23  ;;  %s40_s28 = sadd.s32 1, %s2567_s23 }
  0x10   : > { %3100 = sst [smem:[#allocation21_spill]] %s2571_s24  ;;  %s43_s29 = sadd.s32 1, %s2571_s24 }
  0x11   : > { %p41_p0 = scmp.ge.s32.totalorder %s40_s28, 2  ;;  %s372_s30 = sadd.s32 1, %s2555_s20 }
  0x12   : > { %p382_p1 = scmp.ne.s32.totalorder %s2555_s20, %s2551_s19  ;;  %p383_p2 = scmp.eq.s32.totalorder %s1955_s26, 3 }
  0x13   : > { %s3127_s28 = smov (%p41_p0, %s40_s28), 0  ;;  %s3129_s29 = smov (!%p41_p0, %s43_s29), %s2571_s24 }
  0x14   : > { %3101 = sst [smem:[#allocation22_spill]] %s3127_s28  ;;  %s368_s16 = ssub.s32 %s2567_s23, %s3127_s28 }
  0x15   : > { %p2730_p3 = por %p383_p2, %p382_p1  ;;  %p45_p4 = scmp.ge.s32.totalorder %s3129_s29, 2 }
  0x16   : > { %p388_p5 = scmp.ne.s32.totalorder %s2551_s19, %s2547_s18  ;;  %p389_p6 = scmp.eq.s32.totalorder %s1956_s27, 3 }
  0x17   : > { %p1957_p7 = scmp.ge.s32.totalorder %s2575_s25, 1  ;;  %s3131_s29 = smov (%p45_p4, %s3129_s29), 0 }
  0x18   : > { %3103 = sst [smem:[#allocation23_spill]] %s3131_s29  ;;  %p2739_p8 = por %p389_p6, %p388_p5 }
  0x19   : > { %p396_p9 = scmp.lt.s32.totalorder %s2575_s25, 5  ;;  %s367_s14 = ssub.s32 %s2571_s24, %s3131_s29 }
  0x1a   : > { %s3104_s15 = scalar_select %p2739_p8, 1, 0 }
  0x1b   : > { %s369_s13 = sor.u32 %s368_s16, %s367_s14  ;;  %p2746_p10 = pnand %p1957_p7, %p396_p9 }
  0x1c   : > { %3105 = sst [smem:[#allocation24_spill]] %s3104_s15  ;;  %p370_p11 = scmp.eq.s32.totalorder %s369_s13, 0 }
  0x1d   : > { %p2750_p12 = scmp.eq.s32.totalorder %s1955_s26, 0  ;;  %p2211_p13 = pneg %p2746_p10 }
  0x1e   : > { %s2757_s27 = scalar_select %p370_p11, %s2555_s20, %s372_s30  }
  0x1f   : > { %p2761_p0 = pnand %p2750_p12, %p2211_p13  ;;  %s2577_s14 = smov [#allocation8]  }
  0x20   : > { %3108 = sst [smem:[#allocation25_spill]] %s2757_s27  ;;  %s436_s16 = sshll.u32 %s2577_s14, 4  ;;  %s437_s16 = int_to_ptr.vmem [resolvable:$true] %s436_s16 }
  0x21   : > { %p2369_p1 = pneg %p2761_p0  ;;  %s2378_s13 = scalar_lea.vmem %s437_s16, 256 }
  0x22   : > { %p2379_p2 = scmp.ne.s32.totalorder %s437_s16, %s2378_s13  ;;  %p2386_p6 = scmp.lt.s32.totalorder %s437_s16, %s437_s16 }
  0x23   : > { %p2387_p7 = scmp.lt.s32.totalorder %s2378_s13, %s2378_s13 }
  0x24   : > { %p2381_p4 = pnand %p2379_p2, %p2369_p1 }
  0x25   : > { %p2388_p9 = por %p2387_p7, %p2386_p6 }
  0x26   : > { %p2382_p5 = pneg %p2381_p4 }
  0x28   : > { %p2389_p11 = pnand %p2388_p9, %p2382_p5 }
  0x2a   : > { %2392 = shalt.err (!%p2389_p11)
}
  0x2b   : > { %s2578_s26 = smov 64   ;;  %s2579_s30 = smov 4  }
  0x2c   : > { %2217 = dma.hbm_to_vmem [thread:$0]  (!%p2761_p0), %s3074_s7, 256, %s437_s16, [#allocation9], %s2578_s26, %s2578_s26, %s2579_s30  }
  0x2d   : > { %s2580_s24 = smov [#allocation5]   ;;  %s2581_s20 = smov [#allocation10]  }
  0x2e   : > { %s420_s27 = sshll.u32 %s2580_s24, 4  ;;  %s458_s18 = sshll.u32 %s2581_s20, 4  ;;  %s421_s27 = int_to_ptr.vmem [resolvable:$true] %s420_s27  ;;  %s459_s18 = int_to_ptr.vmem [resolvable:$true] %s458_s18 }
  0x2f   : > { %s2404_s13 = scalar_lea.vmem %s421_s27, 256  ;;  %p2412_p5 = scmp.lt.s32.totalorder %s421_s27, %s421_s27 }
  0x30   : > { %p2405_p13 = scmp.ne.s32.totalorder %s421_s27, %s2404_s13  ;;  %p2413_p6 = scmp.lt.s32.totalorder %s2404_s13, %s2404_s13 }
  0x32   : > { %p2407_p2 = pnand %p2405_p13, %p2369_p1  ;;  %p2414_p7 = por %p2413_p6, %p2412_p5 }
  0x34   : > { %p2408_p4 = pneg %p2407_p2 }
  0x36   : > { %p2415_p9 = pnand %p2414_p7, %p2408_p4 }
  0x38   : > { %2418 = shalt.err (!%p2415_p9)
}
  0x39   : > { %2214 = dma.hbm_to_vmem [thread:$0]  (!%p2761_p0), %s3072_s5, 256, %s421_s27, [#allocation6], %s2578_s26, %s2578_s26, %s2579_s30  }
  0x3a   : > { %s2430_s29 = scalar_lea.vmem %s459_s18, 256  ;;  %p2438_p8 = scmp.lt.s32.totalorder %s459_s18, %s459_s18 }
  0x3b   : > { %p2431_p11 = scmp.ne.s32.totalorder %s459_s18, %s2430_s29  ;;  %p2439_p5 = scmp.lt.s32.totalorder %s2430_s29, %s2430_s29 }
  0x3d   : > { %p2433_p13 = pnand %p2431_p11, %p2369_p1  ;;  %p2440_p4 = por %p2439_p5, %p2438_p8 }
  0x3f   : > { %p2434_p2 = pneg %p2433_p13 }
  0x41   : > { %p2441_p6 = pnand %p2440_p4, %p2434_p2 }
  0x43   : > { %2444 = shalt.err (!%p2441_p6)
}
  0x44   : > { %2220 = dma.hbm_to_vmem [thread:$0]  (!%p2761_p0), %s3078_s11, 256, %s459_s18, [#allocation9], %s2578_s26, %s2578_s26, %s2579_s30  }
  0x45   : > { %s2582_s27 = smov [#allocation11]  }
  0x46   : > { %s472_s13 = sshll.u32 %s2582_s27, 4  ;;  %s473_s13 = int_to_ptr.vmem [resolvable:$true] %s472_s13 }
  0x47   : > { %s2456_s24 = scalar_lea.vmem %s473_s13, 16  ;;  %s2463_s20 = scalar_lea.vmem %s473_s13, 32 }
  0x48   : > { %p2457_p7 = scmp.ne.s32.totalorder %s473_s13, %s2456_s24  ;;  %p2464_p11 = scmp.lt.s32.totalorder %s473_s13, %s473_s13 }
  0x49   : > { %p2465_p13 = scmp.lt.s32.totalorder %s2463_s20, %s2456_s24 }
  0x4a   : > { %p2459_p8 = pnand %p2457_p7, %p2369_p1 }
  0x4b   : > { %p2466_p2 = por %p2465_p13, %p2464_p11 }
  0x4c   : > { %p2460_p9 = pneg %p2459_p8 }
  0x4e   : > { %p2467_p5 = pnand %p2466_p2, %p2460_p9 }
  0x50   : > { %2470 = shalt.err (!%p2467_p5)
}
  0x51   : > { %2223 = dma.hbm_to_vmem [thread:$0]  (!%p2761_p0), %s3079_s12, 16, %s473_s13, [#allocation12]  }
  0x52   : > { %499 = sbr.rel (%p2746_p10) target bundleno = 2883 (0xb43), region = 80 }
  0x57   : > { %2530 = dma.done.wait (%p2750_p12), [#allocation6], 256  }
  0x58   : > { %2532 = vsyncadd (%p2750_p12), [#allocation6], 4294967040 }
  0x59   : > { %2534 = dma.done.wait (%p2750_p12), [#allocation9], 512  }
  0x5a   : > { %2536 = vsyncadd (%p2750_p12), [#allocation9], 4294966784 }
  0x5b   : > { %2538 = dma.done.wait (%p2750_p12), [#allocation12], 16  }
  0x5c   : > { %2540 = vsyncadd (%p2750_p12), [#allocation12], 4294967280  ;;  %s3092_s15 = sand.u32 1, %s2551_s19   ;;  %p559_p10 = scmp.lt.s32.totalorder %s2563_s22, 1 }
  0x5d   : > { %s2826_s18 = sshll.u32 %s3092_s15, 3  ;;  %s3110_s0 = sld [smem:[#allocation26_spill]] }
  0x5e   : > { %s560_s28 = scalar_select %p559_p10, %s2563_s22, 1 }
  0x5f   : > { %s558_s13 = scalar_lea.vmem [#allocation13], %s2826_s18  ;;  %p1971_p12 = scmp.ne.s32.totalorder %s2559_s21, 0 }
  0x60   : > { %s2032_s26 = sshll.u32 %s560_s28, 4  ;;  %s2586_s30 = smov (!%p1971_p12), 120  }
  0x61   : > { %568 = sbr.rel (%p1971_p12) target bundleno = 754 (0x2f2), region = 100  ;;  %s2587_s14 = smov (!%p1971_p12), 80  }
  0x62   : > { %s2588_s23 = smov (!%p1971_p12), 88   ;;  %s2589_s24 = smov (!%p1971_p12), 72  }
  0x63   : > { %s2832_s27 = scalar_lea.vmem %s3110_s0, %s2032_s26  ;;  %s2585_s26 = smov (!%p1971_p12), 96  }
  0x64   : > { %s2590_s20 = smov (!%p1971_p12), 112   ;;  %s2591_s29 = smov (!%p1971_p12), 104  }
  0x66   : > { %v569_v0 = vld [vmem:[%s2832_s27] sm:$0xff]  ;;  %vm572_vm0 = vcmask 261120   ;;  %v708_v1 = vld [vmem:[%s2832_s27 + $0x8] sm:$0xff]  ;;  %v2321_v14 = vld [vmem:[#allocation5 + $0x8] sm:$0xff]   ;;  %v2583_v16 = vmov 0.0   ;;  %vm2584_vm1 = vmmov 0  }
  0x67   : > { %v573_v2 = vsel %vm572_vm0, %v569_v0, 0.0  ;;  %v711_v3 = vsel %vm572_vm0, %v708_v1, 0.0  ;;  %v2323_v15 = vld [vmem:[#allocation5 + $0x8] sm:$0xff]   ;;  %2077 = vmatprep.subr.bf16.mxu0 %v2583_v16  ;;  %2085 = vmatprep.subr.bf16.mxu1 %v2583_v16  ;;  %v2322_v17 = vld [vmem:[#allocation5] sm:$0xff]   ;;  %v1972_v26 = vld [vmem:[%s3068_s1] ss:$0 sm:$0xff] }
  0x68   : > { %574 = vadd.xlane.f32.xlu0 %v573_v2  ;;  %2078 = vmatpush3.bf16.msra.mxu0 %v2321_v14  ;;  %v2324_v18 = vld [vmem:[#allocation5] sm:$0xff]   ;;  %v1973_v28 = vld [vmem:[%s3069_s2] ss:$0 sm:$0xff]  ;;  %vm669_vm2 = vcmask 60416  }
  0x69   : > { %2086 = vmatpush3.bf16.msra.mxu1 %v2323_v15  ;;  %2079 = vmatprep.subr.bf16.mxu0 %v2583_v16  ;;  %v1974_v37 = vld [vmem:[%s3073_s6] ss:$0 sm:$0xff] }
  0x6a   : > { %2081 = vmatprep.mubr.msk.bf16.mxu0 %vm2584_vm1, %v2583_v16  ;;  %2087 = vmatprep.subr.bf16.mxu1 %v2583_v16 }
  0x6b   : > { %2089 = vmatprep.mubr.msk.bf16.mxu1 %vm2584_vm1, %v2583_v16 }
  0x6c   : > { %712 = vadd.xlane.f32.xlu0 %v711_v3  ;;  %2080 = vmatpush3.bf16.msra.mxu0 %v2322_v17 }
  0x6d   : > { %2088 = vmatpush3.bf16.msra.mxu1 %v2324_v18 }
  0xf1   : > { %v575_v4 = vpop.xlane.xlu0 %574 }
  0xf2   : > { %v577_v5 = vmul.f32 0.03125, %v575_v4 }
  0xf4   : > { %v578_v6 = vsub.f32 %v569_v0, %v577_v5 }
  0xf5   : > { %v713_v7 = vpop.xlane.xlu0 %712 }
  0xf6   : > { %v714_v8 = vmul.f32 0.03125, %v713_v7  ;;  %v579_v9 = vmul.f32 %v578_v6, %v578_v6 }
  0xf8   : > { %v715_v10 = vsub.f32 %v708_v1, %v714_v8  ;;  %v580_v11 = vsel %vm572_vm0, %v579_v9, 0.0 }
  0xf9   : > { %581 = vadd.xlane.f32.xlu1 %v580_v11 }
  0xfa   : > { %v716_v12 = vmul.f32 %v715_v10, %v715_v10 }
  0xfc   : > { %v717_v13 = vsel %vm572_vm0, %v716_v12, 0.0 }
  0xfd   : > { %718 = vadd.xlane.f32.xlu1 %v717_v13 }
 0x182   : > { %v582_v19 = vpop.xlane.xlu1 %581 }
 0x183   : > { %v583_v20 = vmul.f32 0.03125, %v582_v19 }
 0x185   : > { %v584_v21 = vadd.f32 1e-05, %v583_v20 }
 0x186   : > { %v719_v22 = vpop.xlane.xlu1 %718 }
 0x187   : > { %2325 = vrsqrt.f32 %v584_v21  ;;  %v720_v23 = vmul.f32 0.03125, %v719_v22 }
 0x189   : > { %v721_v24 = vadd.f32 1e-05, %v720_v23 }
 0x18b   : > { %2327 = vrsqrt.f32 %v721_v24 }
 0x194   : > { %v2326_v25 = vpop.eup %2325 }
 0x195   : > { %v586_v27 = vmul.f32 %v2326_v25, %v578_v6 }
 0x197   : > { %v593_v29 = vmul.f32 %v1972_v26, %v586_v27 }
 0x198   : > { %v2328_v30 = vpop.eup %2327 }
 0x199   : > { %v600_v31 = vadd.f32 %v1973_v28, %v593_v29  ;;  %v723_v32 = vmul.f32 %v2328_v30, %v715_v10 }
 0x19b   : > { %v601_v33 = vpack.c.bf16 %v600_v31, %v600_v31  ;;  %v730_v34 = vmul.f32 %v1972_v26, %v723_v32 }
 0x19d   : > { %2082 = vmatmul.mubr.msk.bf16.vlgmr.msra.gmra.mxu0 %vm572_vm0, %v601_v33  ;;  %v737_v35 = vadd.f32 %v1973_v28, %v730_v34 }
 0x19f   : > { %v738_v36 = vpack.c.bf16 %v737_v35, %v737_v35 }
 0x1a1   : > { %2090 = vmatmul.mubr.msk.bf16.vlgmr.msra.gmra.mxu1 %vm572_vm0, %v738_v36 }
 0x25d   : > { %v662_v38 = vpop.f32.mrf.mxu0 }
 0x25e   : > { %v663_v39 = vadd.f32 %v1974_v37, %v662_v38 }
 0x25f   : > { %v2083_v40 = vpop.f32.mrf.mxu0 }
 0x260   : > { %v668_v41 = vpack.c.bf16 %v663_v39, %v663_v39 }
 0x261   : > { %v665_v42 = vpop.f32.mrf.mxu0  ;;  %v799_v43 = vpop.f32.mrf.mxu1 }
 0x262   : > { %670 = vst.msk [vmem:[#allocation3] sm:$0xf] %vm669_vm2, %v668_v41  ;;  %v800_v44 = vadd.f32 %v1974_v37, %v799_v43  ;;  %674 = vrot.lane.b32.xlu0 %v668_v41, %s2585_s26  ;;  %678 = vrot.lane.b32.xlu1 %v668_v41, %s2586_s30 }
 0x263   : > { %v2084_v45 = vpop.f32.mrf.mxu0  ;;  %v2091_v46 = vpop.f32.mrf.mxu1 }
 0x264   : > { %v805_v47 = vpack.c.bf16 %v800_v44, %v800_v44 }
 0x265   : > { %v802_v48 = vpop.f32.mrf.mxu1 }
 0x266   : > { %806 = vst.msk [vmem:[#allocation3 + $0x4] sm:$0xf] %vm669_vm2, %v805_v47  ;;  %693 = vrot.lane.b32.xlu0 %v668_v41, %s2587_s14  ;;  %683 = vrot.lane.b32.xlu1 %v668_v41, %s2588_s23 }
 0x267   : > { %v2092_v49 = vpop.f32.mrf.mxu1 }
 0x26a   : > { %703 = vrot.lane.b32.xlu0 %v668_v41, %s2589_s24  ;;  %688 = vrot.lane.b32.xlu1 %v668_v41, %s2590_s20 }
 0x26e   : > { %698 = vrot.lane.b32.xlu1 %v668_v41, %s2591_s29  ;;  %814 = vrot.lane.b32.xlu0 %v805_v47, %s2586_s30 }
 0x272   : > { %822 = vrot.lane.b32.xlu0 %v805_v47, %s2590_s20  ;;  %810 = vrot.lane.b32.xlu1 %v805_v47, %s2585_s26 }
 0x276   : > { %830 = vrot.lane.b32.xlu0 %v805_v47, %s2591_s29  ;;  %818 = vrot.lane.b32.xlu1 %v805_v47, %s2588_s23 }
 0x27a   : > { %826 = vrot.lane.b32.xlu1 %v805_v47, %s2587_s14 }
 0x27e   : > { %834 = vrot.lane.b32.xlu1 %v805_v47, %s2589_s24 }
 0x2d4   : > { %v679_v50 = vpop.permute.xlu1 %678  ;;  %v675_v51 = vpop.permute.xlu0 %674 }
 0x2d5   : > { %682 = vst.msk [vmem:[#allocation3 + $0x8] sm:$0xf] %vm669_vm2, %v679_v50  ;;  %677 = vst.msk [vmem:[#allocation4] sm:$0xf] %vm669_vm2, %v675_v51 }
 0x2d8   : > { %v684_v52 = vpop.permute.xlu1 %683  ;;  %v694_v53 = vpop.permute.xlu0 %693 }
 0x2d9   : > { %687 = vst.msk [vmem:[#allocation4 + $0x8] sm:$0xf] %vm669_vm2, %v684_v52  ;;  %697 = vst.msk [vmem:[#allocation4 + $0x10] sm:$0xf] %vm669_vm2, %v694_v53 }
 0x2dc   : > { %v689_v54 = vpop.permute.xlu1 %688  ;;  %v704_v55 = vpop.permute.xlu0 %703 }
 0x2dd   : > { %692 = vst.msk [vmem:[#allocation3 + $0x10] sm:$0xf] %vm669_vm2, %v689_v54  ;;  %707 = vst.msk [vmem:[#allocation4 + $0x18] sm:$0xf] %vm669_vm2, %v704_v55 }
 0x2e0   : > { %v699_v56 = vpop.permute.xlu1 %698  ;;  %v815_v57 = vpop.permute.xlu0 %814 }
 0x2e1   : > { %702 = vst.msk [vmem:[#allocation3 + $0x18] sm:$0xf] %vm669_vm2, %v699_v56  ;;  %817 = vst.msk [vmem:[#allocation3 + $0xc] sm:$0xf] %vm669_vm2, %v815_v57 }
 0x2e4   : > { %v811_v58 = vpop.permute.xlu1 %810  ;;  %v823_v59 = vpop.permute.xlu0 %822 }
 0x2e5   : > { %813 = vst.msk [vmem:[#allocation4 + $0x4] sm:$0xf] %vm669_vm2, %v811_v58  ;;  %825 = vst.msk [vmem:[#allocation3 + $0x14] sm:$0xf] %vm669_vm2, %v823_v59 }
 0x2e8   : > { %v819_v60 = vpop.permute.xlu1 %818  ;;  %v831_v61 = vpop.permute.xlu0 %830 }
 0x2e9   : > { %821 = vst.msk [vmem:[#allocation4 + $0xc] sm:$0xf] %vm669_vm2, %v819_v60  ;;  %833 = vst.msk [vmem:[#allocation3 + $0x1c] sm:$0xf] %vm669_vm2, %v831_v61 }
 0x2ec   : > { %v827_v62 = vpop.permute.xlu1 %826 }
 0x2ed   : > { %829 = vst.msk [vmem:[#allocation4 + $0x14] sm:$0xf] %vm669_vm2, %v827_v62 }
 0x2f0   : > { %v835_v63 = vpop.permute.xlu1 %834 }
 0x2f1   : > { %837 = vst.msk [vmem:[#allocation4 + $0x1c] sm:$0xf] %vm669_vm2, %v835_v63 }
 0x2f2 PF: > { %s1986_s16 = sshll.u32 %s2559_s21, 3  ;;  %vm843_vm3 = vcmask 261120   ;;  %v2329_v7 = vld [vmem:[%s3070_s3 + $0x8] sm:$0xff]   ;;  %v2592_v8 = vmov 0.0   ;;  %vm2593_vm4 = vmmov 0   ;;  %v2330_v9 = vld [vmem:[%s3070_s3] sm:$0xff]  }
 0x2f3   : > { %s839_s28 = scalar_lea.vmem %s2832_s27, %s1986_s16  ;;  %2093 = vmatprep.subr.bf16.mxu1 %v2592_v8  ;;  %2097 = vmatprep.mubr.msk.bf16.mxu1 %vm2593_vm4, %v2592_v8  ;;  %v1987_v14 = vld [vmem:[%s3068_s1] ss:$0 sm:$0xff]  ;;  %v2331_v20 = vld [vmem:[#allocation3] sm:$0xff]   ;;  %vm985_vm5 = vcmask 64512   ;;  %v2332_v22 = vld [vmem:[#allocation3 + $0x8] sm:$0xff]   ;;  %vm940_vm6 = vcmask 60416  }
 0x2f4   : > { %v2871_v0 = vld [vmem:[%s839_s28] sm:$0xff]  ;;  %2094 = vmatpush3.bf16.msra.mxu1 %v2329_v7  ;;  %2107 = vmatprep.subr.bf16.mxu0 %v2592_v8  ;;  %v990_v21 = vsel %vm985_vm5, %v2331_v20, 0  ;;  %v1041_v23 = vsel %vm985_vm5, %v2332_v22, 0  ;;  %s2594_s26 = smov 104   ;;  %s2595_s30 = smov 120   ;;  %v2334_v36 = vld [vmem:[#allocation3 + $0x18] sm:$0xff]  }
 0x2f5   : > { %v844_v1 = vsel %vm843_vm3, %v2871_v0, 0.0  ;;  %2095 = vmatprep.subr.bf16.mxu1 %v2592_v8  ;;  %2109 = vmatprep.mubr.msk.bf16.mxu0 %vm2593_vm4, %v2592_v8  ;;  %v1988_v16 = vld [vmem:[%s3069_s2] ss:$0 sm:$0xff]  ;;  %s2596_s27 = smov 112   ;;  %v1143_v38 = vsel %vm985_vm5, %v2334_v36, 0  ;;  %vm1185_vm7 = vcmask 130048  }
 0x2f6   : > { %845 = vadd.xlane.f32.xlu0 %v844_v1  ;;  %2108 = vmatpush3.bf16.xpose.msra.mxu0 %v1041_v23  ;;  %v1989_v24 = vld [vmem:[%s3071_s4] ss:$0 sm:$0xff]  ;;  %v2335_v47 = vld [vmem:[#allocation4] sm:$0xff]   ;;  %v2336_v1 = vld [vmem:[#allocation4 + $0x8] sm:$0xff]   ;;  %vm1438_vm8 = vcmask 1043456   ;;  %vm1778_vm9 = vcmask 523264  }
 0x2f7   : > { %2119 = vmatprep.subr.bf16.mxu0 %v2592_v8  ;;  %v2333_v31 = vld [vmem:[#allocation3 + $0x10] sm:$0xff]   ;;  %s2028_s16 = sshll.u32 %s2563_s22, 1  ;;  %s3112_s14 = sld [smem:[#allocation28_spill]] }
 0x2f8   : > { %2096 = vmatpush3.bf16.msra.mxu1 %v2330_v9  ;;  %v1092_v32 = vsel %vm985_vm5, %v2333_v31, 0  ;;  %s1836_s28 = sadd.s32 %s2559_s21, %s2028_s16  ;;  %s1840_s24 = sshll.u32 %s558_s13, 4  ;;  %s3012_s24 = int_to_ptr.vmem [resolvable:$true] %s1840_s24 }
 0x2f9   : > { %2101 = vmatprep.subr.bf16.mxu1 %v2592_v8  ;;  %s2029_s23 = sshll.u32 %s1836_s28, 7  ;;  %s3113_s15 = sld [smem:[#allocation29_spill]] }
 0x2fa   : > { %s3114_s21 = sand.u32 1, %s2551_s19   ;;  %s2471_s16 = scalar_lea.vmem %s3012_s24, 128 }
 0x2fb   : > { %s1825_s22 = scalar_lea.sflag [#allocation7], %s3114_s21  ;;  %p2472_p0 = scmp.ne.s32.totalorder %s3012_s24, %s2471_s16 }
 0x2fc   : > { %s2597_s28 = smov [#allocation13]  }
 0x2fd   : > { %p2473_p1 = pnand %p2472_p0, %p2730_p3 }
 0x2ff   : > { %s3010_s0 = scalar_lea.hbm %s3113_s15, %s2029_s23  ;;  %p2474_p4 = pneg %p2473_p1 }
 0x37f   : > { %v846_v2 = vpop.xlane.xlu0 %845 }
 0x380   : > { %v848_v3 = vmul.f32 0.03125, %v846_v2 }
 0x382   : > { %v849_v4 = vsub.f32 %v2871_v0, %v848_v3 }
 0x384   : > { %v850_v5 = vmul.f32 %v849_v4, %v849_v4 }
 0x386   : > { %v851_v6 = vsel %vm843_vm3, %v850_v5, 0.0  ;;  %v2337_v5 = vld [vmem:[#allocation4 + $0x10] sm:$0xff]  }
 0x387   : > { %852 = vadd.xlane.f32.xlu0 %v851_v6 }
 0x410   : > { %v853_v10 = vpop.xlane.xlu0 %852 }
 0x411   : > { %v854_v11 = vmul.f32 0.03125, %v853_v10 }
 0x413   : > { %v855_v12 = vadd.f32 1e-05, %v854_v11 }
 0x415   : > { %2345 = vrsqrt.f32 %v855_v12 }
 0x422   : > { %v2346_v13 = vpop.eup %2345 }
 0x423   : > { %v857_v15 = vmul.f32 %v2346_v13, %v849_v4 }
 0x425   : > { %v864_v17 = vmul.f32 %v1987_v14, %v857_v15 }
 0x427   : > { %v871_v18 = vadd.f32 %v1988_v16, %v864_v17 }
 0x429   : > { %v872_v19 = vpack.c.bf16 %v871_v18, %v871_v18  ;;  %v2338_v18 = vld [vmem:[#allocation4 + $0x18] sm:$0xff]  }
 0x42b   : > { %2098 = vmatmul.mubr.msk.bf16.vlgmr.msra.gmra.mxu1 %vm843_vm3, %v872_v19 }
 0x42c   : > { %2103 = vmatprep.mubr.msk.bf16.mxu1 %vm2593_vm4, %v2592_v8  ;;  %2102 = vmatpush3.bf16.xpose.msra.mxu1 %v990_v21 }
 0x42d   : > { %2113 = vmatprep.subr.bf16.mxu1 %v2592_v8 }
 0x4eb   : > { %v933_v25 = vpop.f32.mrf.mxu1 }
 0x4ec   : > { %v934_v26 = vadd.f32 %v1989_v24, %v933_v25 }
 0x4ed   : > { %v2099_v27 = vpop.f32.mrf.mxu1 }
 0x4ee   : > { %v939_v28 = vpack.c.bf16 %v934_v26, %v934_v26 }
 0x4ef   : > { %v936_v29 = vpop.f32.mrf.mxu1 }
 0x4f0   : > { %941 = vst.msk [vmem:[#allocation2] sm:$0xf] %vm940_vm6, %v939_v28  ;;  %955 = vrot.lane.b32.xlu0 %v939_v28, %s2594_s26  ;;  %945 = vrot.lane.b32.xlu1 %v939_v28, %s2595_s30  ;;  %s3111_s30 = sld [smem:[#allocation27_spill]]  ;;  %s2475_s26 = sshll.u32 %s2597_s28, 4  ;;  %s2476_s26 = int_to_ptr.vmem [resolvable:$false] %s2475_s26 }
 0x4f1   : > { %v2100_v30 = vpop.f32.mrf.mxu1  ;;  %p2478_p6 = scmp.lt.s32.totalorder %s3012_s24, %s2476_s26 }
 0x4f2   : > { %v1434_v30 = vld [vmem:[#allocation8 + $0x4] sm:$0xf] }
 0x4f3   : > { %v1440_v31 = vsel %vm1438_vm8, %v1434_v30, 0 }
 0x4f4   : > { %950 = vrot.lane.b32.xlu1 %v939_v28, %s2596_s27  ;;  %v1431_v28 = vld [vmem:[#allocation8] sm:$0xf]  ;;  %s2477_s27 = scalar_lea.vmem %s2476_s26, 256 }
 0x4f5   : > { %v1486_v29 = vsel %vm1438_vm8, %v1431_v28, 0  ;;  %p2479_p7 = scmp.lt.s32.totalorder %s2477_s27, %s2471_s16 }
 0x4f7   : > { %v960_v33 = vld [vmem:[#allocation2] sm:$0xf]  ;;  %p2480_p8 = por %p2479_p7, %p2478_p6 }
 0x4f8   : > { %2104 = vmatmul.mubr.msk.bf16.vlgmr.msra.gmra.mxu1 %vm985_vm5, %v960_v33 }
 0x4f9   : > { %2114 = vmatpush3.bf16.xpose.msra.mxu1 %v1092_v32  ;;  %2115 = vmatprep.mubr.msk.bf16.mxu1 %vm2593_vm4, %v2592_v8  ;;  %p2481_p9 = pnand %p2480_p8, %p2474_p4 }
 0x4fa   : > { %2125 = vmatprep.subr.bf16.mxu1 %v2592_v8 }
 0x562   : > { %v956_v34 = vpop.permute.xlu0 %955  ;;  %v946_v35 = vpop.permute.xlu1 %945 }
 0x563   : > { %959 = vst.msk [vmem:[#allocation2 + $0xc] sm:$0xf] %vm940_vm6, %v956_v34  ;;  %949 = vst.msk [vmem:[#allocation2 + $0x4] sm:$0xf] %vm940_vm6, %v946_v35 }
 0x566   : > { %v951_v37 = vpop.permute.xlu1 %950 }
 0x567   : > { %954 = vst.msk [vmem:[#allocation2 + $0x8] sm:$0xf] %vm940_vm6, %v951_v37 }
 0x56a   : > { %v961_v39 = vld [vmem:[#allocation2 + $0x4] sm:$0xf]  ;;  %v963_v41 = vld [vmem:[#allocation2 + $0xc] sm:$0xf] }
 0x56b   : > { %2110 = vmatmul.mubr.msk.bf16.vlgmr.msra.gmra.mxu0 %vm985_vm5, %v961_v39  ;;  %v1580_v39 = vld [vmem:[#allocation8 + $0xc] sm:$0xf] }
 0x56c   : > { %2120 = vmatpush3.bf16.xpose.msra.mxu0 %v1143_v38  ;;  %2121 = vmatprep.mubr.msk.bf16.mxu0 %vm2593_vm4, %v2592_v8 }
 0x56d   : > { %2131 = vmatprep.subr.bf16.mxu0 %v2592_v8 }
 0x56e   : > { %v962_v40 = vld [vmem:[#allocation2 + $0x8] sm:$0xf] }
 0x56f   : > { %2116 = vmatmul.mubr.msk.bf16.vlgmr.msra.gmra.mxu1 %vm985_vm5, %v962_v40 }
 0x570   : > { %2127 = vmatprep.mubr.msk.bf16.mxu1 %vm2593_vm4, %v2592_v8  ;;  %2126 = vmatpush3.bf16.msra.mxu1 %v2335_v47  ;;  %v1530_v47 = vld [vmem:[#allocation8 + $0x8] sm:$0xf] }
 0x571   : > { %2137 = vmatprep.subr.bf16.mxu1 %v2592_v8 }
 0x573   : > { %2122 = vmatmul.mubr.msk.bf16.vlgmr.msra.gmra.mxu0 %vm985_vm5, %v963_v41 }
 0x574   : > { %2133 = vmatprep.mubr.msk.bf16.mxu0 %vm2593_vm4, %v2592_v8  ;;  %2132 = vmatpush3.bf16.msra.mxu0 %v2336_v1 }
 0x575   : > { %2143 = vmatprep.subr.bf16.mxu0 %v2592_v8 }
 0x5b8   : > { %v1026_v42 = vpop.f32.mrf.mxu1 }
 0x5b9   : > { %v1186_v43 = vsel %vm1185_vm7, %v1026_v42, -inf }
 0x5ba   : > { %1187 = vmax.xlane.f32.xlu1 %v1186_v43  ;;  %v2105_v44 = vpop.f32.mrf.mxu1 }
 0x5bc   : > { %v1029_v45 = vpop.f32.mrf.mxu1 }
 0x5be   : > { %v2106_v46 = vpop.f32.mrf.mxu1 }
 0x62b   : > { %v1077_v48 = vpop.f32.mrf.mxu0 }
 0x62c   : > { %v1189_v49 = vsel %vm1185_vm7, %v1077_v48, -inf }
 0x62d   : > { %1190 = vmax.xlane.f32.xlu0 %v1189_v49  ;;  %v2111_v50 = vpop.f32.mrf.mxu0 }
 0x62f   : > { %v1080_v51 = vpop.f32.mrf.mxu0  ;;  %v1128_v52 = vpop.f32.mrf.mxu1 }
 0x630   : > { %v1192_v53 = vsel %vm1185_vm7, %v1128_v52, -inf  ;;  %v1535_v51 = vsel %vm1438_vm8, %v1530_v47, 0  ;;  %v2343_v47 = vld [vmem:[%s3111_s30 + $0x8] sm:$0xff]  }
 0x631   : > { %v2112_v54 = vpop.f32.mrf.mxu0  ;;  %1193 = vmax.xlane.f32.xlu1 %v1192_v53  ;;  %v2117_v55 = vpop.f32.mrf.mxu1 }
 0x633   : > { %v1131_v56 = vpop.f32.mrf.mxu1  ;;  %v1179_v57 = vpop.f32.mrf.mxu0 }
 0x634   : > { %v1195_v58 = vsel %vm1185_vm7, %v1179_v57, -inf }
 0x635   : > { %v2123_v59 = vpop.f32.mrf.mxu0  ;;  %1196 = vmax.xlane.f32.xlu1 %v1195_v58  ;;  %v2118_v60 = vpop.f32.mrf.mxu1 }
 0x637   : > { %v1182_v61 = vpop.f32.mrf.mxu0 }
 0x639   : > { %v2124_v62 = vpop.f32.mrf.mxu0 }
 0x643   : > { %v1188_v63 = vpop.xlane.xlu1 %1187 }
 0x644   : > { %v1198_v2 = vsub.f32 %v1026_v42, %v1188_v63  ;;  %v1585_v42 = vsel %vm1438_vm8, %v1580_v39, 0  ;;  %v2015_v39 = vld [vmem:[%s3076_s9] ss:$0 sm:$0xff] }
 0x646   : > { %v1202_v3 = vmul.f32 1.442695, %v1198_v2 }
 0x648   : > { %2347 = vpow2.f32 %v1202_v3 }
 0x655   : > { %v2348_v4 = vpop.eup %2347 }
 0x656   : > { %v1222_v6 = vpack.c.bf16 %v2348_v4, %v2348_v4  ;;  %v1210_v22 = vsel %vm1185_vm7, %v2348_v4, 0.0 }
 0x658   : > { %2128 = vmatmul.mubr.msk.bf16.vlgmr.msra.gmra.mxu1 %vm1185_vm7, %v1222_v6 }
 0x659   : > { %2138 = vmatpush3.bf16.msra.mxu1 %v2337_v5  ;;  %2139 = vmatprep.mubr.msk.bf16.mxu1 %vm2593_vm4, %v2592_v8 }
 0x65a   : > { %2149 = vmatprep.subr.bf16.mxu1 %v2592_v8 }
 0x6b6   : > { %v1191_v7 = vpop.xlane.xlu0 %1190 }
 0x6b7   : > { %v1199_v9 = vsub.f32 %v1077_v48, %v1191_v7 }
 0x6b9   : > { %v1204_v10 = vmul.f32 1.442695, %v1199_v9 }
 0x6ba   : > { %v1194_v11 = vpop.xlane.xlu1 %1193 }
 0x6bb   : > { %2349 = vpow2.f32 %v1204_v10  ;;  %v1200_v12 = vsub.f32 %v1128_v52, %v1194_v11 }
 0x6bd   : > { %v1206_v13 = vmul.f32 1.442695, %v1200_v12 }
 0x6be   : > { %v1197_v14 = vpop.xlane.xlu1 %1196 }
 0x6bf   : > { %2351 = vpow2.f32 %v1206_v13  ;;  %v1201_v15 = vsub.f32 %v1179_v57, %v1197_v14 }
 0x6c1   : > { %v1208_v16 = vmul.f32 1.442695, %v1201_v15 }
 0x6c3   : > { %2353 = vpow2.f32 %v1208_v16 }
 0x6c8   : > { %v2350_v17 = vpop.eup %2349 }
 0x6c9   : > { %v1213_v19 = vsel %vm1185_vm7, %v2350_v17, 0.0  ;;  %v1223_v20 = vpack.c.bf16 %v2350_v17, %v2350_v17 }
 0x6ca   : > { %1214 = vadd.xlane.f32.xlu1 %v1213_v19 }
 0x6cb   : > { %2134 = vmatmul.mubr.msk.bf16.vlgmr.msra.gmra.mxu0 %vm1185_vm7, %v1223_v20 }
 0x6cc   : > { %v2352_v21 = vpop.eup %2351  ;;  %2144 = vmatpush3.bf16.msra.mxu0 %v2338_v18  ;;  %2145 = vmatprep.mubr.msk.bf16.mxu0 %vm2593_vm4, %v2592_v8  ;;  %v2014_v18 = vld [vmem:[%s3075_s8] ss:$0 sm:$0xff] }
 0x6cd   : > { %v1224_v23 = vpack.c.bf16 %v2352_v21, %v2352_v21  ;;  %2155 = vmatprep.subr.bf16.mxu0 %v2592_v8  ;;  %v1216_v25 = vsel %vm1185_vm7, %v2352_v21, 0.0 }
 0x6ce   : > { %1211 = vadd.xlane.f32.xlu1 %v1210_v22 }
 0x6cf   : > { %2140 = vmatmul.mubr.msk.bf16.vlgmr.msra.gmra.mxu1 %vm1185_vm7, %v1224_v23 }
 0x6d0   : > { %v2354_v24 = vpop.eup %2353  ;;  %2151 = vmatprep.mubr.msk.bf16.mxu1 %vm2593_vm4, %v2592_v8  ;;  %2150 = vmatpush3.bf16.msra.mxu1 %v1440_v31 }
 0x6d1   : > { %v1219_v26 = vsel %vm1185_vm7, %v2354_v24, 0.0  ;;  %v1225_v27 = vpack.c.bf16 %v2354_v24, %v2354_v24  ;;  %2161 = vmatprep.subr.bf16.mxu1 %v2592_v8 }
 0x6d2   : > { %1217 = vadd.xlane.f32.xlu1 %v1216_v25  ;;  %1220 = vadd.xlane.f32.xlu0 %v1219_v26 }
 0x6d3   : > { %2146 = vmatmul.mubr.msk.bf16.vlgmr.msra.gmra.mxu0 %vm1185_vm7, %v1225_v27 }
 0x6d4   : > { %2157 = vmatprep.mubr.msk.bf16.mxu0 %vm2593_vm4, %v2592_v8  ;;  %2156 = vmatpush3.bf16.msra.mxu0 %v1486_v29 }
 0x6d5   : > { %2167 = vmatprep.subr.bf16.mxu0 %v2592_v8 }
 0x718   : > { %v1269_v32 = vpop.f32.mrf.mxu1 }
 0x71a   : > { %v2129_v33 = vpop.f32.mrf.mxu1 }
 0x71c   : > { %v1272_v34 = vpop.f32.mrf.mxu1 }
 0x71d   : > { %v2339_v34 = vld [vmem:[#allocation10 + $0x8] sm:$0xff]  }
 0x71e   : > { %v2130_v35 = vpop.f32.mrf.mxu1 }
 0x71f   : > { %v2340_v35 = vld [vmem:[#allocation10] sm:$0xff]  }
 0x753   : > { %v1215_v36 = vpop.xlane.xlu1 %1214 }
 0x757   : > { %v1212_v37 = vpop.xlane.xlu1 %1211 }
 0x758   : > { %2355 = vrcp.f32 %v1212_v37 }
 0x759   : > { %2357 = vrcp.f32 %v1215_v36 }
 0x75b   : > { %v1218_v43 = vpop.xlane.xlu1 %1217  ;;  %v1221_v44 = vpop.xlane.xlu0 %1220 }
 0x75c   : > { %2359 = vrcp.f32 %v1218_v43 }
 0x75d   : > { %2361 = vrcp.f32 %v1221_v44 }
 0x765   : > { %v2356_v38 = vpop.eup %2355 }
 0x766   : > { %v1426_v40 = vmul.f32 %v2356_v38, %v1269_v32  ;;  %v2358_v45 = vpop.eup %2357 }
 0x768   : > { %v1430_v41 = vpack.c.bf16 %v1426_v40, %v1426_v40 }
 0x769   : > { %v2360_v54 = vpop.eup %2359 }
 0x76a   : > { %2158 = vmatmul.mubr.msk.bf16.vlgmr.msra.gmra.mxu0 %vm985_vm5, %v1430_v41  ;;  %v2362_v58 = vpop.eup %2361  ;;  %v2016_v41 = vld [vmem:[%s3077_s10] ss:$0 sm:$0xff] }
 0x76b   : > { %2168 = vmatpush3.bf16.msra.mxu0 %v1585_v42  ;;  %2169 = vmatprep.mubr.msk.bf16.mxu0 %vm2593_vm4, %v2592_v8 }
 0x76c   : > { %2181 = vmatprep.subr.bf16.mxu0 %v2592_v8 }
 0x78b   : > { %v1318_v46 = vpop.f32.mrf.mxu0 }
 0x78c   : > { %v1427_v48 = vmul.f32 %v2358_v45, %v1318_v46  ;;  %v2341_v45 = vld [vmem:[%s3111_s30 + $0x18] sm:$0xff]   ;;  %v2342_v46 = vld [vmem:[%s3111_s30 + $0x10] sm:$0xff]  }
 0x78d   : > { %v2135_v49 = vpop.f32.mrf.mxu0 }
 0x78e   : > { %v1432_v50 = vpack.c.bf16 %v1427_v48, %v1427_v48  ;;  %v2344_v48 = vld [vmem:[%s3111_s30] sm:$0xff]  }
 0x78f   : > { %v1321_v52 = vpop.f32.mrf.mxu0  ;;  %v1367_v53 = vpop.f32.mrf.mxu1  ;;  %v2017_v49 = vld [vmem:[#allocation11] ss:$0 sm:$0xff] }
 0x790   : > { %2152 = vmatmul.mubr.msk.bf16.vlgmr.msra.gmra.mxu1 %vm985_vm5, %v1432_v50  ;;  %v1428_v57 = vmul.f32 %v2360_v54, %v1367_v53 }
 0x791   : > { %2162 = vmatpush3.bf16.msra.mxu1 %v1535_v51  ;;  %v2136_v55 = vpop.f32.mrf.mxu0  ;;  %v2141_v56 = vpop.f32.mrf.mxu1  ;;  %2163 = vmatprep.mubr.msk.bf16.mxu1 %vm2593_vm4, %v2592_v8 }
 0x792   : > { %2173 = vmatprep.subr.bf16.mxu1 %v2592_v8  ;;  %v1528_v1 = vpack.c.bf16 %v1428_v57, %v1428_v57 }
 0x793   : > { %v1370_v59 = vpop.f32.mrf.mxu1  ;;  %v1416_v60 = vpop.f32.mrf.mxu0 }
 0x794   : > { %v1429_v61 = vmul.f32 %v2362_v58, %v1416_v60  ;;  %v2021_v60 = vld [vmem:[%s3112_s14] ss:$0 sm:$0xff] }
 0x795   : > { %v2142_v62 = vpop.f32.mrf.mxu1  ;;  %v2147_v63 = vpop.f32.mrf.mxu0 }
 0x796   : > { %v1578_v2 = vpack.c.bf16 %v1429_v61, %v1429_v61 }
 0x797   : > { %v1419_v3 = vpop.f32.mrf.mxu0 }
 0x798   : > { %2164 = vmatmul.mubr.msk.bf16.vlgmr.msra.gmra.mxu1 %vm985_vm5, %v1528_v1  ;;  %2170 = vmatmul.mubr.msk.bf16.vlgmr.msra.gmra.mxu0 %vm985_vm5, %v1578_v2 }
 0x799   : > { %v2148_v4 = vpop.f32.mrf.mxu0  ;;  %2177 = vmatprep.mubr.msk.bf16.mxu1 %vm2593_vm4, %v2592_v8  ;;  %2189 = vmatprep.mubr.msk.bf16.mxu0 %vm2593_vm4, %v2592_v8 }
 0x79a   : > { %2174 = vmatpush3.bf16.msra.mxu1 %v2339_v34  ;;  %2182 = vmatpush3.bf16.msra.mxu0 %v2341_v45 }
 0x79b   : > { %2175 = vmatprep.subr.bf16.mxu1 %v2592_v8  ;;  %2183 = vmatprep.subr.bf16.mxu0 %v2592_v8 }
 0x79e   : > { %2176 = vmatpush3.bf16.msra.mxu1 %v2340_v35  ;;  %2184 = vmatpush3.bf16.msra.mxu0 %v2342_v46 }
 0x79f   : > { %2185 = vmatprep.subr.bf16.mxu0 %v2592_v8 }
 0x7a2   : > { %2186 = vmatpush3.bf16.msra.mxu0 %v2343_v47 }
 0x7a3   : > { %2187 = vmatprep.subr.bf16.mxu0 %v2592_v8 }
 0x7a6   : > { %2188 = vmatpush3.bf16.msra.mxu0 %v2344_v48 }
 0x82a   : > { %v1522_v5 = vpop.f32.mrf.mxu0 }
 0x82c   : > { %v2159_v6 = vpop.f32.mrf.mxu0 }
 0x82e   : > { %v1525_v7 = vpop.f32.mrf.mxu0 }
 0x830   : > { %v2160_v9 = vpop.f32.mrf.mxu0 }
 0x850   : > { %v1476_v10 = vpop.f32.mrf.mxu1 }
 0x851   : > { %v1523_v14 = vadd.f32 %v1522_v5, %v1476_v10 }
 0x852   : > { %v2153_v11 = vpop.f32.mrf.mxu1 }
 0x854   : > { %v1479_v12 = vpop.f32.mrf.mxu1 }
 0x856   : > { %v2154_v13 = vpop.f32.mrf.mxu1 }
 0x858   : > { %v1571_v15 = vpop.f32.mrf.mxu1  ;;  %v1621_v16 = vpop.f32.mrf.mxu0 }
 0x859   : > { %v1577_v17 = vadd.f32 %v1571_v15, %v1523_v14 }
 0x85a   : > { %v2165_v19 = vpop.f32.mrf.mxu1  ;;  %v2171_v20 = vpop.f32.mrf.mxu0 }
 0x85b   : > { %v1627_v21 = vadd.f32 %v1621_v16, %v1577_v17 }
 0x85c   : > { %v1574_v22 = vpop.f32.mrf.mxu1  ;;  %v1624_v23 = vpop.f32.mrf.mxu0 }
 0x85d   : > { %v1635_v24 = vadd.f32 %v2014_v18, %v1627_v21 }
 0x85e   : > { %v2166_v25 = vpop.f32.mrf.mxu1  ;;  %v2172_v26 = vpop.f32.mrf.mxu0 }
 0x85f   : > { %v1636_v27 = vadd.f32 %v1635_v24, %v2871_v0 }
 0x861   : > { %v1639_v28 = vsel %vm843_vm3, %v1636_v27, 0.0 }
 0x862   : > { %1640 = vadd.xlane.f32.xlu1 %v1639_v28 }
 0x8eb   : > { %v1641_v29 = vpop.xlane.xlu1 %1640 }
 0x8ec   : > { %v1642_v30 = vmul.f32 0.03125, %v1641_v29 }
 0x8ee   : > { %v1643_v31 = vsub.f32 %v1636_v27, %v1642_v30 }
 0x8f0   : > { %v1644_v32 = vmul.f32 %v1643_v31, %v1643_v31 }
 0x8f2   : > { %v1645_v33 = vsel %vm843_vm3, %v1644_v32, 0.0 }
 0x8f3   : > { %1646 = vadd.xlane.f32.xlu0 %v1645_v33 }
 0x97c   : > { %v1647_v36 = vpop.xlane.xlu0 %1646 }
 0x97d   : > { %v1648_v37 = vmul.f32 0.03125, %v1647_v36 }
 0x97f   : > { %v1649_v38 = vadd.f32 1e-05, %v1648_v37 }
 0x981   : > { %2363 = vrsqrt.f32 %v1649_v38 }
 0x98e   : > { %v2364_v0 = vpop.eup %2363 }
 0x98f   : > { %v1651_v40 = vmul.f32 %v2364_v0, %v1643_v31 }
 0x991   : > { %v1658_v42 = vmul.f32 %v2015_v39, %v1651_v40 }
 0x993   : > { %v1665_v43 = vadd.f32 %v2016_v41, %v1658_v42 }
 0x995   : > { %v1666_v44 = vpack.c.bf16 %v1665_v43, %v1665_v43 }
 0x997   : > { %2178 = vmatmul.mubr.msk.bf16.vlgmr.msra.gmra.mxu1 %vm843_vm3, %v1666_v44 }
 0xa57   : > { %v1727_v50 = vpop.f32.mrf.mxu1 }
 0xa58   : > { %v1728_v51 = vadd.f32 %v2017_v49, %v1727_v50 }
 0xa59   : > { %v2179_v52 = vpop.f32.mrf.mxu1 }
 0xa5a   : > { %v1734_v53 = vmul.f32 0.70710677, %v1728_v51  ;;  %v1733_v57 = vmul.f32 0.5, %v1728_v51 }
 0xa5b   : > { %v1730_v54 = vpop.f32.mrf.mxu1 }
 0xa5c   : > { %2365 = verf.f32 %v1734_v53 }
 0xa5d   : > { %v2180_v55 = vpop.f32.mrf.mxu1 }
 0xa69   : > { %v2366_v56 = vpop.eup %2365 }
 0xa6a   : > { %v1736_v58 = vadd.f32 1.0, %v2366_v56 }
 0xa6c   : > { %v1737_v8 = vmul.f32 %v1736_v58, %v1733_v57 }
 0xa6e   : > { %v1738_v59 = vpack.c.bf16 %v1737_v8, %v1737_v8 }
 0xa70   : > { %2190 = vmatmul.mubr.msk.bf16.vlgmr.msra.gmra.mxu0 %vm1778_vm9, %v1738_v59 }
 0xb30   : > { %v1816_v61 = vpop.f32.mrf.mxu0 }
 0xb31   : > { %v1817_v62 = vadd.f32 %v2021_v60, %v1816_v61 }
 0xb32   : > { %v2191_v63 = vpop.f32.mrf.mxu0 }
 0xb33   : > { %v1822_v1 = vadd.f32 %v1817_v62, %v1636_v27 }
 0xb34   : > { %v1819_v2 = vpop.f32.mrf.mxu0 }
 0xb35   : > { %1823 = vst.msk [vmem:[%s558_s13] sm:$0xff] %vm843_vm3, %v1822_v1 }
 0xb36   : > { %v2192_v3 = vpop.f32.mrf.mxu0 }
 0xb37   : > { %2484 = shalt.err (!%p2481_p9)
}
 0xb38   : > { %s2485_s18 = scalar_lea.hbm %s3010_s0, 128  ;;  %s2489_s23 = scalar_lea.hbm %s3113_s15, 512 }
 0xb39   : > { %p2486_p11 = scmp.ne.s32.totalorder %s3010_s0, %s2485_s18  ;;  %p2490_p5 = scmp.lt.s32.totalorder %s3010_s0, %s3113_s15 }
 0xb3a   : > { %p2491_p10 = scmp.lt.s32.totalorder %s2489_s23, %s2485_s18 }
 0xb3b   : > { %p2487_p13 = pnand %p2486_p11, %p2730_p3 }
 0xb3c   : > { %p2492_p12 = por %p2491_p10, %p2490_p5 }
 0xb3d   : > { %p2488_p2 = pneg %p2487_p13 }
 0xb3f   : > { %p2493_p0 = pnand %p2492_p12, %p2488_p2 }
 0xb41   : > { %2496 = shalt.err (!%p2493_p0)
}
 0xb42   : > { %2209 = dma.vmem_to_hbm [thread:$0]  (%p2730_p3), %s3012_s24, 128, %s3010_s0, %s1825_s22  }
 0xb43 PF: > { %s3115_s21 = sld [smem:[#allocation18_spill]]  ;;  %p2236_p1 = scmp.ge.s32.totalorder %s2575_s25, 2 }
 0xb44   : > { %s3116_s16 = sld [smem:[#allocation24_spill]] }
 0xb49   : > { %s1852_s28 = sand.u32 1, %s3115_s21  }
 0xb4a   : > { %p3117_p4 = scmp.ne.s32.totalorder %s3116_s16, 0  ;;  %s1853_s26 = scalar_lea.sflag [#allocation7], %s1852_s28 }
 0xb4c   : > { %p2225_p6 = pnand %p2236_p1, %p3117_p4 }
 0xb4e   : > { %p2226_p7 = pneg %p2225_p6 }
 0xb50   : > { %2542 = dma.done.wait (%p2226_p7), %s1853_s26, 128  }
 0xb51   : > { %2544 = vsyncadd (%p2226_p7), %s1853_s26, 4294967168  ;;  %s31_s25 = sadd.s32 1, %s2575_s25   ;;  %s3118_s17 = sld [smem:[#allocation19_spill]] }
 0xb52   : > { %p28_p8 = scmp.ge.s32.totalorder %s31_s25, 6   ;;  %s3119_s20 = sld [smem:[#allocation25_spill]] }
 0xb53   : > { %s3120_s21 = sld [smem:[#allocation20_spill]]  ;;  %s3124_s18 = smov %s2551_s19 }
 0xb54   : > { %s3121_s22 = sld [smem:[#allocation21_spill]]  ;;  %30 = sbr.rel (!%p28_p8) target bundleno = 13 (0xd), region = 149 }
 0xb55   : > { %s3122_s23 = sld [smem:[#allocation22_spill]] }
 0xb56   : > { %s3123_s24 = sld [smem:[#allocation23_spill]] }
 0xb57   : > { %s3125_s19 = smov %s3118_s17 }
 0xb59   :  { %1858 = vsyncpa [#allocation6], 1 }
 0xb5a   :  { %1860 = vsyncpa [#allocation6 + $0x1], 1 }
 0xb5b   :  { %1861 = vsyncpa [#allocation9], 1 }
 0xb5c   :  { %1862 = vsyncpa [#allocation12], 1 }
 0xb5d   :  { %1863 = vsyncpa [#allocation7], 1 }
 0xb5e   :  { %1865 = vsyncpa [#allocation7 + $0x1], 1 }

// kernel: tpu_custom_call.1
= control target key start
LH: loop header
LB: loop body
LE: loop exit
PB: predicated region body
PF: predicated region fallthrough
CT: control target
= control target key end

     0   :  { %s3067_s0 = inlined_call_operand.vmem [shape: f32[2,16,32], index: 0, kind: input, shape index: {}]   ;;  %s3068_s1 = inlined_call_operand.vmem [shape: f32[1,32], index: 1, kind: input, shape index: {}]   ;;  %s3069_s2 = inlined_call_operand.vmem [shape: f32[1,32], index: 2, kind: input, shape index: {}]   ;;  %s3070_s3 = inlined_call_operand.vmem [shape: bf16[32,32], index: 3, kind: input, shape index: {}]   ;;  %s3071_s4 = inlined_call_operand.vmem [shape: f32[1,32], index: 4, kind: input, shape index: {}]   ;;  %s3072_s5 = inlined_call_operand.hbm [shape: bf16[32,64], index: 5, kind: input, shape index: {}]   ;;  %s3073_s6 = inlined_call_operand.vmem [shape: f32[1,64], index: 6, kind: input, shape index: {}]   ;;  %s3074_s7 = inlined_call_operand.hbm [shape: bf16[4,8,32], index: 7, kind: input, shape index: {}]   ;;  %s3075_s8 = inlined_call_operand.vmem [shape: f32[1,32], index: 8, kind: input, shape index: {}]   ;;  %s3076_s9 = inlined_call_operand.vmem [shape: f32[1,32], index: 9, kind: input, shape index: {}]   ;;  %s3077_s10 = inlined_call_operand.vmem [shape: f32[1,32], index: 10, kind: input, shape index: {}]   ;;  %s3078_s11 = inlined_call_operand.hbm [shape: bf16[32,64], index: 11, kind: input, shape index: {}]   ;;  %s3079_s12 = inlined_call_operand.hbm [shape: f32[1,64], index: 12, kind: input, shape index: {}]   ;;  %s3080_s13 = inlined_call_operand.vmem [shape: bf16[64,32], index: 13, kind: input, shape index: {}]   ;;  %s3081_s14 = inlined_call_operand.vmem [shape: f32[1,32], index: 14, kind: input, shape index: {}]   ;;  %s3082_s15 = inlined_call_operand.hbm [shape: f32[2,16,32], index: 15, kind: output, shape index: {}]  }
   0x1   :  { %3093 = sst [smem:[#allocation26_spill]] %s3067_s0 }
   0x2   :  { %3094 = sst [smem:[#allocation27_spill]] %s3080_s13 }
   0x3   :  { %3095 = sst [smem:[#allocation28_spill]] %s3081_s14 }
   0x4   :  { %3096 = sst [smem:[#allocation29_spill]] %s3082_s15 }
   0x5   :  { %20 = vsyncpa [#allocation6], 0 }
   0x6   :  { %21 = vsyncpa [#allocation9], 0 }
   0x7   :  { %22 = vsyncpa [#allocation12], 0 }
   0x8   :  { %23 = vsyncpa [#allocation7], 0 }
   0x9   :  { %25 = vsyncpa [#allocation7 + $0x1], 0  ;;  %s2678_s18 = smov 0   ;;  %s2680_s19 = smov 0  }
   0xa   :  { %s2682_s20 = smov 0   ;;  %s2684_s21 = smov 0  }
   0xb   :  { %s2686_s22 = smov 0   ;;  %s2688_s23 = smov 0  }
   0xc   :  { %s2690_s24 = smov 0   ;;  %s2692_s25 = smov 0  }
   0xd LB: > { %3097 = sst [smem:[#allocation18_spill]] %s2547_s18  ;;  %s1955_s26 = sadd.s32 4294967295, %s2575_s25   ;;  %s2575_s25 = sphi %s2692_s25, %s31_s25   ;;  %s2571_s24 = sphi %s2690_s24, %s3123_s24   ;;  %s2567_s23 = sphi %s2688_s23, %s3122_s23   ;;  %s2563_s22 = sphi %s2686_s22, %s3121_s22   ;;  %s2559_s21 = sphi %s2684_s21, %s3120_s21   ;;  %s2555_s20 = sphi %s2682_s20, %s3119_s20   ;;  %s2551_s19 = sphi %s2680_s19, %s3125_s19   ;;  %s2547_s18 = sphi %s2678_s18, %s3124_s18  }
   0xe   : > { %3098 = sst [smem:[#allocation19_spill]] %s2555_s20  ;;  %s1956_s27 = sadd.s32 4294967294, %s2575_s25  }
   0xf   : > { %3099 = sst [smem:[#allocation20_spill]] %s2567_s23  ;;  %s40_s28 = sadd.s32 1, %s2567_s23 }
  0x10   : > { %3100 = sst [smem:[#allocation21_spill]] %s2571_s24  ;;  %s43_s29 = sadd.s32 1, %s2571_s24 }
  0x11   : > { %p41_p0 = scmp.ge.s32.totalorder %s40_s28, 2  ;;  %s372_s30 = sadd.s32 1, %s2555_s20 }
  0x12   : > { %p382_p1 = scmp.ne.s32.totalorder %s2555_s20, %s2551_s19  ;;  %p383_p2 = scmp.eq.s32.totalorder %s1955_s26, 3 }
  0x13   : > { %s3127_s28 = smov (%p41_p0, %s40_s28), 0  ;;  %s3129_s29 = smov (!%p41_p0, %s43_s29), %s2571_s24 }
  0x14   : > { %3101 = sst [smem:[#allocation22_spill]] %s3127_s28  ;;  %s368_s16 = ssub.s32 %s2567_s23, %s3127_s28 }
  0x15   : > { %p2730_p3 = por %p383_p2, %p382_p1  ;;  %p45_p4 = scmp.ge.s32.totalorder %s3129_s29, 2 }
  0x16   : > { %p388_p5 = scmp.ne.s32.totalorder %s2551_s19, %s2547_s18  ;;  %p389_p6 = scmp.eq.s32.totalorder %s1956_s27, 3 }
  0x17   : > { %p1957_p7 = scmp.ge.s32.totalorder %s2575_s25, 1  ;;  %s3131_s29 = smov (%p45_p4, %s3129_s29), 0 }
  0x18   : > { %3103 = sst [smem:[#allocation23_spill]] %s3131_s29  ;;  %p2739_p8 = por %p389_p6, %p388_p5 }
  0x19   : > { %p396_p9 = scmp.lt.s32.totalorder %s2575_s25, 5  ;;  %s367_s14 = ssub.s32 %s2571_s24, %s3131_s29 }
  0x1a   : > { %s3104_s15 = scalar_select %p2739_p8, 1, 0 }
  0x1b   : > { %s369_s13 = sor.u32 %s368_s16, %s367_s14  ;;  %p2746_p10 = pnand %p1957_p7, %p396_p9 }
  0x1c   : > { %3105 = sst [smem:[#allocation24_spill]] %s3104_s15  ;;  %p370_p11 = scmp.eq.s32.totalorder %s369_s13, 0 }
  0x1d   : > { %p2750_p12 = scmp.eq.s32.totalorder %s1955_s26, 0  ;;  %p2211_p13 = pneg %p2746_p10 }
  0x1e   : > { %s2757_s27 = scalar_select %p370_p11, %s2555_s20, %s372_s30  }
  0x1f   : > { %p2761_p0 = pnand %p2750_p12, %p2211_p13  ;;  %s2577_s14 = smov [#allocation8]  }
  0x20   : > { %3108 = sst [smem:[#allocation25_spill]] %s2757_s27  ;;  %s436_s16 = sshll.u32 %s2577_s14, 4  ;;  %s437_s16 = int_to_ptr.vmem [resolvable:$true] %s436_s16 }
  0x21   : > { %p2369_p1 = pneg %p2761_p0  ;;  %s2378_s13 = scalar_lea.vmem %s437_s16, 256 }
  0x22   : > { %p2379_p2 = scmp.ne.s32.totalorder %s437_s16, %s2378_s13  ;;  %p2386_p6 = scmp.lt.s32.totalorder %s437_s16, %s437_s16 }
  0x23   : > { %p2387_p7 = scmp.lt.s32.totalorder %s2378_s13, %s2378_s13 }
  0x24   : > { %p2381_p4 = pnand %p2379_p2, %p2369_p1 }
  0x25   : > { %p2388_p9 = por %p2387_p7, %p2386_p6 }
  0x26   : > { %p2382_p5 = pneg %p2381_p4 }
  0x28   : > { %p2389_p11 = pnand %p2388_p9, %p2382_p5 }
  0x2a   : > { %2392 = shalt.err (!%p2389_p11)
}
  0x2b   : > { %s2578_s26 = smov 64   ;;  %s2579_s30 = smov 4  }
  0x2c   : > { %2217 = dma.hbm_to_vmem [thread:$0]  (!%p2761_p0), %s3074_s7, 256, %s437_s16, [#allocation9], %s2578_s26, %s2578_s26, %s2579_s30  }
  0x2d   : > { %s2580_s24 = smov [#allocation5]   ;;  %s2581_s20 = smov [#allocation10]  }
  0x2e   : > { %s420_s27 = sshll.u32 %s2580_s24, 4  ;;  %s458_s18 = sshll.u32 %s2581_s20, 4  ;;  %s421_s27 = int_to_ptr.vmem [resolvable:$true] %s420_s27  ;;  %s459_s18 = int_to_ptr.vmem [resolvable:$true] %s458_s18 }
  0x2f   : > { %s2404_s13 = scalar_lea.vmem %s421_s27, 256  ;;  %p2412_p5 = scmp.lt.s32.totalorder %s421_s27, %s421_s27 }
  0x30   : > { %p2405_p13 = scmp.ne.s32.totalorder %s421_s27, %s2404_s13  ;;  %p2413_p6 = scmp.lt.s32.totalorder %s2404_s13, %s2404_s13 }
  0x32   : > { %p2407_p2 = pnand %p2405_p13, %p2369_p1  ;;  %p2414_p7 = por %p2413_p6, %p2412_p5 }
  0x34   : > { %p2408_p4 = pneg %p2407_p2 }
  0x36   : > { %p2415_p9 = pnand %p2414_p7, %p2408_p4 }
  0x38   : > { %2418 = shalt.err (!%p2415_p9)
}
  0x39   : > { %2214 = dma.hbm_to_vmem [thread:$0]  (!%p2761_p0), %s3072_s5, 256, %s421_s27, [#allocation6], %s2578_s26, %s2578_s26, %s2579_s30  }
  0x3a   : > { %s2430_s29 = scalar_lea.vmem %s459_s18, 256  ;;  %p2438_p8 = scmp.lt.s32.totalorder %s459_s18, %s459_s18 }
  0x3b   : > { %p2431_p11 = scmp.ne.s32.totalorder %s459_s18, %s2430_s29  ;;  %p2439_p5 = scmp.lt.s32.totalorder %s2430_s29, %s2430_s29 }
  0x3d   : > { %p2433_p13 = pnand %p2431_p11, %p2369_p1  ;;  %p2440_p4 = por %p2439_p5, %p2438_p8 }
  0x3f   : > { %p2434_p2 = pneg %p2433_p13 }
  0x41   : > { %p2441_p6 = pnand %p2440_p4, %p2434_p2 }
  0x43   : > { %2444 = shalt.err (!%p2441_p6)
}
  0x44   : > { %2220 = dma.hbm_to_vmem [thread:$0]  (!%p2761_p0), %s3078_s11, 256, %s459_s18, [#allocation9], %s2578_s26, %s2578_s26, %s2579_s30  }
  0x45   : > { %s2582_s27 = smov [#allocation11]  }
  0x46   : > { %s472_s13 = sshll.u32 %s2582_s27, 4  ;;  %s473_s13 = int_to_ptr.vmem [resolvable:$true] %s472_s13 }
  0x47   : > { %s2456_s24 = scalar_lea.vmem %s473_s13, 16  ;;  %s2463_s20 = scalar_lea.vmem %s473_s13, 32 }
  0x48   : > { %p2457_p7 = scmp.ne.s32.totalorder %s473_s13, %s2456_s24  ;;  %p2464_p11 = scmp.lt.s32.totalorder %s473_s13, %s473_s13 }
  0x49   : > { %p2465_p13 = scmp.lt.s32.totalorder %s2463_s20, %s2456_s24 }
  0x4a   : > { %p2459_p8 = pnand %p2457_p7, %p2369_p1 }
  0x4b   : > { %p2466_p2 = por %p2465_p13, %p2464_p11 }
  0x4c   : > { %p2460_p9 = pneg %p2459_p8 }
  0x4e   : > { %p2467_p5 = pnand %p2466_p2, %p2460_p9 }
  0x50   : > { %2470 = shalt.err (!%p2467_p5)
}
  0x51   : > { %2223 = dma.hbm_to_vmem [thread:$0]  (!%p2761_p0), %s3079_s12, 16, %s473_s13, [#allocation12]  }
  0x52   : > { %499 = sbr.rel (%p2746_p10) target bundleno = 2883 (0xb43), region = 80 }
  0x57   : > { %2530 = dma.done.wait (%p2750_p12), [#allocation6], 256  }
  0x58   : > { %2532 = vsyncadd (%p2750_p12), [#allocation6], 4294967040 }
  0x59   : > { %2534 = dma.done.wait (%p2750_p12), [#allocation9], 512  }
  0x5a   : > { %2536 = vsyncadd (%p2750_p12), [#allocation9], 4294966784 }
  0x5b   : > { %2538 = dma.done.wait (%p2750_p12), [#allocation12], 16  }
  0x5c   : > { %2540 = vsyncadd (%p2750_p12), [#allocation12], 4294967280  ;;  %s3092_s15 = sand.u32 1, %s2551_s19   ;;  %p559_p10 = scmp.lt.s32.totalorder %s2563_s22, 1 }
  0x5d   : > { %s2826_s18 = sshll.u32 %s3092_s15, 3  ;;  %s3110_s0 = sld [smem:[#allocation26_spill]] }
  0x5e   : > { %s560_s28 = scalar_select %p559_p10, %s2563_s22, 1 }
  0x5f   : > { %s558_s13 = scalar_lea.vmem [#allocation13], %s2826_s18  ;;  %p1971_p12 = scmp.ne.s32.totalorder %s2559_s21, 0 }
  0x60   : > { %s2032_s26 = sshll.u32 %s560_s28, 4  ;;  %s2586_s30 = smov (!%p1971_p12), 120  }
  0x61   : > { %568 = sbr.rel (%p1971_p12) target bundleno = 754 (0x2f2), region = 100  ;;  %s2587_s14 = smov (!%p1971_p12), 80  }
  0x62   : > { %s2588_s23 = smov (!%p1971_p12), 88   ;;  %s2589_s24 = smov (!%p1971_p12), 72  }
  0x63   : > { %s2832_s27 = scalar_lea.vmem %s3110_s0, %s2032_s26  ;;  %s2585_s26 = smov (!%p1971_p12), 96  }
  0x64   : > { %s2590_s20 = smov (!%p1971_p12), 112   ;;  %s2591_s29 = smov (!%p1971_p12), 104  }
  0x66   : > { %v569_v0 = vld [vmem:[%s2832_s27] sm:$0xff]  ;;  %vm572_vm0 = vcmask 261120   ;;  %v708_v1 = vld [vmem:[%s2832_s27 + $0x8] sm:$0xff]  ;;  %v2321_v14 = vld [vmem:[#allocation5 + $0x8] sm:$0xff]   ;;  %v2583_v16 = vmov 0.0   ;;  %vm2584_vm1 = vmmov 0  }
  0x67   : > { %v573_v2 = vsel %vm572_vm0, %v569_v0, 0.0  ;;  %v711_v3 = vsel %vm572_vm0, %v708_v1, 0.0  ;;  %v2323_v15 = vld [vmem:[#allocation5 + $0x8] sm:$0xff]   ;;  %2077 = vmatprep.subr.bf16.mxu0 %v2583_v16  ;;  %2085 = vmatprep.subr.bf16.mxu1 %v2583_v16  ;;  %v2322_v17 = vld [vmem:[#allocation5] sm:$0xff]   ;;  %v1972_v26 = vld [vmem:[%s3068_s1] ss:$0 sm:$0xff] }
  0x68   : > { %574 = vadd.xlane.f32.xlu0 %v573_v2  ;;  %2078 = vmatpush3.bf16.msra.mxu0 %v2321_v14  ;;  %v2324_v18 = vld [vmem:[#allocation5] sm:$0xff]   ;;  %v1973_v28 = vld [vmem:[%s3069_s2] ss:$0 sm:$0xff]  ;;  %vm669_vm2 = vcmask 60416  }
  0x69   : > { %2086 = vmatpush3.bf16.msra.mxu1 %v2323_v15  ;;  %2079 = vmatprep.subr.bf16.mxu0 %v2583_v16  ;;  %v1974_v37 = vld [vmem:[%s3073_s6] ss:$0 sm:$0xff] }
  0x6a   : > { %2081 = vmatprep.mubr.msk.bf16.mxu0 %vm2584_vm1, %v2583_v16  ;;  %2087 = vmatprep.subr.bf16.mxu1 %v2583_v16 }
  0x6b   : > { %2089 = vmatprep.mubr.msk.bf16.mxu1 %vm2584_vm1, %v2583_v16 }
  0x6c   : > { %712 = vadd.xlane.f32.xlu0 %v711_v3  ;;  %2080 = vmatpush3.bf16.msra.mxu0 %v2322_v17 }
  0x6d   : > { %2088 = vmatpush3.bf16.msra.mxu1 %v2324_v18 }
  0xf1   : > { %v575_v4 = vpop.xlane.xlu0 %574 }
  0xf2   : > { %v577_v5 = vmul.f32 0.03125, %v575_v4 }
  0xf4   : > { %v578_v6 = vsub.f32 %v569_v0, %v577_v5 }
  0xf5   : > { %v713_v7 = vpop.xlane.xlu0 %712 }
  0xf6   : > { %v714_v8 = vmul.f32 0.03125, %v713_v7  ;;  %v579_v9 = vmul.f32 %v578_v6, %v578_v6 }
  0xf8   : > { %v715_v10 = vsub.f32 %v708_v1, %v714_v8  ;;  %v580_v11 = vsel %vm572_vm0, %v579_v9, 0.0 }
  0xf9   : > { %581 = vadd.xlane.f32.xlu1 %v580_v11 }
  0xfa   : > { %v716_v12 = vmul.f32 %v715_v10, %v715_v10 }
  0xfc   : > { %v717_v13 = vsel %vm572_vm0, %v716_v12, 0.0 }
  0xfd   : > { %718 = vadd.xlane.f32.xlu1 %v717_v13 }
 0x182   : > { %v582_v19 = vpop.xlane.xlu1 %581 }
 0x183   : > { %v583_v20 = vmul.f32 0.03125, %v582_v19 }
 0x185   : > { %v584_v21 = vadd.f32 1e-05, %v583_v20 }
 0x186   : > { %v719_v22 = vpop.xlane.xlu1 %718 }
 0x187   : > { %2325 = vrsqrt.f32 %v584_v21  ;;  %v720_v23 = vmul.f32 0.03125, %v719_v22 }
 0x189   : > { %v721_v24 = vadd.f32 1e-05, %v720_v23 }
 0x18b   : > { %2327 = vrsqrt.f32 %v721_v24 }
 0x194   : > { %v2326_v25 = vpop.eup %2325 }
 0x195   : > { %v586_v27 = vmul.f32 %v2326_v25, %v578_v6 }
 0x197   : > { %v593_v29 = vmul.f32 %v1972_v26, %v586_v27 }
 0x198   : > { %v2328_v30 = vpop.eup %2327 }
 0x199   : > { %v600_v31 = vadd.f32 %v1973_v28, %v593_v29  ;;  %v723_v32 = vmul.f32 %v2328_v30, %v715_v10 }
 0x19b   : > { %v601_v33 = vpack.c.bf16 %v600_v31, %v600_v31  ;;  %v730_v34 = vmul.f32 %v1972_v26, %v723_v32 }
 0x19d   : > { %2082 = vmatmul.mubr.msk.bf16.vlgmr.msra.gmra.mxu0 %vm572_vm0, %v601_v33  ;;  %v737_v35 = vadd.f32 %v1973_v28, %v730_v34 }
 0x19f   : > { %v738_v36 = vpack.c.bf16 %v737_v35, %v737_v35 }
 0x1a1   : > { %2090 = vmatmul.mubr.msk.bf16.vlgmr.msra.gmra.mxu1 %vm572_vm0, %v738_v36 }
 0x25d   : > { %v662_v38 = vpop.f32.mrf.mxu0 }
 0x25e   : > { %v663_v39 = vadd.f32 %v1974_v37, %v662_v38 }
 0x25f   : > { %v2083_v40 = vpop.f32.mrf.mxu0 }
 0x260   : > { %v668_v41 = vpack.c.bf16 %v663_v39, %v663_v39 }
 0x261   : > { %v665_v42 = vpop.f32.mrf.mxu0  ;;  %v799_v43 = vpop.f32.mrf.mxu1 }
 0x262   : > { %670 = vst.msk [vmem:[#allocation3] sm:$0xf] %vm669_vm2, %v668_v41  ;;  %v800_v44 = vadd.f32 %v1974_v37, %v799_v43  ;;  %674 = vrot.lane.b32.xlu0 %v668_v41, %s2585_s26  ;;  %678 = vrot.lane.b32.xlu1 %v668_v41, %s2586_s30 }
 0x263   : > { %v2084_v45 = vpop.f32.mrf.mxu0  ;;  %v2091_v46 = vpop.f32.mrf.mxu1 }
 0x264   : > { %v805_v47 = vpack.c.bf16 %v800_v44, %v800_v44 }
 0x265   : > { %v802_v48 = vpop.f32.mrf.mxu1 }
 0x266   : > { %806 = vst.msk [vmem:[#allocation3 + $0x4] sm:$0xf] %vm669_vm2, %v805_v47  ;;  %693 = vrot.lane.b32.xlu0 %v668_v41, %s2587_s14  ;;  %683 = vrot.lane.b32.xlu1 %v668_v41, %s2588_s23 }
 0x267   : > { %v2092_v49 = vpop.f32.mrf.mxu1 }
 0x26a   : > { %703 = vrot.lane.b32.xlu0 %v668_v41, %s2589_s24  ;;  %688 = vrot.lane.b32.xlu1 %v668_v41, %s2590_s20 }
 0x26e   : > { %698 = vrot.lane.b32.xlu1 %v668_v41, %s2591_s29  ;;  %814 = vrot.lane.b32.xlu0 %v805_v47, %s2586_s30 }
 0x272   : > { %822 = vrot.lane.b32.xlu0 %v805_v47, %s2590_s20  ;;  %810 = vrot.lane.b32.xlu1 %v805_v47, %s2585_s26 }
 0x276   : > { %830 = vrot.lane.b32.xlu0 %v805_v47, %s2591_s29  ;;  %818 = vrot.lane.b32.xlu1 %v805_v47, %s2588_s23 }
 0x27a   : > { %826 = vrot.lane.b32.xlu1 %v805_v47, %s2587_s14 }
 0x27e   : > { %834 = vrot.lane.b32.xlu1 %v805_v47, %s2589_s24 }
 0x2d4   : > { %v679_v50 = vpop.permute.xlu1 %678  ;;  %v675_v51 = vpop.permute.xlu0 %674 }
 0x2d5   : > { %682 = vst.msk [vmem:[#allocation3 + $0x8] sm:$0xf] %vm669_vm2, %v679_v50  ;;  %677 = vst.msk [vmem:[#allocation4] sm:$0xf] %vm669_vm2, %v675_v51 }
 0x2d8   : > { %v684_v52 = vpop.permute.xlu1 %683  ;;  %v694_v53 = vpop.permute.xlu0 %693 }
 0x2d9   : > { %687 = vst.msk [vmem:[#allocation4 + $0x8] sm:$0xf] %vm669_vm2, %v684_v52  ;;  %697 = vst.msk [vmem:[#allocation4 + $0x10] sm:$0xf] %vm669_vm2, %v694_v53 }
 0x2dc   : > { %v689_v54 = vpop.permute.xlu1 %688  ;;  %v704_v55 = vpop.permute.xlu0 %703 }
 0x2dd   : > { %692 = vst.msk [vmem:[#allocation3 + $0x10] sm:$0xf] %vm669_vm2, %v689_v54  ;;  %707 = vst.msk [vmem:[#allocation4 + $0x18] sm:$0xf] %vm669_vm2, %v704_v55 }
 0x2e0   : > { %v699_v56 = vpop.permute.xlu1 %698  ;;  %v815_v57 = vpop.permute.xlu0 %814 }
 0x2e1   : > { %702 = vst.msk [vmem:[#allocation3 + $0x18] sm:$0xf] %vm669_vm2, %v699_v56  ;;  %817 = vst.msk [vmem:[#allocation3 + $0xc] sm:$0xf] %vm669_vm2, %v815_v57 }
 0x2e4   : > { %v811_v58 = vpop.permute.xlu1 %810  ;;  %v823_v59 = vpop.permute.xlu0 %822 }
 0x2e5   : > { %813 = vst.msk [vmem:[#allocation4 + $0x4] sm:$0xf] %vm669_vm2, %v811_v58  ;;  %825 = vst.msk [vmem:[#allocation3 + $0x14] sm:$0xf] %vm669_vm2, %v823_v59 }
 0x2e8   : > { %v819_v60 = vpop.permute.xlu1 %818  ;;  %v831_v61 = vpop.permute.xlu0 %830 }
 0x2e9   : > { %821 = vst.msk [vmem:[#allocation4 + $0xc] sm:$0xf] %vm669_vm2, %v819_v60  ;;  %833 = vst.msk [vmem:[#allocation3 + $0x1c] sm:$0xf] %vm669_vm2, %v831_v61 }
 0x2ec   : > { %v827_v62 = vpop.permute.xlu1 %826 }
 0x2ed   : > { %829 = vst.msk [vmem:[#allocation4 + $0x14] sm:$0xf] %vm669_vm2, %v827_v62 }
 0x2f0   : > { %v835_v63 = vpop.permute.xlu1 %834 }
 0x2f1   : > { %837 = vst.msk [vmem:[#allocation4 + $0x1c] sm:$0xf] %vm669_vm2, %v835_v63 }
 0x2f2 PF: > { %s1986_s16 = sshll.u32 %s2559_s21, 3  ;;  %vm843_vm3 = vcmask 261120   ;;  %v2329_v7 = vld [vmem:[%s3070_s3 + $0x8] sm:$0xff]   ;;  %v2592_v8 = vmov 0.0   ;;  %vm2593_vm4 = vmmov 0   ;;  %v2330_v9 = vld [vmem:[%s3070_s3] sm:$0xff]  }
 0x2f3   : > { %s839_s28 = scalar_lea.vmem %s2832_s27, %s1986_s16  ;;  %2093 = vmatprep.subr.bf16.mxu1 %v2592_v8  ;;  %2097 = vmatprep.mubr.msk.bf16.mxu1 %vm2593_vm4, %v2592_v8  ;;  %v1987_v14 = vld [vmem:[%s3068_s1] ss:$0 sm:$0xff]  ;;  %v2331_v20 = vld [vmem:[#allocation3] sm:$0xff]   ;;  %vm985_vm5 = vcmask 64512   ;;  %v2332_v22 = vld [vmem:[#allocation3 + $0x8] sm:$0xff]   ;;  %vm940_vm6 = vcmask 60416  }
 0x2f4   : > { %v2871_v0 = vld [vmem:[%s839_s28] sm:$0xff]  ;;  %2094 = vmatpush3.bf16.msra.mxu1 %v2329_v7  ;;  %2107 = vmatprep.subr.bf16.mxu0 %v2592_v8  ;;  %v990_v21 = vsel %vm985_vm5, %v2331_v20, 0  ;;  %v1041_v23 = vsel %vm985_vm5, %v2332_v22, 0  ;;  %s2594_s26 = smov 104   ;;  %s2595_s30 = smov 120   ;;  %v2334_v36 = vld [vmem:[#allocation3 + $0x18] sm:$0xff]  }
 0x2f5   : > { %v844_v1 = vsel %vm843_vm3, %v2871_v0, 0.0  ;;  %2095 = vmatprep.subr.bf16.mxu1 %v2592_v8  ;;  %2109 = vmatprep.mubr.msk.bf16.mxu0 %vm2593_vm4, %v2592_v8  ;;  %v1988_v16 = vld [vmem:[%s3069_s2] ss:$0 sm:$0xff]  ;;  %s2596_s27 = smov 112   ;;  %v1143_v38 = vsel %vm985_vm5, %v2334_v36, 0  ;;  %vm1185_vm7 = vcmask 130048  }
 0x2f6   : > { %845 = vadd.xlane.f32.xlu0 %v844_v1  ;;  %2108 = vmatpush3.bf16.xpose.msra.mxu0 %v1041_v23  ;;  %v1989_v24 = vld [vmem:[%s3071_s4] ss:$0 sm:$0xff]  ;;  %v2335_v47 = vld [vmem:[#allocation4] sm:$0xff]   ;;  %v2336_v1 = vld [vmem:[#allocation4 + $0x8] sm:$0xff]   ;;  %vm1438_vm8 = vcmask 1043456   ;;  %vm1778_vm9 = vcmask 523264  }
 0x2f7   : > { %2119 = vmatprep.subr.bf16.mxu0 %v2592_v8  ;;  %v2333_v31 = vld [vmem:[#allocation3 + $0x10] sm:$0xff]   ;;  %s2028_s16 = sshll.u32 %s2563_s22, 1  ;;  %s3112_s14 = sld [smem:[#allocation28_spill]] }
 0x2f8   : > { %2096 = vmatpush3.bf16.msra.mxu1 %v2330_v9  ;;  %v1092_v32 = vsel %vm985_vm5, %v2333_v31, 0  ;;  %s1836_s28 = sadd.s32 %s2559_s21, %s2028_s16  ;;  %s1840_s24 = sshll.u32 %s558_s13, 4  ;;  %s3012_s24 = int_to_ptr.vmem [resolvable:$true] %s1840_s24 }
 0x2f9   : > { %2101 = vmatprep.subr.bf16.mxu1 %v2592_v8  ;;  %s2029_s23 = sshll.u32 %s1836_s28, 7  ;;  %s3113_s15 = sld [smem:[#allocation29_spill]] }
 0x2fa   : > { %s3114_s21 = sand.u32 1, %s2551_s19   ;;  %s2471_s16 = scalar_lea.vmem %s3012_s24, 128 }
 0x2fb   : > { %s1825_s22 = scalar_lea.sflag [#allocation7], %s3114_s21  ;;  %p2472_p0 = scmp.ne.s32.totalorder %s3012_s24, %s2471_s16 }
 0x2fc   : > { %s2597_s28 = smov [#allocation13]  }
 0x2fd   : > { %p2473_p1 = pnand %p2472_p0, %p2730_p3 }
 0x2ff   : > { %s3010_s0 = scalar_lea.hbm %s3113_s15, %s2029_s23  ;;  %p2474_p4 = pneg %p2473_p1 }
 0x37f   : > { %v846_v2 = vpop.xlane.xlu0 %845 }
 0x380   : > { %v848_v3 = vmul.f32 0.03125, %v846_v2 }
 0x382   : > { %v849_v4 = vsub.f32 %v2871_v0, %v848_v3 }
 0x384   : > { %v850_v5 = vmul.f32 %v849_v4, %v849_v4 }
 0x386   : > { %v851_v6 = vsel %vm843_vm3, %v850_v5, 0.0  ;;  %v2337_v5 = vld [vmem:[#allocation4 + $0x10] sm:$0xff]  }
 0x387   : > { %852 = vadd.xlane.f32.xlu0 %v851_v6 }
 0x410   : > { %v853_v10 = vpop.xlane.xlu0 %852 }
 0x411   : > { %v854_v11 = vmul.f32 0.03125, %v853_v10 }
 0x413   : > { %v855_v12 = vadd.f32 1e-05, %v854_v11 }
 0x415   : > { %2345 = vrsqrt.f32 %v855_v12 }
 0x422   : > { %v2346_v13 = vpop.eup %2345 }
 0x423   : > { %v857_v15 = vmul.f32 %v2346_v13, %v849_v4 }
 0x425   : > { %v864_v17 = vmul.f32 %v1987_v14, %v857_v15 }
 0x427   : > { %v871_v18 = vadd.f32 %v1988_v16, %v864_v17 }
 0x429   : > { %v872_v19 = vpack.c.bf16 %v871_v18, %v871_v18  ;;  %v2338_v18 = vld [vmem:[#allocation4 + $0x18] sm:$0xff]  }
 0x42b   : > { %2098 = vmatmul.mubr.msk.bf16.vlgmr.msra.gmra.mxu1 %vm843_vm3, %v872_v19 }
 0x42c   : > { %2103 = vmatprep.mubr.msk.bf16.mxu1 %vm2593_vm4, %v2592_v8  ;;  %2102 = vmatpush3.bf16.xpose.msra.mxu1 %v990_v21 }
 0x42d   : > { %2113 = vmatprep.subr.bf16.mxu1 %v2592_v8 }
 0x4eb   : > { %v933_v25 = vpop.f32.mrf.mxu1 }
 0x4ec   : > { %v934_v26 = vadd.f32 %v1989_v24, %v933_v25 }
 0x4ed   : > { %v2099_v27 = vpop.f32.mrf.mxu1 }
 0x4ee   : > { %v939_v28 = vpack.c.bf16 %v934_v26, %v934_v26 }
 0x4ef   : > { %v936_v29 = vpop.f32.mrf.mxu1 }
 0x4f0   : > { %941 = vst.msk [vmem:[#allocation2] sm:$0xf] %vm940_vm6, %v939_v28  ;;  %955 = vrot.lane.b32.xlu0 %v939_v28, %s2594_s26  ;;  %945 = vrot.lane.b32.xlu1 %v939_v28, %s2595_s30  ;;  %s3111_s30 = sld [smem:[#allocation27_spill]]  ;;  %s2475_s26 = sshll.u32 %s2597_s28, 4  ;;  %s2476_s26 = int_to_ptr.vmem [resolvable:$false] %s2475_s26 }
 0x4f1   : > { %v2100_v30 = vpop.f32.mrf.mxu1  ;;  %p2478_p6 = scmp.lt.s32.totalorder %s3012_s24, %s2476_s26 }
 0x4f2   : > { %v1434_v30 = vld [vmem:[#allocation8 + $0x4] sm:$0xf] }
 0x4f3   : > { %v1440_v31 = vsel %vm1438_vm8, %v1434_v30, 0 }
 0x4f4   : > { %950 = vrot.lane.b32.xlu1 %v939_v28, %s2596_s27  ;;  %v1431_v28 = vld [vmem:[#allocation8] sm:$0xf]  ;;  %s2477_s27 = scalar_lea.vmem %s2476_s26, 256 }
 0x4f5   : > { %v1486_v29 = vsel %vm1438_vm8, %v1431_v28, 0  ;;  %p2479_p7 = scmp.lt.s32.totalorder %s2477_s27, %s2471_s16 }
 0x4f7   : > { %v960_v33 = vld [vmem:[#allocation2] sm:$0xf]  ;;  %p2480_p8 = por %p2479_p7, %p2478_p6 }
 0x4f8   : > { %2104 = vmatmul.mubr.msk.bf16.vlgmr.msra.gmra.mxu1 %vm985_vm5, %v960_v33 }
 0x4f9   : > { %2114 = vmatpush3.bf16.xpose.msra.mxu1 %v1092_v32  ;;  %2115 = vmatprep.mubr.msk.bf16.mxu1 %vm2593_vm4, %v2592_v8  ;;  %p2481_p9 = pnand %p2480_p8, %p2474_p4 }
 0x4fa   : > { %2125 = vmatprep.subr.bf16.mxu1 %v2592_v8 }
 0x562   : > { %v956_v34 = vpop.permute.xlu0 %955  ;;  %v946_v35 = vpop.permute.xlu1 %945 }
 0x563   : > { %959 = vst.msk [vmem:[#allocation2 + $0xc] sm:$0xf] %vm940_vm6, %v956_v34  ;;  %949 = vst.msk [vmem:[#allocation2 + $0x4] sm:$0xf] %vm940_vm6, %v946_v35 }
 0x566   : > { %v951_v37 = vpop.permute.xlu1 %950 }
 0x567   : > { %954 = vst.msk [vmem:[#allocation2 + $0x8] sm:$0xf] %vm940_vm6, %v951_v37 }
 0x56a   : > { %v961_v39 = vld [vmem:[#allocation2 + $0x4] sm:$0xf]  ;;  %v963_v41 = vld [vmem:[#allocation2 + $0xc] sm:$0xf] }
 0x56b   : > { %2110 = vmatmul.mubr.msk.bf16.vlgmr.msra.gmra.mxu0 %vm985_vm5, %v961_v39  ;;  %v1580_v39 = vld [vmem:[#allocation8 + $0xc] sm:$0xf] }
 0x56c   : > { %2120 = vmatpush3.bf16.xpose.msra.mxu0 %v1143_v38  ;;  %2121 = vmatprep.mubr.msk.bf16.mxu0 %vm2593_vm4, %v2592_v8 }
 0x56d   : > { %2131 = vmatprep.subr.bf16.mxu0 %v2592_v8 }
 0x56e   : > { %v962_v40 = vld [vmem:[#allocation2 + $0x8] sm:$0xf] }
 0x56f   : > { %2116 = vmatmul.mubr.msk.bf16.vlgmr.msra.gmra.mxu1 %vm985_vm5, %v962_v40 }
 0x570   : > { %2127 = vmatprep.mubr.msk.bf16.mxu1 %vm2593_vm4, %v2592_v8  ;;  %2126 = vmatpush3.bf16.msra.mxu1 %v2335_v47  ;;  %v1530_v47 = vld [vmem:[#allocation8 + $0x8] sm:$0xf] }
 0x571   : > { %2137 = vmatprep.subr.bf16.mxu1 %v2592_v8 }
 0x573   : > { %2122 = vmatmul.mubr.msk.bf16.vlgmr.msra.gmra.mxu0 %vm985_vm5, %v963_v41 }
 0x574   : > { %2133 = vmatprep.mubr.msk.bf16.mxu0 %vm2593_vm4, %v2592_v8  ;;  %2132 = vmatpush3.bf16.msra.mxu0 %v2336_v1 }
 0x575   : > { %2143 = vmatprep.subr.bf16.mxu0 %v2592_v8 }
 0x5b8   : > { %v1026_v42 = vpop.f32.mrf.mxu1 }
 0x5b9   : > { %v1186_v43 = vsel %vm1185_vm7, %v1026_v42, -inf }
 0x5ba   : > { %1187 = vmax.xlane.f32.xlu1 %v1186_v43  ;;  %v2105_v44 = vpop.f32.mrf.mxu1 }
 0x5bc   : > { %v1029_v45 = vpop.f32.mrf.mxu1 }
 0x5be   : > { %v2106_v46 = vpop.f32.mrf.mxu1 }
 0x62b   : > { %v1077_v48 = vpop.f32.mrf.mxu0 }
 0x62c   : > { %v1189_v49 = vsel %vm1185_vm7, %v1077_v48, -inf }
 0x62d   : > { %1190 = vmax.xlane.f32.xlu0 %v1189_v49  ;;  %v2111_v50 = vpop.f32.mrf.mxu0 }
 0x62f   : > { %v1080_v51 = vpop.f32.mrf.mxu0  ;;  %v1128_v52 = vpop.f32.mrf.mxu1 }
 0x630   : > { %v1192_v53 = vsel %vm1185_vm7, %v1128_v52, -inf  ;;  %v1535_v51 = vsel %vm1438_vm8, %v1530_v47, 0  ;;  %v2343_v47 = vld [vmem:[%s3111_s30 + $0x8] sm:$0xff]  }
 0x631   : > { %v2112_v54 = vpop.f32.mrf.mxu0  ;;  %1193 = vmax.xlane.f32.xlu1 %v1192_v53  ;;  %v2117_v55 = vpop.f32.mrf.mxu1 }
 0x633   : > { %v1131_v56 = vpop.f32.mrf.mxu1  ;;  %v1179_v57 = vpop.f32.mrf.mxu0 }
 0x634   : > { %v1195_v58 = vsel %vm1185_vm7, %v1179_v57, -inf }
 0x635   : > { %v2123_v59 = vpop.f32.mrf.mxu0  ;;  %1196 = vmax.xlane.f32.xlu1 %v1195_v58  ;;  %v2118_v60 = vpop.f32.mrf.mxu1 }
 0x637   : > { %v1182_v61 = vpop.f32.mrf.mxu0 }
 0x639   : > { %v2124_v62 = vpop.f32.mrf.mxu0 }
 0x643   : > { %v1188_v63 = vpop.xlane.xlu1 %1187 }
 0x644   : > { %v1198_v2 = vsub.f32 %v1026_v42, %v1188_v63  ;;  %v1585_v42 = vsel %vm1438_vm8, %v1580_v39, 0  ;;  %v2015_v39 = vld [vmem:[%s3076_s9] ss:$0 sm:$0xff] }
 0x646   : > { %v1202_v3 = vmul.f32 1.442695, %v1198_v2 }
 0x648   : > { %2347 = vpow2.f32 %v1202_v3 }
 0x655   : > { %v2348_v4 = vpop.eup %2347 }
 0x656   : > { %v1222_v6 = vpack.c.bf16 %v2348_v4, %v2348_v4  ;;  %v1210_v22 = vsel %vm1185_vm7, %v2348_v4, 0.0 }
 0x658   : > { %2128 = vmatmul.mubr.msk.bf16.vlgmr.msra.gmra.mxu1 %vm1185_vm7, %v1222_v6 }
 0x659   : > { %2138 = vmatpush3.bf16.msra.mxu1 %v2337_v5  ;;  %2139 = vmatprep.mubr.msk.bf16.mxu1 %vm2593_vm4, %v2592_v8 }
 0x65a   : > { %2149 = vmatprep.subr.bf16.mxu1 %v2592_v8 }
 0x6b6   : > { %v1191_v7 = vpop.xlane.xlu0 %1190 }
 0x6b7   : > { %v1199_v9 = vsub.f32 %v1077_v48, %v1191_v7 }
 0x6b9   : > { %v1204_v10 = vmul.f32 1.442695, %v1199_v9 }
 0x6ba   : > { %v1194_v11 = vpop.xlane.xlu1 %1193 }
 0x6bb   : > { %2349 = vpow2.f32 %v1204_v10  ;;  %v1200_v12 = vsub.f32 %v1128_v52, %v1194_v11 }
 0x6bd   : > { %v1206_v13 = vmul.f32 1.442695, %v1200_v12 }
 0x6be   : > { %v1197_v14 = vpop.xlane.xlu1 %1196 }
 0x6bf   : > { %2351 = vpow2.f32 %v1206_v13  ;;  %v1201_v15 = vsub.f32 %v1179_v57, %v1197_v14 }
 0x6c1   : > { %v1208_v16 = vmul.f32 1.442695, %v1201_v15 }
 0x6c3   : > { %2353 = vpow2.f32 %v1208_v16 }
 0x6c8   : > { %v2350_v17 = vpop.eup %2349 }
 0x6c9   : > { %v1213_v19 = vsel %vm1185_vm7, %v2350_v17, 0.0  ;;  %v1223_v20 = vpack.c.bf16 %v2350_v17, %v2350_v17 }
 0x6ca   : > { %1214 = vadd.xlane.f32.xlu1 %v1213_v19 }
 0x6cb   : > { %2134 = vmatmul.mubr.msk.bf16.vlgmr.msra.gmra.mxu0 %vm1185_vm7, %v1223_v20 }
 0x6cc   : > { %v2352_v21 = vpop.eup %2351  ;;  %2144 = vmatpush3.bf16.msra.mxu0 %v2338_v18  ;;  %2145 = vmatprep.mubr.msk.bf16.mxu0 %vm2593_vm4, %v2592_v8  ;;  %v2014_v18 = vld [vmem:[%s3075_s8] ss:$0 sm:$0xff] }
 0x6cd   : > { %v1224_v23 = vpack.c.bf16 %v2352_v21, %v2352_v21  ;;  %2155 = vmatprep.subr.bf16.mxu0 %v2592_v8  ;;  %v1216_v25 = vsel %vm1185_vm7, %v2352_v21, 0.0 }
 0x6ce   : > { %1211 = vadd.xlane.f32.xlu1 %v1210_v22 }
 0x6cf   : > { %2140 = vmatmul.mubr.msk.bf16.vlgmr.msra.gmra.mxu1 %vm1185_vm7, %v1224_v23 }
 0x6d0   : > { %v2354_v24 = vpop.eup %2353  ;;  %2151 = vmatprep.mubr.msk.bf16.mxu1 %vm2593_vm4, %v2592_v8  ;;  %2150 = vmatpush3.bf16.msra.mxu1 %v1440_v31 }
 0x6d1   : > { %v1219_v26 = vsel %vm1185_vm7, %v2354_v24, 0.0  ;;  %v1225_v27 = vpack.c.bf16 %v2354_v24, %v2354_v24  ;;  %2161 = vmatprep.subr.bf16.mxu1 %v2592_v8 }
 0x6d2   : > { %1217 = vadd.xlane.f32.xlu1 %v1216_v25  ;;  %1220 = vadd.xlane.f32.xlu0 %v1219_v26 }
 0x6d3   : > { %2146 = vmatmul.mubr.msk.bf16.vlgmr.msra.gmra.mxu0 %vm1185_vm7, %v1225_v27 }
 0x6d4   : > { %2157 = vmatprep.mubr.msk.bf16.mxu0 %vm2593_vm4, %v2592_v8  ;;  %2156 = vmatpush3.bf16.msra.mxu0 %v1486_v29 }
 0x6d5   : > { %2167 = vmatprep.subr.bf16.mxu0 %v2592_v8 }
 0x718   : > { %v1269_v32 = vpop.f32.mrf.mxu1 }
 0x71a   : > { %v2129_v33 = vpop.f32.mrf.mxu1 }
 0x71c   : > { %v1272_v34 = vpop.f32.mrf.mxu1 }
 0x71d   : > { %v2339_v34 = vld [vmem:[#allocation10 + $0x8] sm:$0xff]  }
 0x71e   : > { %v2130_v35 = vpop.f32.mrf.mxu1 }
 0x71f   : > { %v2340_v35 = vld [vmem:[#allocation10] sm:$0xff]  }
 0x753   : > { %v1215_v36 = vpop.xlane.xlu1 %1214 }
 0x757   : > { %v1212_v37 = vpop.xlane.xlu1 %1211 }
 0x758   : > { %2355 = vrcp.f32 %v1212_v37 }
 0x759   : > { %2357 = vrcp.f32 %v1215_v36 }
 0x75b   : > { %v1218_v43 = vpop.xlane.xlu1 %1217  ;;  %v1221_v44 = vpop.xlane.xlu0 %1220 }
 0x75c   : > { %2359 = vrcp.f32 %v1218_v43 }
 0x75d   : > { %2361 = vrcp.f32 %v1221_v44 }
 0x765   : > { %v2356_v38 = vpop.eup %2355 }
 0x766   : > { %v1426_v40 = vmul.f32 %v2356_v38, %v1269_v32  ;;  %v2358_v45 = vpop.eup %2357 }
 0x768   : > { %v1430_v41 = vpack.c.bf16 %v1426_v40, %v1426_v40 }
 0x769   : > { %v2360_v54 = vpop.eup %2359 }
 0x76a   : > { %2158 = vmatmul.mubr.msk.bf16.vlgmr.msra.gmra.mxu0 %vm985_vm5, %v1430_v41  ;;  %v2362_v58 = vpop.eup %2361  ;;  %v2016_v41 = vld [vmem:[%s3077_s10] ss:$0 sm:$0xff] }
 0x76b   : > { %2168 = vmatpush3.bf16.msra.mxu0 %v1585_v42  ;;  %2169 = vmatprep.mubr.msk.bf16.mxu0 %vm2593_vm4, %v2592_v8 }
 0x76c   : > { %2181 = vmatprep.subr.bf16.mxu0 %v2592_v8 }
 0x78b   : > { %v1318_v46 = vpop.f32.mrf.mxu0 }
 0x78c   : > { %v1427_v48 = vmul.f32 %v2358_v45, %v1318_v46  ;;  %v2341_v45 = vld [vmem:[%s3111_s30 + $0x18] sm:$0xff]   ;;  %v2342_v46 = vld [vmem:[%s3111_s30 + $0x10] sm:$0xff]  }
 0x78d   : > { %v2135_v49 = vpop.f32.mrf.mxu0 }
 0x78e   : > { %v1432_v50 = vpack.c.bf16 %v1427_v48, %v1427_v48  ;;  %v2344_v48 = vld [vmem:[%s3111_s30] sm:$0xff]  }
 0x78f   : > { %v1321_v52 = vpop.f32.mrf.mxu0  ;;  %v1367_v53 = vpop.f32.mrf.mxu1  ;;  %v2017_v49 = vld [vmem:[#allocation11] ss:$0 sm:$0xff] }
 0x790   : > { %2152 = vmatmul.mubr.msk.bf16.vlgmr.msra.gmra.mxu1 %vm985_vm5, %v1432_v50  ;;  %v1428_v57 = vmul.f32 %v2360_v54, %v1367_v53 }
 0x791   : > { %2162 = vmatpush3.bf16.msra.mxu1 %v1535_v51  ;;  %v2136_v55 = vpop.f32.mrf.mxu0  ;;  %v2141_v56 = vpop.f32.mrf.mxu1  ;;  %2163 = vmatprep.mubr.msk.bf16.mxu1 %vm2593_vm4, %v2592_v8 }
 0x792   : > { %2173 = vmatprep.subr.bf16.mxu1 %v2592_v8  ;;  %v1528_v1 = vpack.c.bf16 %v1428_v57, %v1428_v57 }
 0x793   : > { %v1370_v59 = vpop.f32.mrf.mxu1  ;;  %v1416_v60 = vpop.f32.mrf.mxu0 }
 0x794   : > { %v1429_v61 = vmul.f32 %v2362_v58, %v1416_v60  ;;  %v2021_v60 = vld [vmem:[%s3112_s14] ss:$0 sm:$0xff] }
 0x795   : > { %v2142_v62 = vpop.f32.mrf.mxu1  ;;  %v2147_v63 = vpop.f32.mrf.mxu0 }
 0x796   : > { %v1578_v2 = vpack.c.bf16 %v1429_v61, %v1429_v61 }
 0x797   : > { %v1419_v3 = vpop.f32.mrf.mxu0 }
 0x798   : > { %2164 = vmatmul.mubr.msk.bf16.vlgmr.msra.gmra.mxu1 %vm985_vm5, %v1528_v1  ;;  %2170 = vmatmul.mubr.msk.bf16.vlgmr.msra.gmra.mxu0 %vm985_vm5, %v1578_v2 }
 0x799   : > { %v2148_v4 = vpop.f32.mrf.mxu0  ;;  %2177 = vmatprep.mubr.msk.bf16.mxu1 %vm2593_vm4, %v2592_v8  ;;  %2189 = vmatprep.mubr.msk.bf16.mxu0 %vm2593_vm4, %v2592_v8 }
 0x79a   : > { %2174 = vmatpush3.bf16.msra.mxu1 %v2339_v34  ;;  %2182 = vmatpush3.bf16.msra.mxu0 %v2341_v45 }
 0x79b   : > { %2175 = vmatprep.subr.bf16.mxu1 %v2592_v8  ;;  %2183 = vmatprep.subr.bf16.mxu0 %v2592_v8 }
 0x79e   : > { %2176 = vmatpush3.bf16.msra.mxu1 %v2340_v35  ;;  %2184 = vmatpush3.bf16.msra.mxu0 %v2342_v46 }
 0x79f   : > { %2185 = vmatprep.subr.bf16.mxu0 %v2592_v8 }
 0x7a2   : > { %2186 = vmatpush3.bf16.msra.mxu0 %v2343_v47 }
 0x7a3   : > { %2187 = vmatprep.subr.bf16.mxu0 %v2592_v8 }
 0x7a6   : > { %2188 = vmatpush3.bf16.msra.mxu0 %v2344_v48 }
 0x82a   : > { %v1522_v5 = vpop.f32.mrf.mxu0 }
 0x82c   : > { %v2159_v6 = vpop.f32.mrf.mxu0 }
 0x82e   : > { %v1525_v7 = vpop.f32.mrf.mxu0 }
 0x830   : > { %v2160_v9 = vpop.f32.mrf.mxu0 }
 0x850   : > { %v1476_v10 = vpop.f32.mrf.mxu1 }
 0x851   : > { %v1523_v14 = vadd.f32 %v1522_v5, %v1476_v10 }
 0x852   : > { %v2153_v11 = vpop.f32.mrf.mxu1 }
 0x854   : > { %v1479_v12 = vpop.f32.mrf.mxu1 }
 0x856   : > { %v2154_v13 = vpop.f32.mrf.mxu1 }
 0x858   : > { %v1571_v15 = vpop.f32.mrf.mxu1  ;;  %v1621_v16 = vpop.f32.mrf.mxu0 }
 0x859   : > { %v1577_v17 = vadd.f32 %v1571_v15, %v1523_v14 }
 0x85a   : > { %v2165_v19 = vpop.f32.mrf.mxu1  ;;  %v2171_v20 = vpop.f32.mrf.mxu0 }
 0x85b   : > { %v1627_v21 = vadd.f32 %v1621_v16, %v1577_v17 }
 0x85c   : > { %v1574_v22 = vpop.f32.mrf.mxu1  ;;  %v1624_v23 = vpop.f32.mrf.mxu0 }
 0x85d   : > { %v1635_v24 = vadd.f32 %v2014_v18, %v1627_v21 }
 0x85e   : > { %v2166_v25 = vpop.f32.mrf.mxu1  ;;  %v2172_v26 = vpop.f32.mrf.mxu0 }
 0x85f   : > { %v1636_v27 = vadd.f32 %v1635_v24, %v2871_v0 }
 0x861   : > { %v1639_v28 = vsel %vm843_vm3, %v1636_v27, 0.0 }
 0x862   : > { %1640 = vadd.xlane.f32.xlu1 %v1639_v28 }
 0x8eb   : > { %v1641_v29 = vpop.xlane.xlu1 %1640 }
 0x8ec   : > { %v1642_v30 = vmul.f32 0.03125, %v1641_v29 }
 0x8ee   : > { %v1643_v31 = vsub.f32 %v1636_v27, %v1642_v30 }
 0x8f0   : > { %v1644_v32 = vmul.f32 %v1643_v31, %v1643_v31 }
 0x8f2   : > { %v1645_v33 = vsel %vm843_vm3, %v1644_v32, 0.0 }
 0x8f3   : > { %1646 = vadd.xlane.f32.xlu0 %v1645_v33 }
 0x97c   : > { %v1647_v36 = vpop.xlane.xlu0 %1646 }
 0x97d   : > { %v1648_v37 = vmul.f32 0.03125, %v1647_v36 }
 0x97f   : > { %v1649_v38 = vadd.f32 1e-05, %v1648_v37 }
 0x981   : > { %2363 = vrsqrt.f32 %v1649_v38 }
 0x98e   : > { %v2364_v0 = vpop.eup %2363 }
 0x98f   : > { %v1651_v40 = vmul.f32 %v2364_v0, %v1643_v31 }
 0x991   : > { %v1658_v42 = vmul.f32 %v2015_v39, %v1651_v40 }
 0x993   : > { %v1665_v43 = vadd.f32 %v2016_v41, %v1658_v42 }
 0x995   : > { %v1666_v44 = vpack.c.bf16 %v1665_v43, %v1665_v43 }
 0x997   : > { %2178 = vmatmul.mubr.msk.bf16.vlgmr.msra.gmra.mxu1 %vm843_vm3, %v1666_v44 }
 0xa57   : > { %v1727_v50 = vpop.f32.mrf.mxu1 }
 0xa58   : > { %v1728_v51 = vadd.f32 %v2017_v49, %v1727_v50 }
 0xa59   : > { %v2179_v52 = vpop.f32.mrf.mxu1 }
 0xa5a   : > { %v1734_v53 = vmul.f32 0.70710677, %v1728_v51  ;;  %v1733_v57 = vmul.f32 0.5, %v1728_v51 }
 0xa5b   : > { %v1730_v54 = vpop.f32.mrf.mxu1 }
 0xa5c   : > { %2365 = verf.f32 %v1734_v53 }
 0xa5d   : > { %v2180_v55 = vpop.f32.mrf.mxu1 }
 0xa69   : > { %v2366_v56 = vpop.eup %2365 }
 0xa6a   : > { %v1736_v58 = vadd.f32 1.0, %v2366_v56 }
 0xa6c   : > { %v1737_v8 = vmul.f32 %v1736_v58, %v1733_v57 }
 0xa6e   : > { %v1738_v59 = vpack.c.bf16 %v1737_v8, %v1737_v8 }
 0xa70   : > { %2190 = vmatmul.mubr.msk.bf16.vlgmr.msra.gmra.mxu0 %vm1778_vm9, %v1738_v59 }
 0xb30   : > { %v1816_v61 = vpop.f32.mrf.mxu0 }
 0xb31   : > { %v1817_v62 = vadd.f32 %v2021_v60, %v1816_v61 }
 0xb32   : > { %v2191_v63 = vpop.f32.mrf.mxu0 }
 0xb33   : > { %v1822_v1 = vadd.f32 %v1817_v62, %v1636_v27 }
 0xb34   : > { %v1819_v2 = vpop.f32.mrf.mxu0 }
 0xb35   : > { %1823 = vst.msk [vmem:[%s558_s13] sm:$0xff] %vm843_vm3, %v1822_v1 }
 0xb36   : > { %v2192_v3 = vpop.f32.mrf.mxu0 }
 0xb37   : > { %2484 = shalt.err (!%p2481_p9)
}
 0xb38   : > { %s2485_s18 = scalar_lea.hbm %s3010_s0, 128  ;;  %s2489_s23 = scalar_lea.hbm %s3113_s15, 512 }
 0xb39   : > { %p2486_p11 = scmp.ne.s32.totalorder %s3010_s0, %s2485_s18  ;;  %p2490_p5 = scmp.lt.s32.totalorder %s3010_s0, %s3113_s15 }
 0xb3a   : > { %p2491_p10 = scmp.lt.s32.totalorder %s2489_s23, %s2485_s18 }
 0xb3b   : > { %p2487_p13 = pnand %p2486_p11, %p2730_p3 }
 0xb3c   : > { %p2492_p12 = por %p2491_p10, %p2490_p5 }
 0xb3d   : > { %p2488_p2 = pneg %p2487_p13 }
 0xb3f   : > { %p2493_p0 = pnand %p2492_p12, %p2488_p2 }
 0xb41   : > { %2496 = shalt.err (!%p2493_p0)
}
 0xb42   : > { %2209 = dma.vmem_to_hbm [thread:$0]  (%p2730_p3), %s3012_s24, 128, %s3010_s0, %s1825_s22  }
 0xb43 PF: > { %s3115_s21 = sld [smem:[#allocation18_spill]]  ;;  %p2236_p1 = scmp.ge.s32.totalorder %s2575_s25, 2 }
 0xb44   : > { %s3116_s16 = sld [smem:[#allocation24_spill]] }
 0xb49   : > { %s1852_s28 = sand.u32 1, %s3115_s21  }
 0xb4a   : > { %p3117_p4 = scmp.ne.s32.totalorder %s3116_s16, 0  ;;  %s1853_s26 = scalar_lea.sflag [#allocation7], %s1852_s28 }
 0xb4c   : > { %p2225_p6 = pnand %p2236_p1, %p3117_p4 }
 0xb4e   : > { %p2226_p7 = pneg %p2225_p6 }
 0xb50   : > { %2542 = dma.done.wait (%p2226_p7), %s1853_s26, 128  }
 0xb51   : > { %2544 = vsyncadd (%p2226_p7), %s1853_s26, 4294967168  ;;  %s31_s25 = sadd.s32 1, %s2575_s25   ;;  %s3118_s17 = sld [smem:[#allocation19_spill]] }
 0xb52   : > { %p28_p8 = scmp.ge.s32.totalorder %s31_s25, 6   ;;  %s3119_s20 = sld [smem:[#allocation25_spill]] }
 0xb53   : > { %s3120_s21 = sld [smem:[#allocation20_spill]]  ;;  %s3124_s18 = smov %s2551_s19 }
 0xb54   : > { %s3121_s22 = sld [smem:[#allocation21_spill]]  ;;  %30 = sbr.rel (!%p28_p8) target bundleno = 13 (0xd), region = 149 }
 0xb55   : > { %s3122_s23 = sld [smem:[#allocation22_spill]] }
 0xb56   : > { %s3123_s24 = sld [smem:[#allocation23_spill]] }
 0xb57   : > { %s3125_s19 = smov %s3118_s17 }
 0xb59   :  { %1858 = vsyncpa [#allocation6], 1 }
 0xb5a   :  { %1860 = vsyncpa [#allocation6 + $0x1], 1 }
 0xb5b   :  { %1861 = vsyncpa [#allocation9], 1 }
 0xb5c   :  { %1862 = vsyncpa [#allocation12], 1 }
 0xb5d   :  { %1863 = vsyncpa [#allocation7], 1 }
 0xb5e   :  { %1865 = vsyncpa [#allocation7 + $0x1], 1 }

</bundles_post_ra>
